<compile_context>
chip_gen: v7x
topology: tpu7x:2x2x1
jax: 0.10.0
libtpu: 0.0.40
codegen_flags: <defaults>
</compile_context>

<pallas_src>
import functools

import jax
import jax.numpy as jnp
from jax.experimental import pallas as pl
from jax.experimental.pallas import tpu as pltpu


def _activation(x, act):
    act = act.lower()
    if act in ("identity", "linear", "none"):
        return x
    if act == "relu":
        return jnp.maximum(x, 0.0)
    if act == "elu":
        return jnp.where(x > 0, x, jnp.exp(jnp.minimum(x, 0.0)) - 1.0)
    raise ValueError(f"unsupported activation: {act}")


def _sum_all(a):
    # [R, C] -> [1, 1]: lane reduce then sublane reduce.
    return jnp.sum(jnp.sum(a, axis=-1, keepdims=True), axis=0, keepdims=True)


def _bf16_dot(a, b):
    # MXU path: bf16 operands, f32 accumulation.
    return jnp.dot(a.astype(jnp.bfloat16), b.astype(jnp.bfloat16),
                   preferred_element_type=jnp.float32)


def _pairwise_l1(x, chunk=4):
    """d[i, j] = ||x_i - x_j||_1 without the [N, N, F] rank-3 intermediate.

    One transpose of x, then F lane-dense [N, N] VPU accumulations, grouped into
    feature chunks so the big accumulator is only updated F/chunk times (cuts
    vector-store traffic when it does not fit in vregs).  Peak VMEM stays O(N^2).
    F here is small & static, so the Python loops stay unrolled; switch to
    lax.fori_loop(..., unroll=4/8) if F grows well beyond ~32.
    """
    n, f = x.shape
    xt = x.T                                        # [F, N]  (nodes on lanes)
    acc = None
    for c0 in range(0, f, chunk):
        part = None
        for c in range(c0, min(c0 + chunk, f)):
            col = x[:, c:c + 1]                     # [N, 1]  (nodes on sublanes)
            row = xt[c:c + 1, :]                    # [1, N]  (nodes on lanes)
            t = jnp.abs(col - row)                  # dense [N, N] VPU work
            part = t if part is None else part + t
        acc = part if acc is None else acc + part
    return acc


# --------------------------- fused whole-net kernel ---------------------------
def _net_kernel(scal_ref, x_ref, adj_ref, *refs, n_mp, n_lin, k, idx,
                delta, eps, mp_act, mlp_act, totvar_coeff, balance_coeff):
    n_par = 2 * (n_mp + n_lin)
    par = refs[:n_par]
    s_ref, loss_ref = refs[n_par], refs[n_par + 1]

    inv_two_edges = scal_ref[0, 0]              # 1 / (2 * nnz(adj)), graph const
    adj = adj_ref[...]                          # [N, N], resident for whole net
    h = x_ref[...]                              # [N, F_in]

    # ---------------------- GTVConv message-passing stack ----------------------
    # mp weights arrive pre-augmented: w1 = [W | 0] (F_in, F+1), b1 = [b | 1],
    # so xl1 = h @ w1 + b1 carries a ones column and one MXU pass of
    # dot(gamma, xl1) produces both gamma @ xl and deg (= gamma @ 1).
    for li in range(n_mp):
        w1 = par[2 * li][...]                                          # [Fi, F+1]
        b1 = par[2 * li + 1][...]                                      # [1, F+1]
        f = w1.shape[1] - 1
        xl1 = _bf16_dot(h, w1) + b1                                    # [N, F+1]
        xl = xl1[:, :f]                                                # [N, F]
        d = _pairwise_l1(xl)                                           # [N, N]
        # divide -> EUP approx reciprocal (VALU is the saturating unit here)
        gamma = adj * pl.reciprocal(jnp.maximum(d, eps), approx=True)  # [N, N]
        agg = _bf16_dot(gamma, xl1)                                    # [N, F+1]
        gx = agg[:, :f]                                                # gamma @ xl
        deg = agg[:, f:f + 1]                                          # [N, 1]
        # L_Gamma @ xl = deg * xl - gamma @ xl
        h = _activation(xl - delta * (deg * xl - gx), mp_act)

    # ------------------------- pooler MLP + row softmax ------------------------
    off = 2 * n_mp
    for li in range(n_lin):
        w = par[off + 2 * li][...]
        b = par[off + 2 * li + 1][...]
        h = _bf16_dot(h, w) + b
        if li < n_lin - 1:
            h = _activation(h, mlp_act)
    m = jnp.max(h, axis=-1, keepdims=True)
    e = jnp.exp(h - m)
    sum_e = jnp.sum(e, axis=-1, keepdims=True)                         # [N, 1]
    # EUP approx reciprocal + one Newton step (cheap [N,1] VPU) -> near-exact rows
    r = pl.reciprocal(sum_e, approx=True)
    r = r * (2.0 - sum_e * r)
    s = e * r                                                          # [N, K]
    n = s.shape[0]
    st = s.T                                                           # [K, N]

    # -------- losses: K passes of [N, N] work, no [N, N, K] intermediates -------
    # TV: accumulate |s_ic - s_jc| over clusters, multiply by adj and reduce ONCE.
    l1_acc = jnp.zeros((n, n), jnp.float32)
    asym_sum = jnp.zeros((1, 1), jnp.float32)
    for c in range(k):
        col = s[:, c:c + 1]                     # [N, 1]
        row = st[c:c + 1, :]                    # [1, N]
        l1_acc = l1_acc + jnp.abs(col - row)    # [N, N]
        # per-cluster quantile via rank counting: min value of column c with
        # <= idx strictly-greater elements (same order-statistic semantics as
        # the previous version; differs from torch.quantile's interpolation
        # only when N/K does not land exactly on a rank).
        cnt_gt = jnp.sum((row > col).astype(jnp.float32), axis=-1,
                         keepdims=True)         # [N, 1]
        cand = jnp.where(cnt_gt <= float(idx), col, 2.0)   # s in [0, 1]
        quant_c = jnp.min(cand, axis=0, keepdims=True)     # [1, 1]
        diff = col - quant_c                                # [N, 1]
        asym = jnp.where(diff >= 0, (k - 1.0) * diff, -diff)
        asym_sum = asym_sum + _sum_all(asym)

    tv = _sum_all(adj * l1_acc) * inv_two_edges             # [1, 1]
    denom = float(max(n * (k - 1), 1))                      # guard k == 1
    bal = (denom - asym_sum) / denom                        # [1, 1]
    aux = totvar_coeff * tv + balance_coeff * bal

    # K=4 makes this a lane-masked store; negligible at demo size.  For large
    # fused graphs, write s transposed / lane-padded for an unmasked epilogue.
    s_ref[...] = s.astype(s_ref.dtype)
    loss_ref[...] = aux.astype(loss_ref.dtype)


def _vmem_budget(args, n):
    """Generation-aware VMEM limit: resident arrays + a few [N,N] temporaries."""
    vmem_arrays = sum(int(a.size) * a.dtype.itemsize for a in args[1:])
    # grid=() -> no double-buffering; budget d/gamma/l1_acc/mask-style temporaries.
    est = vmem_arrays + 8 * n * n * 4 + (1 << 20)
    try:
        cap = int(pltpu.get_tpu_info().vmem_capacity_bytes)
    except Exception:  # pragma: no cover - older jax / non-TPU trace fallback
        cap = 64 << 20
    # leave headroom for compiler-internal scratch (~15%)
    return int(min(max(est, 16 << 20), int(cap * 0.85)))


def net_forward_fused(params, x, adj, *, n_clusters, mp_act="elu",
                      mlp_act="identity", delta_coeff=0.311, eps=1e-3,
                      totvar_coeff=0.785, balance_coeff=0.514):
    n = x.shape[0]
    mp = params["mp"]
    pw, pb = params["pool_w"], params["pool_b"]
    n_mp, n_lin = len(mp), len(pw)
    idx = n // n_clusters  # same as the reference implementation

    # nnz(adj) is a graph constant: compute once here, pass 1/(2*nnz) via SMEM.
    n_edges = jnp.sum((adj != 0).astype(jnp.float32))
    inv_two_edges = (1.0 / (2.0 * jnp.maximum(n_edges, 1.0))
                     ).reshape(1, 1).astype(jnp.float32)

    args = [inv_two_edges, x, adj]
    # Augment mp weights with a zero column / unit bias so the kernel gets the
    # degree for free out of the gamma matmul (dot(gamma, [xl | 1])).
    for w, b in mp:
        w_aug = jnp.concatenate(
            [w, jnp.zeros((w.shape[0], 1), w.dtype)], axis=1)
        b_aug = jnp.concatenate([b, jnp.ones((1, 1), b.dtype)], axis=1)
        args += [w_aug, b_aug]
    for w, b in zip(pw, pb):
        args += [w, b]

    kern = functools.partial(
        _net_kernel, n_mp=n_mp, n_lin=n_lin, k=n_clusters, idx=idx,
        delta=delta_coeff, eps=eps, mp_act=mp_act, mlp_act=mlp_act,
        totvar_coeff=totvar_coeff, balance_coeff=balance_coeff)

    vmem_limit = _vmem_budget(args, n)

    in_specs = ([pl.BlockSpec(memory_space=pltpu.MemorySpace.SMEM)]
                + [pl.BlockSpec(memory_space=pltpu.MemorySpace.VMEM)]
                * (len(args) - 1))

    s, aux = pl.pallas_call(
        kern,
        out_shape=(jax.ShapeDtypeStruct((n, n_clusters), jnp.float32),
                   jax.ShapeDtypeStruct((1, 1), jnp.float32)),
        in_specs=in_specs,
        out_specs=(pl.BlockSpec(memory_space=pltpu.MemorySpace.VMEM),
                   pl.BlockSpec(memory_space=pltpu.MemorySpace.VMEM)),
        compiler_params=pltpu.CompilerParams(vmem_limit_bytes=vmem_limit),
    )(*args)
    return s, aux[0, 0]


# --------------------------------- Net glue ---------------------------------
def glorot(key, shape):
    limit = (6.0 / (shape[0] + shape[1])) ** 0.5
    return jax.random.uniform(key, shape, jnp.float32, -limit, limit)


def init_params(key, in_channels, mp_units, mlp_units, n_clusters):
    params = {"mp": [], "pool_w": [], "pool_b": []}
    dims = [in_channels] + list(mp_units)
    for i in range(len(mp_units)):
        key, kw = jax.random.split(key)
        params["mp"].append((glorot(kw, (dims[i], dims[i + 1])),
                             jnp.zeros((1, dims[i + 1]), jnp.float32)))
    pdims = [mp_units[-1]] + list(mlp_units) + [n_clusters]
    for i in range(len(pdims) - 1):
        key, kw = jax.random.split(key)
        params["pool_w"].append(glorot(kw, (pdims[i], pdims[i + 1])))
        params["pool_b"].append(jnp.zeros((1, pdims[i + 1]), jnp.float32))
    return params


def to_dense_adj(edge_index, edge_weight, num_nodes):
    # glue equivalent of torch_geometric.utils.to_dense_adj (batch of 1, squeezed)
    adj = jnp.zeros((num_nodes, num_nodes), jnp.float32)
    return adj.at[edge_index[0], edge_index[1]].add(edge_weight)


def net_forward(params, x, edge_index, edge_weight, *, n_clusters,
                mp_act="elu", mlp_act="identity", delta_coeff=0.311,
                totvar_coeff=0.785, balance_coeff=0.514):
    n = x.shape[0]
    adj = to_dense_adj(edge_index, edge_weight, n)
    return net_forward_fused(params, x, adj, n_clusters=n_clusters,
                             mp_act=mp_act, mlp_act=mlp_act,
                             delta_coeff=delta_coeff,
                             totvar_coeff=totvar_coeff,
                             balance_coeff=balance_coeff)


if __name__ == "__main__":
    key = jax.random.PRNGKey(0)
    N, F_IN = 16, 8
    MP_UNITS = [32, 32]   # two GTVConv layers, act='ELU'
    MLP_UNITS = []        # pooler MLP = single Linear(32 -> K), mlp_act='Identity'
    K = 4                 # n_clusters

    kx, kw, kp = jax.random.split(key, 3)
    x = jax.random.normal(kx, (N, F_IN), jnp.float32)

    # small deterministic undirected graph: ring + chords (both directions)
    src, dst = [], []
    for i in range(N):
        src += [i, (i + 1) % N]
        dst += [(i + 1) % N, i]
    for i in range(0, N, 2):
        j = (i + 5) % N
        src += [i, j]
        dst += [j, i]
    edge_index = jnp.array([src, dst], dtype=jnp.int32)
    ew = jax.random.uniform(kw, (edge_index.shape[1] // 2,), jnp.float32, 0.5, 1.5)
    edge_weight = jnp.repeat(ew, 2)  # symmetric weights

    params = init_params(kp, F_IN, MP_UNITS, MLP_UNITS, K)

    fwd = jax.jit(functools.partial(net_forward, n_clusters=K))
    s, aux_loss = fwd(params, x, edge_index, edge_weight)
    jax.block_until_ready((s, aux_loss))

    assert s.shape == (N, K)
    assert bool(jnp.all(jnp.isfinite(s))) and bool(jnp.isfinite(aux_loss))
    # rows of s must be valid softmax distributions (approx-recip + Newton step)
    assert bool(jnp.allclose(jnp.sum(s, axis=-1), 1.0, atol=1e-4))
    print("KERNEL_OK")
</pallas_src>

<mosaic_0001>
module attributes {stable_mosaic.version = 11 : i64} {
  func.func private @main(%arg0: i32) attributes {dimension_semantics = [#tpu.dimension_semantics<core_parallel>], iteration_bounds = array<i64: 2>, tpu.core_type = #tpu.core_type<sc_scalar_subcore>, window_params = []} {
    return
  }
}

module attributes {stable_mosaic.version = 11 : i64} {
  func.func private @main(%arg0: i32) attributes {dimension_semantics = [#tpu.dimension_semantics<core_parallel>], iteration_bounds = array<i64: 2>, tpu.core_type = #tpu.core_type<sc_scalar_subcore>, window_params = []} {
    return
  }
}

module attributes {stable_mosaic.version = 11 : i64} {
  func.func @_net_kernel(%arg0: memref<1x1xf32, #tpu.memory_space<smem>>, %arg1: memref<16x8xf32, #tpu.memory_space<vmem>>, %arg2: memref<16x16xf32, #tpu.memory_space<vmem>>, %arg3: memref<8x33xf32, #tpu.memory_space<vmem>>, %arg4: memref<1x33xf32, #tpu.memory_space<vmem>>, %arg5: memref<32x33xf32, #tpu.memory_space<vmem>>, %arg6: memref<1x33xf32, #tpu.memory_space<vmem>>, %arg7: memref<32x4xf32, #tpu.memory_space<vmem>>, %arg8: memref<1x4xf32, #tpu.memory_space<vmem>>, %arg9: memref<16x4xf32, #tpu.memory_space<vmem>>, %arg10: memref<1x1xf32, #tpu.memory_space<vmem>>) attributes {dimension_semantics = [], scalar_prefetch = 0 : i64, scratch_operands = 0 : i64, tpu.core_type = #tpu.core_type<tc>} {
    %c0 = arith.constant 0 : index
    %c0_0 = arith.constant 0 : index
    %0 = memref.load %arg0[%c0, %c0_0] : memref<1x1xf32, #tpu.memory_space<smem>>
    %c0_1 = arith.constant 0 : index
    %c0_2 = arith.constant 0 : index
    %1 = vector.load %arg2[%c0_1, %c0_2] : memref<16x16xf32, #tpu.memory_space<vmem>>, vector<16x16xf32>
    %c0_3 = arith.constant 0 : index
    %c0_4 = arith.constant 0 : index
    %2 = vector.load %arg1[%c0_3, %c0_4] : memref<16x8xf32, #tpu.memory_space<vmem>>, vector<16x8xf32>
    %c0_5 = arith.constant 0 : index
    %c0_6 = arith.constant 0 : index
    %3 = vector.load %arg3[%c0_5, %c0_6] : memref<8x33xf32, #tpu.memory_space<vmem>>, vector<8x33xf32>
    %c0_7 = arith.constant 0 : index
    %c0_8 = arith.constant 0 : index
    %4 = vector.load %arg4[%c0_7, %c0_8] : memref<1x33xf32, #tpu.memory_space<vmem>>, vector<1x33xf32>
    %5 = arith.truncf %2 : vector<16x8xf32> to vector<16x8xbf16>
    %6 = arith.truncf %3 : vector<8x33xf32> to vector<8x33xbf16>
    %cst = arith.constant dense<0.000000e+00> : vector<16x33xf32>
    %7 = tpu.matmul %5, %6, %cst {dimension_numbers = #tpu.dot_dimension_numbers<[1], [0], [0], [1], [0, 0, 1, 1], [], []>} : vector<16x8xbf16>, vector<8x33xbf16>, vector<16x33xf32> -> vector<16x33xf32>
    %8 = vector.broadcast %4 : vector<1x33xf32> to vector<16x33xf32>
    %9 = arith.addf %7, %8 : vector<16x33xf32>
    %10 = vector.extract_strided_slice %9 {offsets = [0, 0], sizes = [16, 32], strides = [1, 1]} : vector<16x33xf32> to vector<16x32xf32>
    %11 = tpu.transpose %10, [1, 0] : vector<16x32xf32> -> vector<32x16xf32>
    %12 = vector.extract_strided_slice %10 {offsets = [0, 0], sizes = [16, 1], strides = [1, 1]} : vector<16x32xf32> to vector<16x1xf32>
    %13 = vector.extract_strided_slice %11 {offsets = [0, 0], sizes = [1, 16], strides = [1, 1]} : vector<32x16xf32> to vector<1x16xf32>
    %14 = vector.broadcast %12 : vector<16x1xf32> to vector<16x16xf32>
    %15 = vector.broadcast %13 : vector<1x16xf32> to vector<16x16xf32>
    %16 = arith.subf %14, %15 : vector<16x16xf32>
    %17 = math.absf %16 : vector<16x16xf32>
    %18 = vector.extract_strided_slice %10 {offsets = [0, 1], sizes = [16, 1], strides = [1, 1]} : vector<16x32xf32> to vector<16x1xf32>
    %19 = vector.extract_strided_slice %11 {offsets = [1, 0], sizes = [1, 16], strides = [1, 1]} : vector<32x16xf32> to vector<1x16xf32>
    %20 = vector.broadcast %18 : vector<16x1xf32> to vector<16x16xf32>
    %21 = vector.broadcast %19 : vector<1x16xf32> to vector<16x16xf32>
    %22 = arith.subf %20, %21 : vector<16x16xf32>
    %23 = math.absf %22 : vector<16x16xf32>
    %24 = arith.addf %17, %23 : vector<16x16xf32>
    %25 = vector.extract_strided_slice %10 {offsets = [0, 2], sizes = [16, 1], strides = [1, 1]} : vector<16x32xf32> to vector<16x1xf32>
    %26 = vector.extract_strided_slice %11 {offsets = [2, 0], sizes = [1, 16], strides = [1, 1]} : vector<32x16xf32> to vector<1x16xf32>
    %27 = vector.broadcast %25 : vector<16x1xf32> to vector<16x16xf32>
    %28 = vector.broadcast %26 : vector<1x16xf32> to vector<16x16xf32>
    %29 = arith.subf %27, %28 : vector<16x16xf32>
    %30 = math.absf %29 : vector<16x16xf32>
    %31 = arith.addf %24, %30 : vector<16x16xf32>
    %32 = vector.extract_strided_slice %10 {offsets = [0, 3], sizes = [16, 1], strides = [1, 1]} : vector<16x32xf32> to vector<16x1xf32>
    %33 = vector.extract_strided_slice %11 {offsets = [3, 0], sizes = [1, 16], strides = [1, 1]} : vector<32x16xf32> to vector<1x16xf32>
    %34 = vector.broadcast %32 : vector<16x1xf32> to vector<16x16xf32>
    %35 = vector.broadcast %33 : vector<1x16xf32> to vector<16x16xf32>
    %36 = arith.subf %34, %35 : vector<16x16xf32>
    %37 = math.absf %36 : vector<16x16xf32>
    %38 = arith.addf %31, %37 : vector<16x16xf32>
    %39 = vector.extract_strided_slice %10 {offsets = [0, 4], sizes = [16, 1], strides = [1, 1]} : vector<16x32xf32> to vector<16x1xf32>
    %40 = vector.extract_strided_slice %11 {offsets = [4, 0], sizes = [1, 16], strides = [1, 1]} : vector<32x16xf32> to vector<1x16xf32>
    %41 = vector.broadcast %39 : vector<16x1xf32> to vector<16x16xf32>
    %42 = vector.broadcast %40 : vector<1x16xf32> to vector<16x16xf32>
    %43 = arith.subf %41, %42 : vector<16x16xf32>
    %44 = math.absf %43 : vector<16x16xf32>
    %45 = vector.extract_strided_slice %10 {offsets = [0, 5], sizes = [16, 1], strides = [1, 1]} : vector<16x32xf32> to vector<16x1xf32>
    %46 = vector.extract_strided_slice %11 {offsets = [5, 0], sizes = [1, 16], strides = [1, 1]} : vector<32x16xf32> to vector<1x16xf32>
    %47 = vector.broadcast %45 : vector<16x1xf32> to vector<16x16xf32>
    %48 = vector.broadcast %46 : vector<1x16xf32> to vector<16x16xf32>
    %49 = arith.subf %47, %48 : vector<16x16xf32>
    %50 = math.absf %49 : vector<16x16xf32>
    %51 = arith.addf %44, %50 : vector<16x16xf32>
    %52 = vector.extract_strided_slice %10 {offsets = [0, 6], sizes = [16, 1], strides = [1, 1]} : vector<16x32xf32> to vector<16x1xf32>
    %53 = vector.extract_strided_slice %11 {offsets = [6, 0], sizes = [1, 16], strides = [1, 1]} : vector<32x16xf32> to vector<1x16xf32>
    %54 = vector.broadcast %52 : vector<16x1xf32> to vector<16x16xf32>
    %55 = vector.broadcast %53 : vector<1x16xf32> to vector<16x16xf32>
    %56 = arith.subf %54, %55 : vector<16x16xf32>
    %57 = math.absf %56 : vector<16x16xf32>
    %58 = arith.addf %51, %57 : vector<16x16xf32>
    %59 = vector.extract_strided_slice %10 {offsets = [0, 7], sizes = [16, 1], strides = [1, 1]} : vector<16x32xf32> to vector<16x1xf32>
    %60 = vector.extract_strided_slice %11 {offsets = [7, 0], sizes = [1, 16], strides = [1, 1]} : vector<32x16xf32> to vector<1x16xf32>
    %61 = vector.broadcast %59 : vector<16x1xf32> to vector<16x16xf32>
    %62 = vector.broadcast %60 : vector<1x16xf32> to vector<16x16xf32>
    %63 = arith.subf %61, %62 : vector<16x16xf32>
    %64 = math.absf %63 : vector<16x16xf32>
    %65 = arith.addf %58, %64 : vector<16x16xf32>
    %66 = arith.addf %38, %65 : vector<16x16xf32>
    %67 = vector.extract_strided_slice %10 {offsets = [0, 8], sizes = [16, 1], strides = [1, 1]} : vector<16x32xf32> to vector<16x1xf32>
    %68 = vector.extract_strided_slice %11 {offsets = [8, 0], sizes = [1, 16], strides = [1, 1]} : vector<32x16xf32> to vector<1x16xf32>
    %69 = vector.broadcast %67 : vector<16x1xf32> to vector<16x16xf32>
    %70 = vector.broadcast %68 : vector<1x16xf32> to vector<16x16xf32>
    %71 = arith.subf %69, %70 : vector<16x16xf32>
    %72 = math.absf %71 : vector<16x16xf32>
    %73 = vector.extract_strided_slice %10 {offsets = [0, 9], sizes = [16, 1], strides = [1, 1]} : vector<16x32xf32> to vector<16x1xf32>
    %74 = vector.extract_strided_slice %11 {offsets = [9, 0], sizes = [1, 16], strides = [1, 1]} : vector<32x16xf32> to vector<1x16xf32>
    %75 = vector.broadcast %73 : vector<16x1xf32> to vector<16x16xf32>
    %76 = vector.broadcast %74 : vector<1x16xf32> to vector<16x16xf32>
    %77 = arith.subf %75, %76 : vector<16x16xf32>
    %78 = math.absf %77 : vector<16x16xf32>
    %79 = arith.addf %72, %78 : vector<16x16xf32>
    %80 = vector.extract_strided_slice %10 {offsets = [0, 10], sizes = [16, 1], strides = [1, 1]} : vector<16x32xf32> to vector<16x1xf32>
    %81 = vector.extract_strided_slice %11 {offsets = [10, 0], sizes = [1, 16], strides = [1, 1]} : vector<32x16xf32> to vector<1x16xf32>
    %82 = vector.broadcast %80 : vector<16x1xf32> to vector<16x16xf32>
    %83 = vector.broadcast %81 : vector<1x16xf32> to vector<16x16xf32>
    %84 = arith.subf %82, %83 : vector<16x16xf32>
    %85 = math.absf %84 : vector<16x16xf32>
    %86 = arith.addf %79, %85 : vector<16x16xf32>
    %87 = vector.extract_strided_slice %10 {offsets = [0, 11], sizes = [16, 1], strides = [1, 1]} : vector<16x32xf32> to vector<16x1xf32>
    %88 = vector.extract_strided_slice %11 {offsets = [11, 0], sizes = [1, 16], strides = [1, 1]} : vector<32x16xf32> to vector<1x16xf32>
    %89 = vector.broadcast %87 : vector<16x1xf32> to vector<16x16xf32>
    %90 = vector.broadcast %88 : vector<1x16xf32> to vector<16x16xf32>
    %91 = arith.subf %89, %90 : vector<16x16xf32>
    %92 = math.absf %91 : vector<16x16xf32>
    %93 = arith.addf %86, %92 : vector<16x16xf32>
    %94 = arith.addf %66, %93 : vector<16x16xf32>
    %95 = vector.extract_strided_slice %10 {offsets = [0, 12], sizes = [16, 1], strides = [1, 1]} : vector<16x32xf32> to vector<16x1xf32>
    %96 = vector.extract_strided_slice %11 {offsets = [12, 0], sizes = [1, 16], strides = [1, 1]} : vector<32x16xf32> to vector<1x16xf32>
    %97 = vector.broadcast %95 : vector<16x1xf32> to vector<16x16xf32>
    %98 = vector.broadcast %96 : vector<1x16xf32> to vector<16x16xf32>
    %99 = arith.subf %97, %98 : vector<16x16xf32>
    %100 = math.absf %99 : vector<16x16xf32>
    %101 = vector.extract_strided_slice %10 {offsets = [0, 13], sizes = [16, 1], strides = [1, 1]} : vector<16x32xf32> to vector<16x1xf32>
    %102 = vector.extract_strided_slice %11 {offsets = [13, 0], sizes = [1, 16], strides = [1, 1]} : vector<32x16xf32> to vector<1x16xf32>
    %103 = vector.broadcast %101 : vector<16x1xf32> to vector<16x16xf32>
    %104 = vector.broadcast %102 : vector<1x16xf32> to vector<16x16xf32>
    %105 = arith.subf %103, %104 : vector<16x16xf32>
    %106 = math.absf %105 : vector<16x16xf32>
    %107 = arith.addf %100, %106 : vector<16x16xf32>
    %108 = vector.extract_strided_slice %10 {offsets = [0, 14], sizes = [16, 1], strides = [1, 1]} : vector<16x32xf32> to vector<16x1xf32>
    %109 = vector.extract_strided_slice %11 {offsets = [14, 0], sizes = [1, 16], strides = [1, 1]} : vector<32x16xf32> to vector<1x16xf32>
    %110 = vector.broadcast %108 : vector<16x1xf32> to vector<16x16xf32>
    %111 = vector.broadcast %109 : vector<1x16xf32> to vector<16x16xf32>
    %112 = arith.subf %110, %111 : vector<16x16xf32>
    %113 = math.absf %112 : vector<16x16xf32>
    %114 = arith.addf %107, %113 : vector<16x16xf32>
    %115 = vector.extract_strided_slice %10 {offsets = [0, 15], sizes = [16, 1], strides = [1, 1]} : vector<16x32xf32> to vector<16x1xf32>
    %116 = vector.extract_strided_slice %11 {offsets = [15, 0], sizes = [1, 16], strides = [1, 1]} : vector<32x16xf32> to vector<1x16xf32>
    %117 = vector.broadcast %115 : vector<16x1xf32> to vector<16x16xf32>
    %118 = vector.broadcast %116 : vector<1x16xf32> to vector<16x16xf32>
    %119 = arith.subf %117, %118 : vector<16x16xf32>
    %120 = math.absf %119 : vector<16x16xf32>
    %121 = arith.addf %114, %120 : vector<16x16xf32>
    %122 = arith.addf %94, %121 : vector<16x16xf32>
    %123 = vector.extract_strided_slice %10 {offsets = [0, 16], sizes = [16, 1], strides = [1, 1]} : vector<16x32xf32> to vector<16x1xf32>
    %124 = vector.extract_strided_slice %11 {offsets = [16, 0], sizes = [1, 16], strides = [1, 1]} : vector<32x16xf32> to vector<1x16xf32>
    %125 = vector.broadcast %123 : vector<16x1xf32> to vector<16x16xf32>
    %126 = vector.broadcast %124 : vector<1x16xf32> to vector<16x16xf32>
    %127 = arith.subf %125, %126 : vector<16x16xf32>
    %128 = math.absf %127 : vector<16x16xf32>
    %129 = vector.extract_strided_slice %10 {offsets = [0, 17], sizes = [16, 1], strides = [1, 1]} : vector<16x32xf32> to vector<16x1xf32>
    %130 = vector.extract_strided_slice %11 {offsets = [17, 0], sizes = [1, 16], strides = [1, 1]} : vector<32x16xf32> to vector<1x16xf32>
    %131 = vector.broadcast %129 : vector<16x1xf32> to vector<16x16xf32>
    %132 = vector.broadcast %130 : vector<1x16xf32> to vector<16x16xf32>
    %133 = arith.subf %131, %132 : vector<16x16xf32>
    %134 = math.absf %133 : vector<16x16xf32>
    %135 = arith.addf %128, %134 : vector<16x16xf32>
    %136 = vector.extract_strided_slice %10 {offsets = [0, 18], sizes = [16, 1], strides = [1, 1]} : vector<16x32xf32> to vector<16x1xf32>
    %137 = vector.extract_strided_slice %11 {offsets = [18, 0], sizes = [1, 16], strides = [1, 1]} : vector<32x16xf32> to vector<1x16xf32>
    %138 = vector.broadcast %136 : vector<16x1xf32> to vector<16x16xf32>
    %139 = vector.broadcast %137 : vector<1x16xf32> to vector<16x16xf32>
    %140 = arith.subf %138, %139 : vector<16x16xf32>
    %141 = math.absf %140 : vector<16x16xf32>
    %142 = arith.addf %135, %141 : vector<16x16xf32>
    %143 = vector.extract_strided_slice %10 {offsets = [0, 19], sizes = [16, 1], strides = [1, 1]} : vector<16x32xf32> to vector<16x1xf32>
    %144 = vector.extract_strided_slice %11 {offsets = [19, 0], sizes = [1, 16], strides = [1, 1]} : vector<32x16xf32> to vector<1x16xf32>
    %145 = vector.broadcast %143 : vector<16x1xf32> to vector<16x16xf32>
    %146 = vector.broadcast %144 : vector<1x16xf32> to vector<16x16xf32>
    %147 = arith.subf %145, %146 : vector<16x16xf32>
    %148 = math.absf %147 : vector<16x16xf32>
    %149 = arith.addf %142, %148 : vector<16x16xf32>
    %150 = arith.addf %122, %149 : vector<16x16xf32>
    %151 = vector.extract_strided_slice %10 {offsets = [0, 20], sizes = [16, 1], strides = [1, 1]} : vector<16x32xf32> to vector<16x1xf32>
    %152 = vector.extract_strided_slice %11 {offsets = [20, 0], sizes = [1, 16], strides = [1, 1]} : vector<32x16xf32> to vector<1x16xf32>
    %153 = vector.broadcast %151 : vector<16x1xf32> to vector<16x16xf32>
    %154 = vector.broadcast %152 : vector<1x16xf32> to vector<16x16xf32>
    %155 = arith.subf %153, %154 : vector<16x16xf32>
    %156 = math.absf %155 : vector<16x16xf32>
    %157 = vector.extract_strided_slice %10 {offsets = [0, 21], sizes = [16, 1], strides = [1, 1]} : vector<16x32xf32> to vector<16x1xf32>
    %158 = vector.extract_strided_slice %11 {offsets = [21, 0], sizes = [1, 16], strides = [1, 1]} : vector<32x16xf32> to vector<1x16xf32>
    %159 = vector.broadcast %157 : vector<16x1xf32> to vector<16x16xf32>
    %160 = vector.broadcast %158 : vector<1x16xf32> to vector<16x16xf32>
    %161 = arith.subf %159, %160 : vector<16x16xf32>
    %162 = math.absf %161 : vector<16x16xf32>
    %163 = arith.addf %156, %162 : vector<16x16xf32>
    %164 = vector.extract_strided_slice %10 {offsets = [0, 22], sizes = [16, 1], strides = [1, 1]} : vector<16x32xf32> to vector<16x1xf32>
    %165 = vector.extract_strided_slice %11 {offsets = [22, 0], sizes = [1, 16], strides = [1, 1]} : vector<32x16xf32> to vector<1x16xf32>
    %166 = vector.broadcast %164 : vector<16x1xf32> to vector<16x16xf32>
    %167 = vector.broadcast %165 : vector<1x16xf32> to vector<16x16xf32>
    %168 = arith.subf %166, %167 : vector<16x16xf32>
    %169 = math.absf %168 : vector<16x16xf32>
    %170 = arith.addf %163, %169 : vector<16x16xf32>
    %171 = vector.extract_strided_slice %10 {offsets = [0, 23], sizes = [16, 1], strides = [1, 1]} : vector<16x32xf32> to vector<16x1xf32>
    %172 = vector.extract_strided_slice %11 {offsets = [23, 0], sizes = [1, 16], strides = [1, 1]} : vector<32x16xf32> to vector<1x16xf32>
    %173 = vector.broadcast %171 : vector<16x1xf32> to vector<16x16xf32>
    %174 = vector.broadcast %172 : vector<1x16xf32> to vector<16x16xf32>
    %175 = arith.subf %173, %174 : vector<16x16xf32>
    %176 = math.absf %175 : vector<16x16xf32>
    %177 = arith.addf %170, %176 : vector<16x16xf32>
    %178 = arith.addf %150, %177 : vector<16x16xf32>
    %179 = vector.extract_strided_slice %10 {offsets = [0, 24], sizes = [16, 1], strides = [1, 1]} : vector<16x32xf32> to vector<16x1xf32>
    %180 = vector.extract_strided_slice %11 {offsets = [24, 0], sizes = [1, 16], strides = [1, 1]} : vector<32x16xf32> to vector<1x16xf32>
    %181 = vector.broadcast %179 : vector<16x1xf32> to vector<16x16xf32>
    %182 = vector.broadcast %180 : vector<1x16xf32> to vector<16x16xf32>
    %183 = arith.subf %181, %182 : vector<16x16xf32>
    %184 = math.absf %183 : vector<16x16xf32>
    %185 = vector.extract_strided_slice %10 {offsets = [0, 25], sizes = [16, 1], strides = [1, 1]} : vector<16x32xf32> to vector<16x1xf32>
    %186 = vector.extract_strided_slice %11 {offsets = [25, 0], sizes = [1, 16], strides = [1, 1]} : vector<32x16xf32> to vector<1x16xf32>
    %187 = vector.broadcast %185 : vector<16x1xf32> to vector<16x16xf32>
    %188 = vector.broadcast %186 : vector<1x16xf32> to vector<16x16xf32>
    %189 = arith.subf %187, %188 : vector<16x16xf32>
    %190 = math.absf %189 : vector<16x16xf32>
    %191 = arith.addf %184, %190 : vector<16x16xf32>
    %192 = vector.extract_strided_slice %10 {offsets = [0, 26], sizes = [16, 1], strides = [1, 1]} : vector<16x32xf32> to vector<16x1xf32>
    %193 = vector.extract_strided_slice %11 {offsets = [26, 0], sizes = [1, 16], strides = [1, 1]} : vector<32x16xf32> to vector<1x16xf32>
    %194 = vector.broadcast %192 : vector<16x1xf32> to vector<16x16xf32>
    %195 = vector.broadcast %193 : vector<1x16xf32> to vector<16x16xf32>
    %196 = arith.subf %194, %195 : vector<16x16xf32>
    %197 = math.absf %196 : vector<16x16xf32>
    %198 = arith.addf %191, %197 : vector<16x16xf32>
    %199 = vector.extract_strided_slice %10 {offsets = [0, 27], sizes = [16, 1], strides = [1, 1]} : vector<16x32xf32> to vector<16x1xf32>
    %200 = vector.extract_strided_slice %11 {offsets = [27, 0], sizes = [1, 16], strides = [1, 1]} : vector<32x16xf32> to vector<1x16xf32>
    %201 = vector.broadcast %199 : vector<16x1xf32> to vector<16x16xf32>
    %202 = vector.broadcast %200 : vector<1x16xf32> to vector<16x16xf32>
    %203 = arith.subf %201, %202 : vector<16x16xf32>
    %204 = math.absf %203 : vector<16x16xf32>
    %205 = arith.addf %198, %204 : vector<16x16xf32>
    %206 = arith.addf %178, %205 : vector<16x16xf32>
    %207 = vector.extract_strided_slice %10 {offsets = [0, 28], sizes = [16, 1], strides = [1, 1]} : vector<16x32xf32> to vector<16x1xf32>
    %208 = vector.extract_strided_slice %11 {offsets = [28, 0], sizes = [1, 16], strides = [1, 1]} : vector<32x16xf32> to vector<1x16xf32>
    %209 = vector.broadcast %207 : vector<16x1xf32> to vector<16x16xf32>
    %210 = vector.broadcast %208 : vector<1x16xf32> to vector<16x16xf32>
    %211 = arith.subf %209, %210 : vector<16x16xf32>
    %212 = math.absf %211 : vector<16x16xf32>
    %213 = vector.extract_strided_slice %10 {offsets = [0, 29], sizes = [16, 1], strides = [1, 1]} : vector<16x32xf32> to vector<16x1xf32>
    %214 = vector.extract_strided_slice %11 {offsets = [29, 0], sizes = [1, 16], strides = [1, 1]} : vector<32x16xf32> to vector<1x16xf32>
    %215 = vector.broadcast %213 : vector<16x1xf32> to vector<16x16xf32>
    %216 = vector.broadcast %214 : vector<1x16xf32> to vector<16x16xf32>
    %217 = arith.subf %215, %216 : vector<16x16xf32>
    %218 = math.absf %217 : vector<16x16xf32>
    %219 = arith.addf %212, %218 : vector<16x16xf32>
    %220 = vector.extract_strided_slice %10 {offsets = [0, 30], sizes = [16, 1], strides = [1, 1]} : vector<16x32xf32> to vector<16x1xf32>
    %221 = vector.extract_strided_slice %11 {offsets = [30, 0], sizes = [1, 16], strides = [1, 1]} : vector<32x16xf32> to vector<1x16xf32>
    %222 = vector.broadcast %220 : vector<16x1xf32> to vector<16x16xf32>
    %223 = vector.broadcast %221 : vector<1x16xf32> to vector<16x16xf32>
    %224 = arith.subf %222, %223 : vector<16x16xf32>
    %225 = math.absf %224 : vector<16x16xf32>
    %226 = arith.addf %219, %225 : vector<16x16xf32>
    %227 = vector.extract_strided_slice %10 {offsets = [0, 31], sizes = [16, 1], strides = [1, 1]} : vector<16x32xf32> to vector<16x1xf32>
    %228 = vector.extract_strided_slice %11 {offsets = [31, 0], sizes = [1, 16], strides = [1, 1]} : vector<32x16xf32> to vector<1x16xf32>
    %229 = vector.broadcast %227 : vector<16x1xf32> to vector<16x16xf32>
    %230 = vector.broadcast %228 : vector<1x16xf32> to vector<16x16xf32>
    %231 = arith.subf %229, %230 : vector<16x16xf32>
    %232 = math.absf %231 : vector<16x16xf32>
    %233 = arith.addf %226, %232 : vector<16x16xf32>
    %234 = arith.addf %206, %233 : vector<16x16xf32>
    %cst_9 = arith.constant 1.000000e-03 : f32
    %235 = vector.broadcast %cst_9 : f32 to vector<16x16xf32>
    %236 = arith.maximumf %234, %235 : vector<16x16xf32>
    %237 = tpu.reciprocal %236 {approx = true} : vector<16x16xf32> -> vector<16x16xf32>
    %238 = arith.mulf %1, %237 : vector<16x16xf32>
    %239 = arith.truncf %238 : vector<16x16xf32> to vector<16x16xbf16>
    %240 = arith.truncf %9 : vector<16x33xf32> to vector<16x33xbf16>
    %cst_10 = arith.constant dense<0.000000e+00> : vector<16x33xf32>
    %241 = tpu.matmul %239, %240, %cst_10 {dimension_numbers = #tpu.dot_dimension_numbers<[1], [0], [0], [1], [0, 0, 1, 1], [], []>} : vector<16x16xbf16>, vector<16x33xbf16>, vector<16x33xf32> -> vector<16x33xf32>
    %242 = vector.extract_strided_slice %241 {offsets = [0, 0], sizes = [16, 32], strides = [1, 1]} : vector<16x33xf32> to vector<16x32xf32>
    %243 = vector.extract_strided_slice %241 {offsets = [0, 32], sizes = [16, 1], strides = [1, 1]} : vector<16x33xf32> to vector<16x1xf32>
    %244 = vector.broadcast %243 : vector<16x1xf32> to vector<16x32xf32>
    %245 = arith.mulf %244, %10 : vector<16x32xf32>
    %246 = arith.subf %245, %242 : vector<16x32xf32>
    %cst_11 = arith.constant 3.110000e-01 : f32
    %247 = vector.broadcast %cst_11 : f32 to vector<16x32xf32>
    %248 = arith.mulf %247, %246 : vector<16x32xf32>
    %249 = arith.subf %10, %248 : vector<16x32xf32>
    %cst_12 = arith.constant 0.000000e+00 : f32
    %250 = vector.broadcast %cst_12 : f32 to vector<16x32xf32>
    %251 = arith.cmpf ogt, %249, %250 : vector<16x32xf32>
    %cst_13 = arith.constant 0.000000e+00 : f32
    %252 = vector.broadcast %cst_13 : f32 to vector<16x32xf32>
    %253 = arith.minimumf %249, %252 : vector<16x32xf32>
    %254 = math.exp %253 : vector<16x32xf32>
    %cst_14 = arith.constant 1.000000e+00 : f32
    %255 = vector.broadcast %cst_14 : f32 to vector<16x32xf32>
    %256 = arith.subf %254, %255 : vector<16x32xf32>
    %257 = arith.select %251, %249, %256 : vector<16x32xi1>, vector<16x32xf32>
    %c0_15 = arith.constant 0 : index
    %c0_16 = arith.constant 0 : index
    %258 = vector.load %arg5[%c0_15, %c0_16] : memref<32x33xf32, #tpu.memory_space<vmem>>, vector<32x33xf32>
    %c0_17 = arith.constant 0 : index
    %c0_18 = arith.constant 0 : index
    %259 = vector.load %arg6[%c0_17, %c0_18] : memref<1x33xf32, #tpu.memory_space<vmem>>, vector<1x33xf32>
    %260 = arith.truncf %257 : vector<16x32xf32> to vector<16x32xbf16>
    %261 = arith.truncf %258 : vector<32x33xf32> to vector<32x33xbf16>
    %cst_19 = arith.constant dense<0.000000e+00> : vector<16x33xf32>
    %262 = tpu.matmul %260, %261, %cst_19 {dimension_numbers = #tpu.dot_dimension_numbers<[1], [0], [0], [1], [0, 0, 1, 1], [], []>} : vector<16x32xbf16>, vector<32x33xbf16>, vector<16x33xf32> -> vector<16x33xf32>
    %263 = vector.broadcast %259 : vector<1x33xf32> to vector<16x33xf32>
    %264 = arith.addf %262, %263 : vector<16x33xf32>
    %265 = vector.extract_strided_slice %264 {offsets = [0, 0], sizes = [16, 32], strides = [1, 1]} : vector<16x33xf32> to vector<16x32xf32>
    %266 = tpu.transpose %265, [1, 0] : vector<16x32xf32> -> vector<32x16xf32>
    %267 = vector.extract_strided_slice %265 {offsets = [0, 0], sizes = [16, 1], strides = [1, 1]} : vector<16x32xf32> to vector<16x1xf32>
    %268 = vector.extract_strided_slice %266 {offsets = [0, 0], sizes = [1, 16], strides = [1, 1]} : vector<32x16xf32> to vector<1x16xf32>
    %269 = vector.broadcast %267 : vector<16x1xf32> to vector<16x16xf32>
    %270 = vector.broadcast %268 : vector<1x16xf32> to vector<16x16xf32>
    %271 = arith.subf %269, %270 : vector<16x16xf32>
    %272 = math.absf %271 : vector<16x16xf32>
    %273 = vector.extract_strided_slice %265 {offsets = [0, 1], sizes = [16, 1], strides = [1, 1]} : vector<16x32xf32> to vector<16x1xf32>
    %274 = vector.extract_strided_slice %266 {offsets = [1, 0], sizes = [1, 16], strides = [1, 1]} : vector<32x16xf32> to vector<1x16xf32>
    %275 = vector.broadcast %273 : vector<16x1xf32> to vector<16x16xf32>
    %276 = vector.broadcast %274 : vector<1x16xf32> to vector<16x16xf32>
    %277 = arith.subf %275, %276 : vector<16x16xf32>
    %278 = math.absf %277 : vector<16x16xf32>
    %279 = arith.addf %272, %278 : vector<16x16xf32>
    %280 = vector.extract_strided_slice %265 {offsets = [0, 2], sizes = [16, 1], strides = [1, 1]} : vector<16x32xf32> to vector<16x1xf32>
    %281 = vector.extract_strided_slice %266 {offsets = [2, 0], sizes = [1, 16], strides = [1, 1]} : vector<32x16xf32> to vector<1x16xf32>
    %282 = vector.broadcast %280 : vector<16x1xf32> to vector<16x16xf32>
    %283 = vector.broadcast %281 : vector<1x16xf32> to vector<16x16xf32>
    %284 = arith.subf %282, %283 : vector<16x16xf32>
    %285 = math.absf %284 : vector<16x16xf32>
    %286 = arith.addf %279, %285 : vector<16x16xf32>
    %287 = vector.extract_strided_slice %265 {offsets = [0, 3], sizes = [16, 1], strides = [1, 1]} : vector<16x32xf32> to vector<16x1xf32>
    %288 = vector.extract_strided_slice %266 {offsets = [3, 0], sizes = [1, 16], strides = [1, 1]} : vector<32x16xf32> to vector<1x16xf32>
    %289 = vector.broadcast %287 : vector<16x1xf32> to vector<16x16xf32>
    %290 = vector.broadcast %288 : vector<1x16xf32> to vector<16x16xf32>
    %291 = arith.subf %289, %290 : vector<16x16xf32>
    %292 = math.absf %291 : vector<16x16xf32>
    %293 = arith.addf %286, %292 : vector<16x16xf32>
    %294 = vector.extract_strided_slice %265 {offsets = [0, 4], sizes = [16, 1], strides = [1, 1]} : vector<16x32xf32> to vector<16x1xf32>
    %295 = vector.extract_strided_slice %266 {offsets = [4, 0], sizes = [1, 16], strides = [1, 1]} : vector<32x16xf32> to vector<1x16xf32>
    %296 = vector.broadcast %294 : vector<16x1xf32> to vector<16x16xf32>
    %297 = vector.broadcast %295 : vector<1x16xf32> to vector<16x16xf32>
    %298 = arith.subf %296, %297 : vector<16x16xf32>
    %299 = math.absf %298 : vector<16x16xf32>
    %300 = vector.extract_strided_slice %265 {offsets = [0, 5], sizes = [16, 1], strides = [1, 1]} : vector<16x32xf32> to vector<16x1xf32>
    %301 = vector.extract_strided_slice %266 {offsets = [5, 0], sizes = [1, 16], strides = [1, 1]} : vector<32x16xf32> to vector<1x16xf32>
    %302 = vector.broadcast %300 : vector<16x1xf32> to vector<16x16xf32>
    %303 = vector.broadcast %301 : vector<1x16xf32> to vector<16x16xf32>
    %304 = arith.subf %302, %303 : vector<16x16xf32>
    %305 = math.absf %304 : vector<16x16xf32>
    %306 = arith.addf %299, %305 : vector<16x16xf32>
    %307 = vector.extract_strided_slice %265 {offsets = [0, 6], sizes = [16, 1], strides = [1, 1]} : vector<16x32xf32> to vector<16x1xf32>
    %308 = vector.extract_strided_slice %266 {offsets = [6, 0], sizes = [1, 16], strides = [1, 1]} : vector<32x16xf32> to vector<1x16xf32>
    %309 = vector.broadcast %307 : vector<16x1xf32> to vector<16x16xf32>
    %310 = vector.broadcast %308 : vector<1x16xf32> to vector<16x16xf32>
    %311 = arith.subf %309, %310 : vector<16x16xf32>
    %312 = math.absf %311 : vector<16x16xf32>
    %313 = arith.addf %306, %312 : vector<16x16xf32>
    %314 = vector.extract_strided_slice %265 {offsets = [0, 7], sizes = [16, 1], strides = [1, 1]} : vector<16x32xf32> to vector<16x1xf32>
    %315 = vector.extract_strided_slice %266 {offsets = [7, 0], sizes = [1, 16], strides = [1, 1]} : vector<32x16xf32> to vector<1x16xf32>
    %316 = vector.broadcast %314 : vector<16x1xf32> to vector<16x16xf32>
    %317 = vector.broadcast %315 : vector<1x16xf32> to vector<16x16xf32>
    %318 = arith.subf %316, %317 : vector<16x16xf32>
    %319 = math.absf %318 : vector<16x16xf32>
    %320 = arith.addf %313, %319 : vector<16x16xf32>
    %321 = arith.addf %293, %320 : vector<16x16xf32>
    %322 = vector.extract_strided_slice %265 {offsets = [0, 8], sizes = [16, 1], strides = [1, 1]} : vector<16x32xf32> to vector<16x1xf32>
    %323 = vector.extract_strided_slice %266 {offsets = [8, 0], sizes = [1, 16], strides = [1, 1]} : vector<32x16xf32> to vector<1x16xf32>
    %324 = vector.broadcast %322 : vector<16x1xf32> to vector<16x16xf32>
    %325 = vector.broadcast %323 : vector<1x16xf32> to vector<16x16xf32>
    %326 = arith.subf %324, %325 : vector<16x16xf32>
    %327 = math.absf %326 : vector<16x16xf32>
    %328 = vector.extract_strided_slice %265 {offsets = [0, 9], sizes = [16, 1], strides = [1, 1]} : vector<16x32xf32> to vector<16x1xf32>
    %329 = vector.extract_strided_slice %266 {offsets = [9, 0], sizes = [1, 16], strides = [1, 1]} : vector<32x16xf32> to vector<1x16xf32>
    %330 = vector.broadcast %328 : vector<16x1xf32> to vector<16x16xf32>
    %331 = vector.broadcast %329 : vector<1x16xf32> to vector<16x16xf32>
    %332 = arith.subf %330, %331 : vector<16x16xf32>
    %333 = math.absf %332 : vector<16x16xf32>
    %334 = arith.addf %327, %333 : vector<16x16xf32>
    %335 = vector.extract_strided_slice %265 {offsets = [0, 10], sizes = [16, 1], strides = [1, 1]} : vector<16x32xf32> to vector<16x1xf32>
    %336 = vector.extract_strided_slice %266 {offsets = [10, 0], sizes = [1, 16], strides = [1, 1]} : vector<32x16xf32> to vector<1x16xf32>
    %337 = vector.broadcast %335 : vector<16x1xf32> to vector<16x16xf32>
    %338 = vector.broadcast %336 : vector<1x16xf32> to vector<16x16xf32>
    %339 = arith.subf %337, %338 : vector<16x16xf32>
    %340 = math.absf %339 : vector<16x16xf32>
    %341 = arith.addf %334, %340 : vector<16x16xf32>
    %342 = vector.extract_strided_slice %265 {offsets = [0, 11], sizes = [16, 1], strides = [1, 1]} : vector<16x32xf32> to vector<16x1xf32>
    %343 = vector.extract_strided_slice %266 {offsets = [11, 0], sizes = [1, 16], strides = [1, 1]} : vector<32x16xf32> to vector<1x16xf32>
    %344 = vector.broadcast %342 : vector<16x1xf32> to vector<16x16xf32>
    %345 = vector.broadcast %343 : vector<1x16xf32> to vector<16x16xf32>
    %346 = arith.subf %344, %345 : vector<16x16xf32>
    %347 = math.absf %346 : vector<16x16xf32>
    %348 = arith.addf %341, %347 : vector<16x16xf32>
    %349 = arith.addf %321, %348 : vector<16x16xf32>
    %350 = vector.extract_strided_slice %265 {offsets = [0, 12], sizes = [16, 1], strides = [1, 1]} : vector<16x32xf32> to vector<16x1xf32>
    %351 = vector.extract_strided_slice %266 {offsets = [12, 0], sizes = [1, 16], strides = [1, 1]} : vector<32x16xf32> to vector<1x16xf32>
    %352 = vector.broadcast %350 : vector<16x1xf32> to vector<16x16xf32>
    %353 = vector.broadcast %351 : vector<1x16xf32> to vector<16x16xf32>
    %354 = arith.subf %352, %353 : vector<16x16xf32>
    %355 = math.absf %354 : vector<16x16xf32>
    %356 = vector.extract_strided_slice %265 {offsets = [0, 13], sizes = [16, 1], strides = [1, 1]} : vector<16x32xf32> to vector<16x1xf32>
    %357 = vector.extract_strided_slice %266 {offsets = [13, 0], sizes = [1, 16], strides = [1, 1]} : vector<32x16xf32> to vector<1x16xf32>
    %358 = vector.broadcast %356 : vector<16x1xf32> to vector<16x16xf32>
    %359 = vector.broadcast %357 : vector<1x16xf32> to vector<16x16xf32>
    %360 = arith.subf %358, %359 : vector<16x16xf32>
    %361 = math.absf %360 : vector<16x16xf32>
    %362 = arith.addf %355, %361 : vector<16x16xf32>
    %363 = vector.extract_strided_slice %265 {offsets = [0, 14], sizes = [16, 1], strides = [1, 1]} : vector<16x32xf32> to vector<16x1xf32>
    %364 = vector.extract_strided_slice %266 {offsets = [14, 0], sizes = [1, 16], strides = [1, 1]} : vector<32x16xf32> to vector<1x16xf32>
    %365 = vector.broadcast %363 : vector<16x1xf32> to vector<16x16xf32>
    %366 = vector.broadcast %364 : vector<1x16xf32> to vector<16x16xf32>
    %367 = arith.subf %365, %366 : vector<16x16xf32>
    %368 = math.absf %367 : vector<16x16xf32>
    %369 = arith.addf %362, %368 : vector<16x16xf32>
    %370 = vector.extract_strided_slice %265 {offsets = [0, 15], sizes = [16, 1], strides = [1, 1]} : vector<16x32xf32> to vector<16x1xf32>
    %371 = vector.extract_strided_slice %266 {offsets = [15, 0], sizes = [1, 16], strides = [1, 1]} : vector<32x16xf32> to vector<1x16xf32>
    %372 = vector.broadcast %370 : vector<16x1xf32> to vector<16x16xf32>
    %373 = vector.broadcast %371 : vector<1x16xf32> to vector<16x16xf32>
    %374 = arith.subf %372, %373 : vector<16x16xf32>
    %375 = math.absf %374 : vector<16x16xf32>
    %376 = arith.addf %369, %375 : vector<16x16xf32>
    %377 = arith.addf %349, %376 : vector<16x16xf32>
    %378 = vector.extract_strided_slice %265 {offsets = [0, 16], sizes = [16, 1], strides = [1, 1]} : vector<16x32xf32> to vector<16x1xf32>
    %379 = vector.extract_strided_slice %266 {offsets = [16, 0], sizes = [1, 16], strides = [1, 1]} : vector<32x16xf32> to vector<1x16xf32>
    %380 = vector.broadcast %378 : vector<16x1xf32> to vector<16x16xf32>
    %381 = vector.broadcast %379 : vector<1x16xf32> to vector<16x16xf32>
    %382 = arith.subf %380, %381 : vector<16x16xf32>
    %383 = math.absf %382 : vector<16x16xf32>
    %384 = vector.extract_strided_slice %265 {offsets = [0, 17], sizes = [16, 1], strides = [1, 1]} : vector<16x32xf32> to vector<16x1xf32>
    %385 = vector.extract_strided_slice %266 {offsets = [17, 0], sizes = [1, 16], strides = [1, 1]} : vector<32x16xf32> to vector<1x16xf32>
    %386 = vector.broadcast %384 : vector<16x1xf32> to vector<16x16xf32>
    %387 = vector.broadcast %385 : vector<1x16xf32> to vector<16x16xf32>
    %388 = arith.subf %386, %387 : vector<16x16xf32>
    %389 = math.absf %388 : vector<16x16xf32>
    %390 = arith.addf %383, %389 : vector<16x16xf32>
    %391 = vector.extract_strided_slice %265 {offsets = [0, 18], sizes = [16, 1], strides = [1, 1]} : vector<16x32xf32> to vector<16x1xf32>
    %392 = vector.extract_strided_slice %266 {offsets = [18, 0], sizes = [1, 16], strides = [1, 1]} : vector<32x16xf32> to vector<1x16xf32>
    %393 = vector.broadcast %391 : vector<16x1xf32> to vector<16x16xf32>
    %394 = vector.broadcast %392 : vector<1x16xf32> to vector<16x16xf32>
    %395 = arith.subf %393, %394 : vector<16x16xf32>
    %396 = math.absf %395 : vector<16x16xf32>
    %397 = arith.addf %390, %396 : vector<16x16xf32>
    %398 = vector.extract_strided_slice %265 {offsets = [0, 19], sizes = [16, 1], strides = [1, 1]} : vector<16x32xf32> to vector<16x1xf32>
    %399 = vector.extract_strided_slice %266 {offsets = [19, 0], sizes = [1, 16], strides = [1, 1]} : vector<32x16xf32> to vector<1x16xf32>
    %400 = vector.broadcast %398 : vector<16x1xf32> to vector<16x16xf32>
    %401 = vector.broadcast %399 : vector<1x16xf32> to vector<16x16xf32>
    %402 = arith.subf %400, %401 : vector<16x16xf32>
    %403 = math.absf %402 : vector<16x16xf32>
    %404 = arith.addf %397, %403 : vector<16x16xf32>
    %405 = arith.addf %377, %404 : vector<16x16xf32>
    %406 = vector.extract_strided_slice %265 {offsets = [0, 20], sizes = [16, 1], strides = [1, 1]} : vector<16x32xf32> to vector<16x1xf32>
    %407 = vector.extract_strided_slice %266 {offsets = [20, 0], sizes = [1, 16], strides = [1, 1]} : vector<32x16xf32> to vector<1x16xf32>
    %408 = vector.broadcast %406 : vector<16x1xf32> to vector<16x16xf32>
    %409 = vector.broadcast %407 : vector<1x16xf32> to vector<16x16xf32>
    %410 = arith.subf %408, %409 : vector<16x16xf32>
    %411 = math.absf %410 : vector<16x16xf32>
    %412 = vector.extract_strided_slice %265 {offsets = [0, 21], sizes = [16, 1], strides = [1, 1]} : vector<16x32xf32> to vector<16x1xf32>
    %413 = vector.extract_strided_slice %266 {offsets = [21, 0], sizes = [1, 16], strides = [1, 1]} : vector<32x16xf32> to vector<1x16xf32>
    %414 = vector.broadcast %412 : vector<16x1xf32> to vector<16x16xf32>
    %415 = vector.broadcast %413 : vector<1x16xf32> to vector<16x16xf32>
    %416 = arith.subf %414, %415 : vector<16x16xf32>
    %417 = math.absf %416 : vector<16x16xf32>
    %418 = arith.addf %411, %417 : vector<16x16xf32>
    %419 = vector.extract_strided_slice %265 {offsets = [0, 22], sizes = [16, 1], strides = [1, 1]} : vector<16x32xf32> to vector<16x1xf32>
    %420 = vector.extract_strided_slice %266 {offsets = [22, 0], sizes = [1, 16], strides = [1, 1]} : vector<32x16xf32> to vector<1x16xf32>
    %421 = vector.broadcast %419 : vector<16x1xf32> to vector<16x16xf32>
    %422 = vector.broadcast %420 : vector<1x16xf32> to vector<16x16xf32>
    %423 = arith.subf %421, %422 : vector<16x16xf32>
    %424 = math.absf %423 : vector<16x16xf32>
    %425 = arith.addf %418, %424 : vector<16x16xf32>
    %426 = vector.extract_strided_slice %265 {offsets = [0, 23], sizes = [16, 1], strides = [1, 1]} : vector<16x32xf32> to vector<16x1xf32>
    %427 = vector.extract_strided_slice %266 {offsets = [23, 0], sizes = [1, 16], strides = [1, 1]} : vector<32x16xf32> to vector<1x16xf32>
    %428 = vector.broadcast %426 : vector<16x1xf32> to vector<16x16xf32>
    %429 = vector.broadcast %427 : vector<1x16xf32> to vector<16x16xf32>
    %430 = arith.subf %428, %429 : vector<16x16xf32>
    %431 = math.absf %430 : vector<16x16xf32>
    %432 = arith.addf %425, %431 : vector<16x16xf32>
    %433 = arith.addf %405, %432 : vector<16x16xf32>
    %434 = vector.extract_strided_slice %265 {offsets = [0, 24], sizes = [16, 1], strides = [1, 1]} : vector<16x32xf32> to vector<16x1xf32>
    %435 = vector.extract_strided_slice %266 {offsets = [24, 0], sizes = [1, 16], strides = [1, 1]} : vector<32x16xf32> to vector<1x16xf32>
    %436 = vector.broadcast %434 : vector<16x1xf32> to vector<16x16xf32>
    %437 = vector.broadcast %435 : vector<1x16xf32> to vector<16x16xf32>
    %438 = arith.subf %436, %437 : vector<16x16xf32>
    %439 = math.absf %438 : vector<16x16xf32>
    %440 = vector.extract_strided_slice %265 {offsets = [0, 25], sizes = [16, 1], strides = [1, 1]} : vector<16x32xf32> to vector<16x1xf32>
    %441 = vector.extract_strided_slice %266 {offsets = [25, 0], sizes = [1, 16], strides = [1, 1]} : vector<32x16xf32> to vector<1x16xf32>
    %442 = vector.broadcast %440 : vector<16x1xf32> to vector<16x16xf32>
    %443 = vector.broadcast %441 : vector<1x16xf32> to vector<16x16xf32>
    %444 = arith.subf %442, %443 : vector<16x16xf32>
    %445 = math.absf %444 : vector<16x16xf32>
    %446 = arith.addf %439, %445 : vector<16x16xf32>
    %447 = vector.extract_strided_slice %265 {offsets = [0, 26], sizes = [16, 1], strides = [1, 1]} : vector<16x32xf32> to vector<16x1xf32>
    %448 = vector.extract_strided_slice %266 {offsets = [26, 0], sizes = [1, 16], strides = [1, 1]} : vector<32x16xf32> to vector<1x16xf32>
    %449 = vector.broadcast %447 : vector<16x1xf32> to vector<16x16xf32>
    %450 = vector.broadcast %448 : vector<1x16xf32> to vector<16x16xf32>
    %451 = arith.subf %449, %450 : vector<16x16xf32>
    %452 = math.absf %451 : vector<16x16xf32>
    %453 = arith.addf %446, %452 : vector<16x16xf32>
    %454 = vector.extract_strided_slice %265 {offsets = [0, 27], sizes = [16, 1], strides = [1, 1]} : vector<16x32xf32> to vector<16x1xf32>
    %455 = vector.extract_strided_slice %266 {offsets = [27, 0], sizes = [1, 16], strides = [1, 1]} : vector<32x16xf32> to vector<1x16xf32>
    %456 = vector.broadcast %454 : vector<16x1xf32> to vector<16x16xf32>
    %457 = vector.broadcast %455 : vector<1x16xf32> to vector<16x16xf32>
    %458 = arith.subf %456, %457 : vector<16x16xf32>
    %459 = math.absf %458 : vector<16x16xf32>
    %460 = arith.addf %453, %459 : vector<16x16xf32>
    %461 = arith.addf %433, %460 : vector<16x16xf32>
    %462 = vector.extract_strided_slice %265 {offsets = [0, 28], sizes = [16, 1], strides = [1, 1]} : vector<16x32xf32> to vector<16x1xf32>
    %463 = vector.extract_strided_slice %266 {offsets = [28, 0], sizes = [1, 16], strides = [1, 1]} : vector<32x16xf32> to vector<1x16xf32>
    %464 = vector.broadcast %462 : vector<16x1xf32> to vector<16x16xf32>
    %465 = vector.broadcast %463 : vector<1x16xf32> to vector<16x16xf32>
    %466 = arith.subf %464, %465 : vector<16x16xf32>
    %467 = math.absf %466 : vector<16x16xf32>
    %468 = vector.extract_strided_slice %265 {offsets = [0, 29], sizes = [16, 1], strides = [1, 1]} : vector<16x32xf32> to vector<16x1xf32>
    %469 = vector.extract_strided_slice %266 {offsets = [29, 0], sizes = [1, 16], strides = [1, 1]} : vector<32x16xf32> to vector<1x16xf32>
    %470 = vector.broadcast %468 : vector<16x1xf32> to vector<16x16xf32>
    %471 = vector.broadcast %469 : vector<1x16xf32> to vector<16x16xf32>
    %472 = arith.subf %470, %471 : vector<16x16xf32>
    %473 = math.absf %472 : vector<16x16xf32>
    %474 = arith.addf %467, %473 : vector<16x16xf32>
    %475 = vector.extract_strided_slice %265 {offsets = [0, 30], sizes = [16, 1], strides = [1, 1]} : vector<16x32xf32> to vector<16x1xf32>
    %476 = vector.extract_strided_slice %266 {offsets = [30, 0], sizes = [1, 16], strides = [1, 1]} : vector<32x16xf32> to vector<1x16xf32>
    %477 = vector.broadcast %475 : vector<16x1xf32> to vector<16x16xf32>
    %478 = vector.broadcast %476 : vector<1x16xf32> to vector<16x16xf32>
    %479 = arith.subf %477, %478 : vector<16x16xf32>
    %480 = math.absf %479 : vector<16x16xf32>
    %481 = arith.addf %474, %480 : vector<16x16xf32>
    %482 = vector.extract_strided_slice %265 {offsets = [0, 31], sizes = [16, 1], strides = [1, 1]} : vector<16x32xf32> to vector<16x1xf32>
    %483 = vector.extract_strided_slice %266 {offsets = [31, 0], sizes = [1, 16], strides = [1, 1]} : vector<32x16xf32> to vector<1x16xf32>
    %484 = vector.broadcast %482 : vector<16x1xf32> to vector<16x16xf32>
    %485 = vector.broadcast %483 : vector<1x16xf32> to vector<16x16xf32>
    %486 = arith.subf %484, %485 : vector<16x16xf32>
    %487 = math.absf %486 : vector<16x16xf32>
    %488 = arith.addf %481, %487 : vector<16x16xf32>
    %489 = arith.addf %461, %488 : vector<16x16xf32>
    %cst_20 = arith.constant 1.000000e-03 : f32
    %490 = vector.broadcast %cst_20 : f32 to vector<16x16xf32>
    %491 = arith.maximumf %489, %490 : vector<16x16xf32>
    %492 = tpu.reciprocal %491 {approx = true} : vector<16x16xf32> -> vector<16x16xf32>
    %493 = arith.mulf %1, %492 : vector<16x16xf32>
    %494 = arith.truncf %493 : vector<16x16xf32> to vector<16x16xbf16>
    %495 = arith.truncf %264 : vector<16x33xf32> to vector<16x33xbf16>
    %cst_21 = arith.constant dense<0.000000e+00> : vector<16x33xf32>
    %496 = tpu.matmul %494, %495, %cst_21 {dimension_numbers = #tpu.dot_dimension_numbers<[1], [0], [0], [1], [0, 0, 1, 1], [], []>} : vector<16x16xbf16>, vector<16x33xbf16>, vector<16x33xf32> -> vector<16x33xf32>
    %497 = vector.extract_strided_slice %496 {offsets = [0, 0], sizes = [16, 32], strides = [1, 1]} : vector<16x33xf32> to vector<16x32xf32>
    %498 = vector.extract_strided_slice %496 {offsets = [0, 32], sizes = [16, 1], strides = [1, 1]} : vector<16x33xf32> to vector<16x1xf32>
    %499 = vector.broadcast %498 : vector<16x1xf32> to vector<16x32xf32>
    %500 = arith.mulf %499, %265 : vector<16x32xf32>
    %501 = arith.subf %500, %497 : vector<16x32xf32>
    %cst_22 = arith.constant 3.110000e-01 : f32
    %502 = vector.broadcast %cst_22 : f32 to vector<16x32xf32>
    %503 = arith.mulf %502, %501 : vector<16x32xf32>
    %504 = arith.subf %265, %503 : vector<16x32xf32>
    %cst_23 = arith.constant 0.000000e+00 : f32
    %505 = vector.broadcast %cst_23 : f32 to vector<16x32xf32>
    %506 = arith.cmpf ogt, %504, %505 : vector<16x32xf32>
    %cst_24 = arith.constant 0.000000e+00 : f32
    %507 = vector.broadcast %cst_24 : f32 to vector<16x32xf32>
    %508 = arith.minimumf %504, %507 : vector<16x32xf32>
    %509 = math.exp %508 : vector<16x32xf32>
    %cst_25 = arith.constant 1.000000e+00 : f32
    %510 = vector.broadcast %cst_25 : f32 to vector<16x32xf32>
    %511 = arith.subf %509, %510 : vector<16x32xf32>
    %512 = arith.select %506, %504, %511 : vector<16x32xi1>, vector<16x32xf32>
    %c0_26 = arith.constant 0 : index
    %c0_27 = arith.constant 0 : index
    %513 = vector.load %arg7[%c0_26, %c0_27] : memref<32x4xf32, #tpu.memory_space<vmem>>, vector<32x4xf32>
    %c0_28 = arith.constant 0 : index
    %c0_29 = arith.constant 0 : index
    %514 = vector.load %arg8[%c0_28, %c0_29] : memref<1x4xf32, #tpu.memory_space<vmem>>, vector<1x4xf32>
    %515 = arith.truncf %512 : vector<16x32xf32> to vector<16x32xbf16>
    %516 = arith.truncf %513 : vector<32x4xf32> to vector<32x4xbf16>
    %cst_30 = arith.constant dense<0.000000e+00> : vector<16x4xf32>
    %517 = tpu.matmul %515, %516, %cst_30 {dimension_numbers = #tpu.dot_dimension_numbers<[1], [0], [0], [1], [0, 0, 1, 1], [], []>} : vector<16x32xbf16>, vector<32x4xbf16>, vector<16x4xf32> -> vector<16x4xf32>
    %518 = vector.broadcast %514 : vector<1x4xf32> to vector<16x4xf32>
    %519 = arith.addf %517, %518 : vector<16x4xf32>
    %cst_31 = arith.constant dense<0xFF800000> : vector<16xf32>
    %520 = vector.multi_reduction <maximumf>, %519, %cst_31 [1] : vector<16x4xf32> to vector<16xf32>
    %521 = vector.shape_cast %520 : vector<16xf32> to vector<16x1xf32>
    %522 = vector.broadcast %521 : vector<16x1xf32> to vector<16x4xf32>
    %523 = arith.subf %519, %522 : vector<16x4xf32>
    %524 = math.exp %523 : vector<16x4xf32>
    %cst_32 = arith.constant dense<0.000000e+00> : vector<16xf32>
    %525 = vector.multi_reduction <add>, %524, %cst_32 [1] : vector<16x4xf32> to vector<16xf32>
    %526 = vector.shape_cast %525 : vector<16xf32> to vector<16x1xf32>
    %527 = tpu.reciprocal %526 {approx = true} : vector<16x1xf32> -> vector<16x1xf32>
    %528 = arith.mulf %526, %527 : vector<16x1xf32>
    %cst_33 = arith.constant 2.000000e+00 : f32
    %529 = vector.broadcast %cst_33 : f32 to vector<16x1xf32>
    %530 = arith.subf %529, %528 : vector<16x1xf32>
    %531 = arith.mulf %527, %530 : vector<16x1xf32>
    %532 = vector.broadcast %531 : vector<16x1xf32> to vector<16x4xf32>
    %533 = arith.mulf %524, %532 : vector<16x4xf32>
    %534 = tpu.transpose %533, [1, 0] : vector<16x4xf32> -> vector<4x16xf32>
    %cst_34 = arith.constant 0.000000e+00 : f32
    %535 = vector.broadcast %cst_34 : f32 to vector<16x16xf32>
    %cst_35 = arith.constant 0.000000e+00 : f32
    %536 = vector.broadcast %cst_35 : f32 to vector<1x1xf32>
    %537 = vector.extract_strided_slice %533 {offsets = [0, 0], sizes = [16, 1], strides = [1, 1]} : vector<16x4xf32> to vector<16x1xf32>
    %538 = vector.extract_strided_slice %534 {offsets = [0, 0], sizes = [1, 16], strides = [1, 1]} : vector<4x16xf32> to vector<1x16xf32>
    %539 = vector.broadcast %537 : vector<16x1xf32> to vector<16x16xf32>
    %540 = vector.broadcast %538 : vector<1x16xf32> to vector<16x16xf32>
    %541 = arith.subf %539, %540 : vector<16x16xf32>
    %542 = math.absf %541 : vector<16x16xf32>
    %543 = arith.addf %535, %542 : vector<16x16xf32>
    %544 = vector.broadcast %538 : vector<1x16xf32> to vector<16x16xf32>
    %545 = vector.broadcast %537 : vector<16x1xf32> to vector<16x16xf32>
    %546 = arith.cmpf ogt, %544, %545 : vector<16x16xf32>
    %547 = arith.extui %546 : vector<16x16xi1> to vector<16x16xi32>
    %548 = arith.sitofp %547 : vector<16x16xi32> to vector<16x16xf32>
    %cst_36 = arith.constant dense<0.000000e+00> : vector<16xf32>
    %549 = vector.multi_reduction <add>, %548, %cst_36 [1] : vector<16x16xf32> to vector<16xf32>
    %550 = vector.shape_cast %549 : vector<16xf32> to vector<16x1xf32>
    %cst_37 = arith.constant 4.000000e+00 : f32
    %551 = vector.broadcast %cst_37 : f32 to vector<16x1xf32>
    %552 = arith.cmpf ole, %550, %551 : vector<16x1xf32>
    %cst_38 = arith.constant 2.000000e+00 : f32
    %553 = vector.broadcast %cst_38 : f32 to vector<16x1xf32>
    %554 = arith.select %552, %537, %553 : vector<16x1xi1>, vector<16x1xf32>
    %cst_39 = arith.constant dense<0x7F800000> : vector<1xf32>
    %555 = vector.multi_reduction <minimumf>, %554, %cst_39 [0] : vector<16x1xf32> to vector<1xf32>
    %556 = vector.shape_cast %555 : vector<1xf32> to vector<1x1xf32>
    %557 = vector.broadcast %556 : vector<1x1xf32> to vector<16x1xf32>
    %558 = arith.subf %537, %557 : vector<16x1xf32>
    %cst_40 = arith.constant 0.000000e+00 : f32
    %559 = vector.broadcast %cst_40 : f32 to vector<16x1xf32>
    %560 = arith.cmpf oge, %558, %559 : vector<16x1xf32>
    %cst_41 = arith.constant 3.000000e+00 : f32
    %561 = vector.broadcast %cst_41 : f32 to vector<16x1xf32>
    %562 = arith.mulf %561, %558 : vector<16x1xf32>
    %cst_42 = arith.constant 0.000000e+00 : f32
    %563 = vector.broadcast %cst_42 : f32 to vector<16x1xf32>
    %564 = arith.subf %563, %558 : vector<16x1xf32>
    %565 = arith.select %560, %562, %564 : vector<16x1xi1>, vector<16x1xf32>
    %cst_43 = arith.constant dense<0.000000e+00> : vector<16xf32>
    %566 = vector.multi_reduction <add>, %565, %cst_43 [1] : vector<16x1xf32> to vector<16xf32>
    %567 = vector.shape_cast %566 : vector<16xf32> to vector<16x1xf32>
    %cst_44 = arith.constant dense<0.000000e+00> : vector<1xf32>
    %568 = vector.multi_reduction <add>, %567, %cst_44 [0] : vector<16x1xf32> to vector<1xf32>
    %569 = vector.shape_cast %568 : vector<1xf32> to vector<1x1xf32>
    %570 = arith.addf %536, %569 : vector<1x1xf32>
    %571 = vector.extract_strided_slice %533 {offsets = [0, 1], sizes = [16, 1], strides = [1, 1]} : vector<16x4xf32> to vector<16x1xf32>
    %572 = vector.extract_strided_slice %534 {offsets = [1, 0], sizes = [1, 16], strides = [1, 1]} : vector<4x16xf32> to vector<1x16xf32>
    %573 = vector.broadcast %571 : vector<16x1xf32> to vector<16x16xf32>
    %574 = vector.broadcast %572 : vector<1x16xf32> to vector<16x16xf32>
    %575 = arith.subf %573, %574 : vector<16x16xf32>
    %576 = math.absf %575 : vector<16x16xf32>
    %577 = arith.addf %543, %576 : vector<16x16xf32>
    %578 = vector.broadcast %572 : vector<1x16xf32> to vector<16x16xf32>
    %579 = vector.broadcast %571 : vector<16x1xf32> to vector<16x16xf32>
    %580 = arith.cmpf ogt, %578, %579 : vector<16x16xf32>
    %581 = arith.extui %580 : vector<16x16xi1> to vector<16x16xi32>
    %582 = arith.sitofp %581 : vector<16x16xi32> to vector<16x16xf32>
    %cst_45 = arith.constant dense<0.000000e+00> : vector<16xf32>
    %583 = vector.multi_reduction <add>, %582, %cst_45 [1] : vector<16x16xf32> to vector<16xf32>
    %584 = vector.shape_cast %583 : vector<16xf32> to vector<16x1xf32>
    %cst_46 = arith.constant 4.000000e+00 : f32
    %585 = vector.broadcast %cst_46 : f32 to vector<16x1xf32>
    %586 = arith.cmpf ole, %584, %585 : vector<16x1xf32>
    %cst_47 = arith.constant 2.000000e+00 : f32
    %587 = vector.broadcast %cst_47 : f32 to vector<16x1xf32>
    %588 = arith.select %586, %571, %587 : vector<16x1xi1>, vector<16x1xf32>
    %cst_48 = arith.constant dense<0x7F800000> : vector<1xf32>
    %589 = vector.multi_reduction <minimumf>, %588, %cst_48 [0] : vector<16x1xf32> to vector<1xf32>
    %590 = vector.shape_cast %589 : vector<1xf32> to vector<1x1xf32>
    %591 = vector.broadcast %590 : vector<1x1xf32> to vector<16x1xf32>
    %592 = arith.subf %571, %591 : vector<16x1xf32>
    %cst_49 = arith.constant 0.000000e+00 : f32
    %593 = vector.broadcast %cst_49 : f32 to vector<16x1xf32>
    %594 = arith.cmpf oge, %592, %593 : vector<16x1xf32>
    %cst_50 = arith.constant 3.000000e+00 : f32
    %595 = vector.broadcast %cst_50 : f32 to vector<16x1xf32>
    %596 = arith.mulf %595, %592 : vector<16x1xf32>
    %cst_51 = arith.constant 0.000000e+00 : f32
    %597 = vector.broadcast %cst_51 : f32 to vector<16x1xf32>
    %598 = arith.subf %597, %592 : vector<16x1xf32>
    %599 = arith.select %594, %596, %598 : vector<16x1xi1>, vector<16x1xf32>
    %cst_52 = arith.constant dense<0.000000e+00> : vector<16xf32>
    %600 = vector.multi_reduction <add>, %599, %cst_52 [1] : vector<16x1xf32> to vector<16xf32>
    %601 = vector.shape_cast %600 : vector<16xf32> to vector<16x1xf32>
    %cst_53 = arith.constant dense<0.000000e+00> : vector<1xf32>
    %602 = vector.multi_reduction <add>, %601, %cst_53 [0] : vector<16x1xf32> to vector<1xf32>
    %603 = vector.shape_cast %602 : vector<1xf32> to vector<1x1xf32>
    %604 = arith.addf %570, %603 : vector<1x1xf32>
    %605 = vector.extract_strided_slice %533 {offsets = [0, 2], sizes = [16, 1], strides = [1, 1]} : vector<16x4xf32> to vector<16x1xf32>
    %606 = vector.extract_strided_slice %534 {offsets = [2, 0], sizes = [1, 16], strides = [1, 1]} : vector<4x16xf32> to vector<1x16xf32>
    %607 = vector.broadcast %605 : vector<16x1xf32> to vector<16x16xf32>
    %608 = vector.broadcast %606 : vector<1x16xf32> to vector<16x16xf32>
    %609 = arith.subf %607, %608 : vector<16x16xf32>
    %610 = math.absf %609 : vector<16x16xf32>
    %611 = arith.addf %577, %610 : vector<16x16xf32>
    %612 = vector.broadcast %606 : vector<1x16xf32> to vector<16x16xf32>
    %613 = vector.broadcast %605 : vector<16x1xf32> to vector<16x16xf32>
    %614 = arith.cmpf ogt, %612, %613 : vector<16x16xf32>
    %615 = arith.extui %614 : vector<16x16xi1> to vector<16x16xi32>
    %616 = arith.sitofp %615 : vector<16x16xi32> to vector<16x16xf32>
    %cst_54 = arith.constant dense<0.000000e+00> : vector<16xf32>
    %617 = vector.multi_reduction <add>, %616, %cst_54 [1] : vector<16x16xf32> to vector<16xf32>
    %618 = vector.shape_cast %617 : vector<16xf32> to vector<16x1xf32>
    %cst_55 = arith.constant 4.000000e+00 : f32
    %619 = vector.broadcast %cst_55 : f32 to vector<16x1xf32>
    %620 = arith.cmpf ole, %618, %619 : vector<16x1xf32>
    %cst_56 = arith.constant 2.000000e+00 : f32
    %621 = vector.broadcast %cst_56 : f32 to vector<16x1xf32>
    %622 = arith.select %620, %605, %621 : vector<16x1xi1>, vector<16x1xf32>
    %cst_57 = arith.constant dense<0x7F800000> : vector<1xf32>
    %623 = vector.multi_reduction <minimumf>, %622, %cst_57 [0] : vector<16x1xf32> to vector<1xf32>
    %624 = vector.shape_cast %623 : vector<1xf32> to vector<1x1xf32>
    %625 = vector.broadcast %624 : vector<1x1xf32> to vector<16x1xf32>
    %626 = arith.subf %605, %625 : vector<16x1xf32>
    %cst_58 = arith.constant 0.000000e+00 : f32
    %627 = vector.broadcast %cst_58 : f32 to vector<16x1xf32>
    %628 = arith.cmpf oge, %626, %627 : vector<16x1xf32>
    %cst_59 = arith.constant 3.000000e+00 : f32
    %629 = vector.broadcast %cst_59 : f32 to vector<16x1xf32>
    %630 = arith.mulf %629, %626 : vector<16x1xf32>
    %cst_60 = arith.constant 0.000000e+00 : f32
    %631 = vector.broadcast %cst_60 : f32 to vector<16x1xf32>
    %632 = arith.subf %631, %626 : vector<16x1xf32>
    %633 = arith.select %628, %630, %632 : vector<16x1xi1>, vector<16x1xf32>
    %cst_61 = arith.constant dense<0.000000e+00> : vector<16xf32>
    %634 = vector.multi_reduction <add>, %633, %cst_61 [1] : vector<16x1xf32> to vector<16xf32>
    %635 = vector.shape_cast %634 : vector<16xf32> to vector<16x1xf32>
    %cst_62 = arith.constant dense<0.000000e+00> : vector<1xf32>
    %636 = vector.multi_reduction <add>, %635, %cst_62 [0] : vector<16x1xf32> to vector<1xf32>
    %637 = vector.shape_cast %636 : vector<1xf32> to vector<1x1xf32>
    %638 = arith.addf %604, %637 : vector<1x1xf32>
    %639 = vector.extract_strided_slice %533 {offsets = [0, 3], sizes = [16, 1], strides = [1, 1]} : vector<16x4xf32> to vector<16x1xf32>
    %640 = vector.extract_strided_slice %534 {offsets = [3, 0], sizes = [1, 16], strides = [1, 1]} : vector<4x16xf32> to vector<1x16xf32>
    %641 = vector.broadcast %639 : vector<16x1xf32> to vector<16x16xf32>
    %642 = vector.broadcast %640 : vector<1x16xf32> to vector<16x16xf32>
    %643 = arith.subf %641, %642 : vector<16x16xf32>
    %644 = math.absf %643 : vector<16x16xf32>
    %645 = arith.addf %611, %644 : vector<16x16xf32>
    %646 = vector.broadcast %640 : vector<1x16xf32> to vector<16x16xf32>
    %647 = vector.broadcast %639 : vector<16x1xf32> to vector<16x16xf32>
    %648 = arith.cmpf ogt, %646, %647 : vector<16x16xf32>
    %649 = arith.extui %648 : vector<16x16xi1> to vector<16x16xi32>
    %650 = arith.sitofp %649 : vector<16x16xi32> to vector<16x16xf32>
    %cst_63 = arith.constant dense<0.000000e+00> : vector<16xf32>
    %651 = vector.multi_reduction <add>, %650, %cst_63 [1] : vector<16x16xf32> to vector<16xf32>
    %652 = vector.shape_cast %651 : vector<16xf32> to vector<16x1xf32>
    %cst_64 = arith.constant 4.000000e+00 : f32
    %653 = vector.broadcast %cst_64 : f32 to vector<16x1xf32>
    %654 = arith.cmpf ole, %652, %653 : vector<16x1xf32>
    %cst_65 = arith.constant 2.000000e+00 : f32
    %655 = vector.broadcast %cst_65 : f32 to vector<16x1xf32>
    %656 = arith.select %654, %639, %655 : vector<16x1xi1>, vector<16x1xf32>
    %cst_66 = arith.constant dense<0x7F800000> : vector<1xf32>
    %657 = vector.multi_reduction <minimumf>, %656, %cst_66 [0] : vector<16x1xf32> to vector<1xf32>
    %658 = vector.shape_cast %657 : vector<1xf32> to vector<1x1xf32>
    %659 = vector.broadcast %658 : vector<1x1xf32> to vector<16x1xf32>
    %660 = arith.subf %639, %659 : vector<16x1xf32>
    %cst_67 = arith.constant 0.000000e+00 : f32
    %661 = vector.broadcast %cst_67 : f32 to vector<16x1xf32>
    %662 = arith.cmpf oge, %660, %661 : vector<16x1xf32>
    %cst_68 = arith.constant 3.000000e+00 : f32
    %663 = vector.broadcast %cst_68 : f32 to vector<16x1xf32>
    %664 = arith.mulf %663, %660 : vector<16x1xf32>
    %cst_69 = arith.constant 0.000000e+00 : f32
    %665 = vector.broadcast %cst_69 : f32 to vector<16x1xf32>
    %666 = arith.subf %665, %660 : vector<16x1xf32>
    %667 = arith.select %662, %664, %666 : vector<16x1xi1>, vector<16x1xf32>
    %cst_70 = arith.constant dense<0.000000e+00> : vector<16xf32>
    %668 = vector.multi_reduction <add>, %667, %cst_70 [1] : vector<16x1xf32> to vector<16xf32>
    %669 = vector.shape_cast %668 : vector<16xf32> to vector<16x1xf32>
    %cst_71 = arith.constant dense<0.000000e+00> : vector<1xf32>
    %670 = vector.multi_reduction <add>, %669, %cst_71 [0] : vector<16x1xf32> to vector<1xf32>
    %671 = vector.shape_cast %670 : vector<1xf32> to vector<1x1xf32>
    %672 = arith.addf %638, %671 : vector<1x1xf32>
    %673 = arith.mulf %1, %645 : vector<16x16xf32>
    %cst_72 = arith.constant dense<0.000000e+00> : vector<16xf32>
    %674 = vector.multi_reduction <add>, %673, %cst_72 [1] : vector<16x16xf32> to vector<16xf32>
    %675 = vector.shape_cast %674 : vector<16xf32> to vector<16x1xf32>
    %cst_73 = arith.constant dense<0.000000e+00> : vector<1xf32>
    %676 = vector.multi_reduction <add>, %675, %cst_73 [0] : vector<16x1xf32> to vector<1xf32>
    %677 = vector.shape_cast %676 : vector<1xf32> to vector<1x1xf32>
    %678 = vector.broadcast %0 : f32 to vector<1x1xf32>
    %679 = arith.mulf %677, %678 : vector<1x1xf32>
    %cst_74 = arith.constant 4.800000e+01 : f32
    %680 = vector.broadcast %cst_74 : f32 to vector<1x1xf32>
    %681 = arith.subf %680, %672 : vector<1x1xf32>
    %cst_75 = arith.constant 4.800000e+01 : f32
    %682 = vector.broadcast %cst_75 : f32 to vector<1x1xf32>
    %683 = arith.divf %681, %682 : vector<1x1xf32>
    %cst_76 = arith.constant 7.850000e-01 : f32
    %684 = vector.broadcast %cst_76 : f32 to vector<1x1xf32>
    %685 = arith.mulf %684, %679 : vector<1x1xf32>
    %cst_77 = arith.constant 5.140000e-01 : f32
    %686 = vector.broadcast %cst_77 : f32 to vector<1x1xf32>
    %687 = arith.mulf %686, %683 : vector<1x1xf32>
    %688 = arith.addf %685, %687 : vector<1x1xf32>
    %c0_78 = arith.constant 0 : index
    %c0_79 = arith.constant 0 : index
    %689 = vector.load %arg9[%c0_78, %c0_79] : memref<16x4xf32, #tpu.memory_space<vmem>>, vector<16x4xf32>
    tpu.vector_store %arg9[%c0_78, %c0_79], %533 {strides = array<i32>} : memref<16x4xf32, #tpu.memory_space<vmem>>, vector<16x4xf32>,
    %c0_80 = arith.constant 0 : index
    %c0_81 = arith.constant 0 : index
    %690 = vector.load %arg10[%c0_80, %c0_81] : memref<1x1xf32, #tpu.memory_space<vmem>>, vector<1x1xf32>
    tpu.vector_store %arg10[%c0_80, %c0_81], %688 {strides = array<i32>} : memref<1x1xf32, #tpu.memory_space<vmem>>, vector<1x1xf32>,
    return
  }
}

</mosaic_0001>

<bundles_post_ra>
// kernel: net_forward.1
= control target key start
LH: loop header
LB: loop body
LE: loop exit
PB: predicated region body
PF: predicated region fallthrough
CT: control target
= control target key end

     0   :  { %vm56_vm0 = vcmask 1043456   ;;  %v3390_v3 = vmov 0.0   ;;  %vm2276_vm1 = vmmov 0   ;;  %s3315_s0 = inlined_call_operand.<no memory space> [shape: f32[1,1], index: 0, kind: input, shape index: {}]   ;;  %s3316_s1 = inlined_call_operand.vmem [shape: f32[16,8], index: 1, kind: input, shape index: {}]   ;;  %s3317_s2 = inlined_call_operand.vmem [shape: f32[16,16], index: 2, kind: input, shape index: {}]   ;;  %s3318_s3 = inlined_call_operand.vmem [shape: f32[8,33], index: 3, kind: input, shape index: {}]   ;;  %s3319_s4 = inlined_call_operand.vmem [shape: f32[1,33], index: 4, kind: input, shape index: {}]   ;;  %s3320_s5 = inlined_call_operand.vmem [shape: f32[32,33], index: 5, kind: input, shape index: {}]   ;;  %s3321_s6 = inlined_call_operand.vmem [shape: f32[1,33], index: 6, kind: input, shape index: {}]   ;;  %s3322_s7 = inlined_call_operand.vmem [shape: f32[32,4], index: 7, kind: input, shape index: {}]   ;;  %s3323_s8 = inlined_call_operand.vmem [shape: f32[1,4], index: 8, kind: input, shape index: {}]   ;;  %s3324_s9 = inlined_call_operand.vmem [shape: f32[16,4], index: 9, kind: output, shape index: {0}]   ;;  %s3325_s10 = inlined_call_operand.hbm [shape: f32[1,1], index: 10, kind: output, shape index: {1}]  }
   0x1   :  { %v42_v0 = vld [vmem:[%s3318_s3] sm:$0xff]  ;;  %v41_v2 = vld [vmem:[%s3316_s1 + $0x8] sm:$0xff]  ;;  %2015 = vmatprep.subr.bf16.mxu0 %v3390_v3  ;;  %2017 = vmatprep.mubr.msk.bf16.mxu0 %vm2276_vm1, %v3390_v3 }
   0x2   :  { %v40_v1 = vld [vmem:[%s3316_s1] sm:$0xff]  ;;  %v45_v4 = vpack.c.bf16 %v42_v0, %v42_v0 }
   0x3   :  { %17 = vsyncpa [#allocation4], 0  ;;  %2021 = vmatprep.subr.bf16.mxu1 %v3390_v3  ;;  %2023 = vmatprep.mubr.msk.bf16.mxu1 %vm2276_vm1, %v3390_v3  ;;  %v44_v6 = vpack.c.bf16 %v41_v2, %v40_v1  ;;  %vm52_vm2 = vcmask 64512   ;;  %v3384_v7 = vmov 1   ;;  %v3388_v8 = vmov 0   ;;  %s2311_s22 = smov 126  }
   0x4   :  { %v58_v5 = vsel %vm56_vm0, %v45_v4, 0  ;;  %2089 = vset.pattern.permute.xlu1 %v3384_v7  ;;  %2088 = vset.pattern.permute.xlu0 %v3388_v8  ;;  %v1983_v9 = vld [vmem:[%s3319_s4] ss:$0 sm:$0xff]  ;;  %v3376_v17 = vmov 5   ;;  %v3380_v18 = vmov 4   ;;  %v3372_v19 = vmov 2  }
   0x5   :  { %2016 = vmatpush3.bf16.msra.mxu0 %v58_v5  ;;  %v3368_v20 = vmov 6   ;;  %v3363_v21 = vmov 8   ;;  %v3357_v22 = vmov 3   ;;  %v3361_v23 = vmov 9   ;;  %s2312_s23 = smov 125   ;;  %s2313_s26 = smov [#allocation3]  }
   0x6   :  { %2027 = vmatprep.subr.bf16.mxu0 %v3390_v3  ;;  %v3359_v24 = vmov 12   ;;  %v3353_v25 = vmov 7   ;;  %v3355_v26 = vmov 14   ;;  %v3326_v27 = vmov 10   ;;  %s1973_s27 = sshll.u32 %s2313_s26, 4  ;;  %s1974_s27 = int_to_ptr.vmem [resolvable:$true] %s1973_s27 }
   0x7   :  { %v3351_v28 = vmov 15   ;;  %v3347_v29 = vmov 13   ;;  %v3349_v30 = vmov 21   ;;  %v3386_v31 = vmov 11   ;;  %s2251_s28 = scalar_lea.vmem %s1974_s27, 16  ;;  %s2255_s29 = scalar_lea.vmem %s1974_s27, 32 }
   0x8   :  { %2018 = vmatmul.mubr.msk.bf16.vlgmr.msra.gmra.mrb[0].mxu0 %vm52_vm2, %v44_v6  ;;  %v3345_v32 = vmov 24   ;;  %v3341_v33 = vmov 16   ;;  %v3343_v34 = vmov 26   ;;  %v3382_v35 = vmov 17   ;;  %p2252_p0 = scmp.ne.s32.totalorder %s1974_s27, %s2251_s28  ;;  %p2256_p1 = scmp.lt.s32.totalorder %s1974_s27, %s1974_s27 }
   0x9   :  { %2031 = vmatprep.mubr.msk.bf16.mxu0 %vm2276_vm1, %v3390_v3  ;;  %v3337_v36 = vmov 27   ;;  %v3335_v37 = vmov 18   ;;  %v3378_v38 = vmov 20   ;;  %v3333_v39 = vmov 19   ;;  %p2257_p2 = scmp.lt.s32.totalorder %s2255_s29, %s2251_s28 }
   0xa   :  { %v3374_v40 = vmov 22   ;;  %v3331_v41 = vmov 25   ;;  %v3370_v42 = vmov 23   ;;  %v3329_v43 = vmov 28  }
   0xb   :  { %v3365_v44 = vmov 29   ;;  %v3327_v45 = vmov 30   ;;  %v3339_v46 = vmov 31   ;;  %vm717_vm3 = vcmask 130048   ;;  %p2258_p3 = por %p2257_p2, %p2256_p1 }
   0xc   :  { %vm806_vm6 = vcmask 261120   ;;  %vm1599_vm9 = vcmask 31744   ;;  %vm1762_vm2 = vcmask 15368  }
   0xd   :  { %p2259_p4 = pnand %p2258_p3, %p2252_p0 }
  0xdb   :  { %v94_v10 = vpop.f32.mrb[0].mxu0 }
  0xdc   :  { %v2392_v11 = vadd.f32 %v1983_v9, %v94_v10  ;;  %v2019_v12 = vpop.f32.mrb[1].mxu0 }
  0xdd   :  { %v97_v13 = vpop.f32.mrb[2].mxu0 }
  0xde   :  { %3407 = vst [vmem:[#allocation6_spill] sm:$0xff] %v2392_v11  ;;  %v2394_v14 = vadd.f32 %v1983_v9, %v97_v13  ;;  %152 = vperm.xlu1 %2089, %v2392_v11   ;;  %135 = vperm.xlu0 %2088, %v2392_v11   ;;  %v2020_v15 = vpop.f32.mrb[3].mxu0 }
  0xe0   :  { %3408 = vst [vmem:[#allocation7_spill] sm:$0xff] %v2394_v14  ;;  %v716_v16 = vpack.c.bf16 %v2394_v14, %v2392_v11 }
  0xe2   :  { %2091 = vset.pattern.permute.xlu1 %v3376_v17  ;;  %2090 = vset.pattern.permute.xlu0 %v3380_v18 }
  0xe3   :  { %2022 = vmatpush3.bf16.msra.mxu1 %v716_v16  ;;  %222 = vperm.xlu1 %2091, %v2392_v11  }
  0xe4   :  { %206 = vperm.xlu0 %2090, %v2392_v11   ;;  %2035 = vmatprep.subr.bf16.mxu1 %v3390_v3 }
  0xe7   :  { %2092 = vset.pattern.permute.xlu1 %v3372_v19 }
  0xe8   :  { %2093 = vset.pattern.permute.xlu0 %v3368_v20  ;;  %170 = vperm.xlu1 %2092, %v2392_v11  }
  0xe9   :  { %240 = vperm.xlu0 %2093, %v2392_v11  }
  0xec   :  { %2094 = vset.pattern.permute.xlu1 %v3363_v21 }
  0xed   :  { %2096 = vset.pattern.permute.xlu0 %v3357_v22  ;;  %278 = vperm.xlu1 %2094, %v2392_v11  }
  0xee   :  { %188 = vperm.xlu0 %2096, %v2392_v11  }
  0xf1   :  { %2095 = vset.pattern.permute.xlu1 %v3361_v23 }
  0xf2   :  { %2099 = vset.pattern.permute.xlu0 %v3359_v24  ;;  %294 = vperm.xlu1 %2095, %v2392_v11  }
  0xf3   :  { %350 = vperm.xlu0 %2099, %v2392_v11  }
  0xf6   :  { %2097 = vset.pattern.permute.xlu1 %v3353_v25 }
  0xf7   :  { %2102 = vset.pattern.permute.xlu0 %v3355_v26  ;;  %258 = vperm.xlu1 %2097, %v2392_v11  }
  0xf8   :  { %384 = vperm.xlu0 %2102, %v2392_v11  }
  0xfb   :  { %2098 = vset.pattern.permute.xlu1 %v3326_v27 }
  0xfc   :  { %2105 = vset.pattern.permute.xlu0 %v3351_v28  ;;  %312 = vperm.xlu1 %2098, %v2392_v11  }
  0xfd   :  { %402 = vperm.xlu0 %2105, %v2392_v11  }
 0x100   :  { %2100 = vset.pattern.permute.xlu1 %v3347_v29 }
 0x101   :  { %2108 = vset.pattern.permute.xlu0 %v3349_v30  ;;  %366 = vperm.xlu1 %2100, %v2392_v11  }
 0x102   :  { %510 = vperm.xlu0 %2108, %v2392_v11  }
 0x105   :  { %2101 = vset.pattern.permute.xlu1 %v3386_v31 }
 0x106   :  { %2111 = vset.pattern.permute.xlu0 %v3345_v32  ;;  %330 = vperm.xlu1 %2101, %v2392_v11  }
 0x107   :  { %566 = vperm.xlu0 %2111, %v2392_v11  }
 0x10a   :  { %2103 = vset.pattern.permute.xlu1 %v3341_v33 }
 0x10b   :  { %2114 = vset.pattern.permute.xlu0 %v3343_v34  ;;  %422 = vperm.xlu1 %2103, %v2392_v11  }
 0x10c   :  { %600 = vperm.xlu0 %2114, %v2392_v11  }
 0x10f   :  { %2104 = vset.pattern.permute.xlu1 %v3382_v35 }
 0x110   :  { %2117 = vset.pattern.permute.xlu0 %v3337_v36  ;;  %438 = vperm.xlu1 %2104, %v2392_v11  }
 0x111   :  { %618 = vperm.xlu0 %2117, %v2392_v11  }
 0x114   :  { %2106 = vset.pattern.permute.xlu1 %v3335_v37 }
 0x115   :  { %2120 = vset.pattern.permute.xlu0 %v3388_v8  ;;  %456 = vperm.xlu1 %2106, %v2392_v11  }
 0x116   :  { %140 = vperm.xlu0 %2120, %v2394_v14  }
 0x119   :  { %2107 = vset.pattern.permute.xlu1 %v3378_v38 }
 0x11a   :  { %2123 = vset.pattern.permute.xlu0 %v3376_v17  ;;  %494 = vperm.xlu1 %2107, %v2392_v11  }
 0x11b   :  { %226 = vperm.xlu0 %2123, %v2394_v14  }
 0x11e   :  { %2109 = vset.pattern.permute.xlu1 %v3333_v39 }
 0x11f   :  { %2126 = vset.pattern.permute.xlu0 %v3363_v21  ;;  %474 = vperm.xlu1 %2109, %v2392_v11  }
 0x120   :  { %282 = vperm.xlu0 %2126, %v2394_v14  }
 0x123   :  { %2110 = vset.pattern.permute.xlu1 %v3374_v40 }
 0x124   :  { %2129 = vset.pattern.permute.xlu0 %v3353_v25  ;;  %528 = vperm.xlu1 %2110, %v2392_v11  }
 0x125   :  { %262 = vperm.xlu0 %2129, %v2394_v14  }
 0x128   :  { %2112 = vset.pattern.permute.xlu1 %v3331_v41 }
 0x129   :  { %2132 = vset.pattern.permute.xlu0 %v3347_v29  ;;  %582 = vperm.xlu1 %2112, %v2392_v11  }
 0x12a   :  { %370 = vperm.xlu0 %2132, %v2394_v14  }
 0x12d   :  { %2113 = vset.pattern.permute.xlu1 %v3370_v42 }
 0x12e   :  { %2135 = vset.pattern.permute.xlu0 %v3341_v33  ;;  %546 = vperm.xlu1 %2113, %v2392_v11   ;;  %v3367_v33 = vmov 32  }
 0x12f   :  { %426 = vperm.xlu0 %2135, %v2394_v14  }
 0x132   :  { %2115 = vset.pattern.permute.xlu1 %v3329_v43 }
 0x133   :  { %2138 = vset.pattern.permute.xlu0 %v3335_v37  ;;  %638 = vperm.xlu1 %2115, %v2392_v11  }
 0x134   :  { %460 = vperm.xlu0 %2138, %v2394_v14  }
 0x137   :  { %2116 = vset.pattern.permute.xlu1 %v3365_v44 }
 0x138   :  { %2141 = vset.pattern.permute.xlu0 %v3333_v39  ;;  %654 = vperm.xlu1 %2116, %v2392_v11  }
 0x139   :  { %478 = vperm.xlu0 %2141, %v2394_v14  }
 0x13c   :  { %2118 = vset.pattern.permute.xlu1 %v3327_v45 }
 0x13d   :  { %2144 = vset.pattern.permute.xlu0 %v3331_v41  ;;  %672 = vperm.xlu1 %2118, %v2392_v11  }
 0x13e   :  { %586 = vperm.xlu0 %2144, %v2394_v14  }
 0x141   :  { %2119 = vset.pattern.permute.xlu1 %v3339_v46 }
 0x142   :  { %2147 = vset.pattern.permute.xlu0 %v3329_v43  ;;  %690 = vperm.xlu1 %2119, %v2392_v11  }
 0x143   :  { %642 = vperm.xlu0 %2147, %v2394_v14  }
 0x146   :  { %2121 = vset.pattern.permute.xlu1 %v3384_v7 }
 0x147   :  { %2150 = vset.pattern.permute.xlu0 %v3327_v45  ;;  %156 = vperm.xlu1 %2121, %v2394_v14  }
 0x148   :  { %676 = vperm.xlu0 %2150, %v2394_v14  }
 0x14b   :  { %2122 = vset.pattern.permute.xlu1 %v3380_v18 }
 0x14c   :  { %210 = vperm.xlu1 %2122, %v2394_v14  }
 0x150   :  { %2124 = vset.pattern.permute.xlu1 %v3372_v19 }
 0x151   :  { %174 = vperm.xlu1 %2124, %v2394_v14  }
 0x155   :  { %2125 = vset.pattern.permute.xlu1 %v3368_v20 }
 0x156   :  { %244 = vperm.xlu1 %2125, %v2394_v14  }
 0x15a   :  { %2127 = vset.pattern.permute.xlu1 %v3361_v23 }
 0x15b   :  { %298 = vperm.xlu1 %2127, %v2394_v14  }
 0x15d   :  { %v2493_v47 = vpop.permute.xlu1 %152  ;;  %v2504_v50 = vpop.permute.xlu0 %135 }
 0x15f   :  { %2128 = vset.pattern.permute.xlu1 %v3357_v22 }
 0x160   :  { %192 = vperm.xlu1 %2128, %v2394_v14  }
 0x162   :  { %v2497_v48 = vpop.permute.xlu1 %222 }
 0x163   :  { %v2512_v52 = vpop.permute.xlu0 %206 }
 0x164   :  { %2130 = vset.pattern.permute.xlu1 %v3326_v27 }
 0x165   :  { %316 = vperm.xlu1 %2130, %v2394_v14  }
 0x166   :  { %101 = vxpose.xlu0.b32.start [1/2] (short) (narrow) %v2392_v11, 32 }
 0x167   :  { %v2502_v49 = vpop.permute.xlu1 %170 }
 0x168   :  { %v2519_v54 = vpop.permute.xlu0 %240 }
 0x169   :  { %2131 = vset.pattern.permute.xlu1 %v3359_v24 }
 0x16a   :  { %102 = vxpose.xlu0.b32.end [2/2] (short) (narrow) %v2394_v14, 32  ;;  %354 = vperm.xlu1 %2131, %v2394_v14  }
 0x16c   :  { %v2509_v51 = vpop.permute.xlu1 %278 }
 0x16d   :  { %v2525_v56 = vpop.permute.xlu0 %188 }
 0x16e   :  { %2133 = vset.pattern.permute.xlu1 %v3386_v31 }
 0x16f   :  { %334 = vperm.xlu1 %2133, %v2394_v14  }
 0x171   :  { %v2515_v53 = vpop.permute.xlu1 %294 }
 0x172   :  { %v2533_v59 = vpop.permute.xlu0 %350 }
 0x173   :  { %2134 = vset.pattern.permute.xlu1 %v3355_v26 }
 0x174   :  { %388 = vperm.xlu1 %2134, %v2394_v14  }
 0x176   :  { %v2521_v55 = vpop.permute.xlu1 %258 }
 0x177   :  { %v2539_v61 = vpop.permute.xlu0 %384 }
 0x178   :  { %2136 = vset.pattern.permute.xlu1 %v3382_v35 }
 0x179   :  { %442 = vperm.xlu1 %2136, %v2394_v14  }
 0x17b   :  { %v2527_v57 = vpop.permute.xlu1 %312 }
 0x17c   :  { %v2546_v63 = vpop.permute.xlu0 %402 }
 0x17d   :  { %2137 = vset.pattern.permute.xlu1 %v3351_v28  ;;  %3409 = vst [vmem:[#allocation8_spill] sm:$0xff] %v2546_v63 }
 0x17e   :  { %406 = vperm.xlu1 %2137, %v2394_v14  }
 0x180   :  { %v2531_v58 = vpop.permute.xlu1 %366 }
 0x181   :  { %v2553_v1 = vpop.permute.xlu0 %510 }
 0x182   :  { %2139 = vset.pattern.permute.xlu1 %v3378_v38  ;;  %3410 = vst [vmem:[#allocation9_spill] sm:$0xff] %v2553_v1 }
 0x183   :  { %498 = vperm.xlu1 %2139, %v2394_v14  }
 0x185   :  { %v2537_v60 = vpop.permute.xlu1 %330 }
 0x186   :  { %v2560_v4 = vpop.permute.xlu0 %566 }
 0x187   :  { %2140 = vset.pattern.permute.xlu1 %v3349_v30  ;;  %3412 = vst [vmem:[#allocation11_spill] sm:$0xff] %v2560_v4 }
 0x188   :  { %514 = vperm.xlu1 %2140, %v2394_v14  }
 0x18a   :  { %v2543_v62 = vpop.permute.xlu1 %422 }
 0x18b   :  { %v2568_v9 = vpop.permute.xlu0 %600 }
 0x18c   :  { %2142 = vset.pattern.permute.xlu1 %v3374_v40  ;;  %3414 = vst [vmem:[#allocation13_spill] sm:$0xff] %v2568_v9 }
 0x18d   :  { %532 = vperm.xlu1 %2142, %v2394_v14  }
 0x18f   :  { %v2549_v0 = vpop.permute.xlu1 %438 }
 0x190   :  { %v2574_v12 = vpop.permute.xlu0 %618 }
 0x191   :  { %2143 = vset.pattern.permute.xlu1 %v3345_v32  ;;  %3416 = vst [vmem:[#allocation15_spill] sm:$0xff] %v2574_v12 }
 0x192   :  { %570 = vperm.xlu1 %2143, %v2394_v14  }
 0x193   :  { %2163 = vset.pattern.permute.xlu0 %v3326_v27 }
 0x194   :  { %v2556_v2 = vpop.permute.xlu1 %456 }
 0x195   :  { %3411 = vst [vmem:[#allocation10_spill] sm:$0xff] %v2556_v2  ;;  %v141_v15 = vpop.permute.xlu0 %140 }
 0x196   :  { %2145 = vset.pattern.permute.xlu1 %v3370_v42 }
 0x197   :  { %550 = vperm.xlu1 %2145, %v2394_v14  }
 0x199   :  { %v2562_v5 = vpop.permute.xlu1 %494 }
 0x19a   :  { %v2584_v27 = vpop.permute.xlu0 %226 }
 0x19b   :  { %2146 = vset.pattern.permute.xlu1 %v3343_v34 }
 0x19c   :  { %604 = vperm.xlu1 %2146, %v2394_v14  }
 0x19e   :  { %v2566_v6 = vpop.permute.xlu1 %474 }
 0x19f   :  { %3413 = vst [vmem:[#allocation12_spill] sm:$0xff] %v2566_v6  ;;  %v2588_v43 = vpop.permute.xlu0 %282 }
 0x1a0   :  { %2148 = vset.pattern.permute.xlu1 %v3365_v44  ;;  %v143_v44 = vlaneseq }
 0x1a1   :  { %658 = vperm.xlu1 %2148, %v2394_v14  }
 0x1a2   :  { %v144_v20 = vshrl.u32 %v143_v44, 7 }
 0x1a3   :  { %v2572_v10 = vpop.permute.xlu1 %528 }
 0x1a4   :  { %3415 = vst [vmem:[#allocation14_spill] sm:$0xff] %v2572_v10  ;;  %v2594_v37 = vpop.permute.xlu0 %262  ;;  %v2621_v40 = vsub.s32 0, %v144_v20  ;;  %v2623_v17 = vsub.s32 1, %v144_v20  ;;  %v2625_v18 = vsub.s32 2, %v144_v20  ;;  %v2631_v8 = vsub.s32 4, %v144_v20 }
 0x1a5   :  { %2149 = vset.pattern.permute.xlu1 %v3337_v36  ;;  %v2633_v44 = vsub.s32 5, %v144_v20  ;;  %v2635_v3 = vsub.s32 3, %v144_v20 }
 0x1a6   :  { %622 = vperm.xlu1 %2149, %v2394_v14  }
 0x1a8   :  { %v2578_v13 = vpop.permute.xlu1 %582 }
 0x1a9   :  { %3417 = vst [vmem:[#allocation16_spill] sm:$0xff] %v2578_v13 }
 0x1aa   :  { %2151 = vset.pattern.permute.xlu1 %v3339_v46  ;;  %v2598_v46 = vpop.permute.xlu0 %370 }
 0x1ab   :  { %694 = vperm.xlu1 %2151, %v2394_v14  }
 0x1ad   :  { %v2582_v16 = vpop.permute.xlu1 %546 }
 0x1ae   :  { %3418 = vst [vmem:[#allocation17_spill] sm:$0xff] %v2582_v16  ;;  %v2601_v32 = vpop.permute.xlu0 %426 }
 0x1af   :  { %2152 = vset.pattern.permute.xlu1 %v3367_v33 }
 0x1b2   :  { %v2586_v45 = vpop.permute.xlu1 %638 }
 0x1b3   :  { %3419 = vst [vmem:[#allocation18_spill] sm:$0xff] %v2586_v45  ;;  %v2603_v30 = vpop.permute.xlu0 %460  ;;  %v2648_v45 = vsub.s32 7, %v144_v20 }
 0x1b4   :  { %3423 = vst [vmem:[#allocation22_spill] sm:$0xff] %v2603_v30 }
 0x1b7   :  { %v2590_v41 = vpop.permute.xlu1 %654 }
 0x1b8   :  { %3420 = vst [vmem:[#allocation19_spill] sm:$0xff] %v2590_v41  ;;  %v2605_v25 = vpop.permute.xlu0 %478  ;;  %v2646_v41 = vsub.s32 6, %v144_v20 }
 0x1b9   :  { %3424 = vst [vmem:[#allocation23_spill] sm:$0xff] %v2605_v25 }
 0x1bc   :  { %v2592_v39 = vpop.permute.xlu1 %672 }
 0x1bd   :  { %3421 = vst [vmem:[#allocation20_spill] sm:$0xff] %v2592_v39  ;;  %v2611_v24 = vpop.permute.xlu0 %586 }
 0x1be   :  { %3425 = vst [vmem:[#allocation24_spill] sm:$0xff] %v2611_v24 }
 0x1c1   :  { %v2596_v36 = vpop.permute.xlu1 %690 }
 0x1c2   :  { %3422 = vst [vmem:[#allocation21_spill] sm:$0xff] %v2596_v36  ;;  %v2613_v21 = vpop.permute.xlu0 %642 }
 0x1c3   :  { %3426 = vst [vmem:[#allocation25_spill] sm:$0xff] %v2613_v21 }
 0x1c6   :  { %v157_v34 = vpop.permute.xlu1 %156 }
 0x1c7   :  { %v2617_v42 = vpop.permute.xlu0 %676 }
 0x1c8   :  { %3427 = vst [vmem:[#allocation26_spill] sm:$0xff] %v2617_v42 }
 0x1cb   :  { %v211_v29 = vpop.permute.xlu1 %210 }
 0x1d0   :  { %v175_v28 = vpop.permute.xlu1 %174 }
 0x1d5   :  { %v2607_v26 = vpop.permute.xlu1 %244 }
 0x1da   :  { %v2609_v22 = vpop.permute.xlu1 %298 }
 0x1df   :  { %v193_v23 = vpop.permute.xlu1 %192 }
 0x1e4   :  { %v2615_v33 = vpop.permute.xlu1 %316 }
 0x1e6   :  { %v117_v38 = vpop.trf.xlu0 }
 0x1e7   :  { %v146_v7 = vrot.slane %v117_v38, %v2621_v40  ;;  %v162_v31 = vrot.slane %v117_v38, %v2623_v17  ;;  %v180_v42 = vrot.slane %v117_v38, %v2625_v18  ;;  %v216_v24 = vrot.slane %v117_v38, %v2631_v8 }
 0x1e8   :  { %v232_v39 = vrot.slane %v117_v38, %v2633_v44 }
 0x1e9   :  { %v2619_v19 = vpop.permute.xlu1 %354  ;;  %v147_v14 = vsub.f32 %v2504_v50, %v146_v7  ;;  %v163_v11 = vsub.f32 %v2493_v47, %v162_v31  ;;  %v148_v36 = vsub.f32 %v141_v15, %v146_v7  ;;  %v164_v21 = vsub.f32 %v157_v34, %v162_v31 }
 0x1ea   :  { %v2644_v16 = vpop.trf.xlu0  ;;  %v198_v50 = vrot.slane %v117_v38, %v2635_v3  ;;  %v181_v25 = vsub.f32 %v2502_v49, %v180_v42  ;;  %v182_v7 = vsub.f32 %v175_v28, %v180_v42  ;;  %v217_v15 = vsub.f32 %v2512_v52, %v216_v24 }
 0x1eb   :  { %v149_v9 = vand.u32 2147483647, %v147_v14  ;;  %v165_v47 = vand.u32 2147483647, %v163_v11  ;;  %v150_v31 = vand.u32 2147483647, %v148_v36  ;;  %v233_v10 = vsub.f32 %v2497_v48, %v232_v39 }
 0x1ec   :  { %v166_v34 = vand.u32 2147483647, %v164_v21  ;;  %v218_v30 = vsub.f32 %v211_v29, %v216_v24  ;;  %v234_v6 = vsub.f32 %v2584_v27, %v232_v39  ;;  %v288_v20 = vrot.slane %v2644_v16, %v2621_v40 }
 0x1ed   :  { %v304_v13 = vrot.slane %v2644_v16, %v2623_v17  ;;  %v199_v11 = vsub.f32 %v2525_v56, %v198_v50  ;;  %v250_v28 = vrot.slane %v117_v38, %v2646_v41  ;;  %v167_v21 = vadd.f32 %v165_v47, %v149_v9 }
 0x1ee   :  { %v2627_v35 = vpop.permute.xlu1 %334  ;;  %v183_v36 = vand.u32 2147483647, %v181_v25  ;;  %v200_v42 = vsub.f32 %v193_v23, %v198_v50  ;;  %v268_v48 = vrot.slane %v117_v38, %v2648_v45  ;;  %v168_v24 = vadd.f32 %v166_v34, %v150_v31 }
 0x1ef   :  { %v184_v29 = vand.u32 2147483647, %v182_v7  ;;  %v219_v27 = vand.u32 2147483647, %v217_v15  ;;  %v235_v39 = vand.u32 2147483647, %v233_v10  ;;  %v289_v4 = vsub.f32 %v2509_v51, %v288_v20 }
 0x1f0   :  { %v220_v49 = vand.u32 2147483647, %v218_v30  ;;  %v236_v52 = vand.u32 2147483647, %v234_v6  ;;  %v305_v63 = vsub.f32 %v2515_v53, %v304_v13  ;;  %v201_v2 = vand.u32 2147483647, %v199_v11 }
 0x1f1   :  { %v251_v56 = vsub.f32 %v2519_v54, %v250_v28  ;;  %v290_v1 = vsub.f32 %v2588_v43, %v288_v20  ;;  %v306_v25 = vsub.f32 %v2609_v22, %v304_v13  ;;  %v185_v38 = vadd.f32 %v183_v36, %v167_v21  ;;  %v2686_v21 = vpop.trf.xlu0 }
 0x1f2   :  { %v202_v9 = vand.u32 2147483647, %v200_v42  ;;  %v252_v50 = vsub.f32 %v2607_v26, %v250_v28  ;;  %v322_v30 = vrot.slane %v2644_v16, %v2625_v18  ;;  %v186_v6 = vadd.f32 %v184_v29, %v168_v24 }
 0x1f3   :  { %v2642_v12 = vpop.permute.xlu1 %388  ;;  %v237_v51 = vadd.f32 %v235_v39, %v219_v27  ;;  %v269_v53 = vsub.f32 %v2521_v55, %v268_v48  ;;  %v270_v10 = vsub.f32 %v2594_v37, %v268_v48  ;;  %v238_v54 = vadd.f32 %v236_v52, %v220_v49 }
 0x1f4   :  { %v291_v47 = vand.u32 2147483647, %v289_v4  ;;  %v307_v43 = vand.u32 2147483647, %v305_v63  ;;  %v360_v22 = vrot.slane %v2644_v16, %v2631_v8  ;;  %v253_v13 = vand.u32 2147483647, %v251_v56 }
 0x1f5   :  { %v292_v7 = vand.u32 2147483647, %v290_v1  ;;  %v308_v31 = vand.u32 2147483647, %v306_v25  ;;  %v376_v26 = vrot.slane %v2644_v16, %v2633_v44  ;;  %v203_v34 = vadd.f32 %v201_v2, %v185_v38 }
 0x1f6   :  { %v254_v15 = vand.u32 2147483647, %v252_v50  ;;  %v323_v20 = vsub.f32 %v2527_v57, %v322_v30  ;;  %v340_v55 = vrot.slane %v2644_v16, %v2635_v3  ;;  %v204_v4 = vadd.f32 %v202_v9, %v186_v6 }
 0x1f7   :  { %v255_v63 = vadd.f32 %v253_v13, %v237_v51  ;;  %v271_v11 = vand.u32 2147483647, %v269_v53  ;;  %v324_v28 = vsub.f32 %v2615_v33, %v322_v30  ;;  %v309_v36 = vadd.f32 %v307_v43, %v291_v47  ;;  %v2706_v13 = vpop.trf.xlu0 }
 0x1f8   :  { %v2659_v14 = vpop.permute.xlu1 %442  ;;  %v256_v1 = vadd.f32 %v254_v15, %v238_v54  ;;  %v342_v42 = vsub.f32 %v2627_v35, %v340_v55  ;;  %v361_v2 = vsub.f32 %v2533_v59, %v360_v22  ;;  %v310_v48 = vadd.f32 %v308_v31, %v292_v7 }
 0x1f9   :  { %v362_v57 = vsub.f32 %v2619_v19, %v360_v22  ;;  %v377_v24 = vsub.f32 %v2531_v58, %v376_v26  ;;  %v378_v29 = vsub.f32 %v2598_v46, %v376_v26  ;;  %v272_v27 = vand.u32 2147483647, %v270_v10 }
 0x1fa   :  { %v325_v39 = vand.u32 2147483647, %v323_v20  ;;  %v341_v49 = vsub.f32 %v2537_v60, %v340_v55  ;;  %v394_v33 = vrot.slane %v2644_v16, %v2646_v41  ;;  %v273_v52 = vadd.f32 %v271_v11, %v255_v63 }
 0x1fb   :  { %v326_v56 = vand.u32 2147483647, %v324_v28  ;;  %v432_v35 = vrot.slane %v2686_v21, %v2621_v40  ;;  %v448_v59 = vrot.slane %v2686_v21, %v2623_v17  ;;  %v274_v58 = vadd.f32 %v272_v27, %v256_v1 }
 0x1fc   :  { %v327_v25 = vadd.f32 %v325_v39, %v309_v36  ;;  %v344_v46 = vand.u32 2147483647, %v342_v42  ;;  %v363_v38 = vand.u32 2147483647, %v361_v2  ;;  %v364_v50 = vand.u32 2147483647, %v362_v57 }
 0x1fd   :  { %v2669_v23 = vpop.permute.xlu1 %406  ;;  %v328_v9 = vadd.f32 %v326_v56, %v310_v48  ;;  %v379_v60 = vand.u32 2147483647, %v377_v24  ;;  %v380_v30 = vand.u32 2147483647, %v378_v29  ;;  %v343_v6 = vand.u32 2147483647, %v341_v49 }
 0x1fe   :  { %v395_v51 = vsub.f32 %v2539_v61, %v394_v33  ;;  %v396_v53 = vsub.f32 %v2642_v12, %v394_v33  ;;  %v275_v10 = vadd.f32 %v273_v52, %v203_v34  ;;  %v433_v54 = vsub.f32 %v2543_v62, %v432_v35  ;;  %v3429_v57 = vld [vmem:[#allocation10_spill] sm:$0xff]  ;;  %v3431_v56 = vld [vmem:[#allocation11_spill] sm:$0xff] }
 0x1ff   :  { %v449_v47 = vsub.f32 %v2549_v0, %v448_v59  ;;  %v276_v43 = vadd.f32 %v274_v58, %v204_v4  ;;  %v345_v22 = vadd.f32 %v343_v6, %v327_v25  ;;  %v2710_v7 = vrot.slane %v2686_v21, %v2631_v8 }
 0x200   :  { %v2714_v31 = vrot.slane %v2686_v21, %v2633_v44  ;;  %v346_v12 = vadd.f32 %v344_v46, %v328_v9  ;;  %v381_v26 = vadd.f32 %v379_v60, %v363_v38  ;;  %v382_v34 = vadd.f32 %v380_v30, %v364_v50  ;;  %v3433_v46 = vld [vmem:[#allocation12_spill] sm:$0xff] }
 0x201   :  { %v466_v62 = vrot.slane %v2686_v21, %v2625_v18  ;;  %v397_v0 = vand.u32 2147483647, %v395_v51  ;;  %v398_v15 = vand.u32 2147483647, %v396_v53  ;;  %v434_v20 = vsub.f32 %v2601_v32, %v432_v35  ;;  %v3434_v53 = vld [vmem:[#allocation22_spill] sm:$0xff] }
 0x202   :  { %v2683_v37 = vpop.permute.xlu1 %498  ;;  %v412_v55 = vrot.slane %v2644_v16, %v2648_v45  ;;  %v435_v4 = vand.u32 2147483647, %v433_v54  ;;  %v451_v63 = vand.u32 2147483647, %v449_v47  ;;  %v2725_v11 = vrot.slane %v2706_v13, %v2621_v40  ;;  %v3428_v16 = vld [vmem:[#allocation9_spill] sm:$0xff]  ;;  %v3435_v47 = vld [vmem:[#allocation14_spill] sm:$0xff] }
 0x203   :  { %v2729_v28 = vrot.slane %v2706_v13, %v2623_v17  ;;  %v450_v1 = vsub.f32 %v2659_v14, %v448_v59  ;;  %v2734_v36 = vrot.slane %v2686_v21, %v2635_v3  ;;  %v505_v32 = vsub.f32 %v2562_v5, %v2710_v7  ;;  %v3430_v14 = vld [vmem:[#allocation8_spill] sm:$0xff] }
 0x204   :  { %v521_v42 = vsub.f32 %v3428_v16, %v2714_v31  ;;  %v347_v2 = vadd.f32 %v345_v22, %v275_v10  ;;  %v2740_v48 = vadd.f32 %v346_v12, %v276_v43  ;;  %v467_v24 = vsub.f32 %v3429_v57, %v466_v62  ;;  %v3432_v59 = vld [vmem:[#allocation16_spill] sm:$0xff] }
 0x205   :  { %v399_v27 = vadd.f32 %v397_v0, %v381_v26  ;;  %v2745_v39 = vadd.f32 %v398_v15, %v382_v34  ;;  %v413_v49 = vsub.f32 %v3430_v14, %v412_v55  ;;  %v2750_v33 = vrot.slane %v2686_v21, %v2646_v41  ;;  %v3436_v34 = vld [vmem:[#allocation23_spill] sm:$0xff] }
 0x206   :  { %v436_v5 = vand.u32 2147483647, %v434_v20  ;;  %v453_v52 = vadd.f32 %v451_v63, %v435_v4  ;;  %v577_v35 = vsub.f32 %v3431_v56, %v2725_v11  ;;  %v593_v58 = vsub.f32 %v3432_v59, %v2729_v28 }
 0x207   :  { %v2700_v19 = vpop.permute.xlu1 %514  ;;  %v452_v25 = vand.u32 2147483647, %v450_v1  ;;  %v485_v38 = vsub.f32 %v3433_v46, %v2734_v36  ;;  %v507_v9 = vand.u32 2147483647, %v505_v32  ;;  %v523_v50 = vand.u32 2147483647, %v521_v42 }
 0x208   :  { %v469_v60 = vand.u32 2147483647, %v467_v24  ;;  %v2760_v30 = vrot.slane %v2706_v13, %v2625_v18  ;;  %v2764_v6 = vrot.slane %v2706_v13, %v2631_v8  ;;  %v2768_v51 = vrot.slane %v2706_v13, %v2633_v44  ;;  %v3438_v42 = vld [vmem:[#allocation18_spill] sm:$0xff]  ;;  %v3439_v24 = vld [vmem:[#allocation19_spill] sm:$0xff] }
 0x209   :  { %v468_v10 = vsub.f32 %v3434_v53, %v466_v62  ;;  %v415_v54 = vand.u32 2147483647, %v413_v49  ;;  %v539_v43 = vsub.f32 %v3435_v47, %v2750_v33  ;;  %v556_v12 = vrot.slane %v2686_v21, %v2648_v45  ;;  %v3437_v62 = vld [vmem:[#allocation13_spill] sm:$0xff] }
 0x20a   :  { %v471_v26 = vadd.f32 %v469_v60, %v453_v52  ;;  %v486_v0 = vsub.f32 %v3436_v34, %v2734_v36  ;;  %v579_v15 = vand.u32 2147483647, %v577_v35  ;;  %v595_v20 = vand.u32 2147483647, %v593_v58 }
 0x20b   :  { %v487_v4 = vand.u32 2147483647, %v485_v38  ;;  %v414_v63 = vsub.f32 %v2669_v23, %v412_v55  ;;  %v417_v1 = vadd.f32 %v415_v54, %v399_v27  ;;  %v525_v32 = vadd.f32 %v523_v50, %v507_v9  ;;  %v3440_v23 = vld [vmem:[#allocation17_spill] sm:$0xff] }
 0x20c   :  { %v2716_v61 = vpop.permute.xlu1 %532  ;;  %v611_v16 = vsub.f32 %v3437_v62, %v2760_v30  ;;  %v649_v57 = vsub.f32 %v3438_v42, %v2764_v6  ;;  %v665_v21 = vsub.f32 %v3439_v24, %v2768_v51  ;;  %v628_v14 = vrot.slane %v2706_v13, %v2635_v3  ;;  %v3444_v42 = vld [vmem:[#allocation25_spill] sm:$0xff] }
 0x20d   :  { %v454_v36 = vadd.f32 %v452_v25, %v436_v5  ;;  %v506_v49 = vsub.f32 %v2683_v37, %v2710_v7  ;;  %v541_v52 = vand.u32 2147483647, %v539_v43  ;;  %v557_v55 = vsub.f32 %v3440_v23, %v556_v12  ;;  %v3441_v37 = vld [vmem:[#allocation15_spill] sm:$0xff] }
 0x20e   :  { %v489_v27 = vadd.f32 %v487_v4, %v471_v26  ;;  %v419_v56 = vadd.f32 %v417_v1, %v347_v2  ;;  %v597_v35 = vadd.f32 %v595_v20, %v579_v15  ;;  %v682_v58 = vrot.slane %v2706_v13, %v2646_v41  ;;  %v3442_v26 = vld [vmem:[#allocation20_spill] sm:$0xff] }
 0x20f   :  { %v470_v46 = vand.u32 2147483647, %v468_v10  ;;  %v416_v38 = vand.u32 2147483647, %v414_v63  ;;  %v522_v9 = vsub.f32 %v2700_v19, %v2714_v31  ;;  %v543_v50 = vadd.f32 %v541_v52, %v525_v32  ;;  %v3443_v15 = vld [vmem:[#allocation24_spill] sm:$0xff] }
 0x210   :  { %v613_v5 = vand.u32 2147483647, %v611_v16  ;;  %v651_v25 = vand.u32 2147483647, %v649_v57  ;;  %v667_v60 = vand.u32 2147483647, %v665_v21  ;;  %v629_v7 = vsub.f32 %v3441_v37, %v628_v14 }
 0x211   :  { %v2743_v29 = vpop.permute.xlu1 %570  ;;  %v508_v53 = vand.u32 2147483647, %v506_v49  ;;  %v540_v2 = vsub.f32 %v2716_v61, %v2750_v33  ;;  %v559_v47 = vand.u32 2147483647, %v557_v55  ;;  %v491_v43 = vadd.f32 %v489_v27, %v419_v56 }
 0x212   :  { %v578_v54 = vsub.f32 %v2743_v29, %v2725_v11  ;;  %v615_v10 = vadd.f32 %v613_v5, %v597_v35  ;;  %v683_v34 = vsub.f32 %v3442_v26, %v682_v58  ;;  %v700_v19 = vrot.slane %v2706_v13, %v2648_v45 }
 0x213   :  { %v524_v31 = vand.u32 2147483647, %v522_v9  ;;  %v594_v20 = vsub.f32 %v3443_v15, %v2729_v28  ;;  %v561_v63 = vadd.f32 %v559_v47, %v543_v50  ;;  %v669_v11 = vadd.f32 %v667_v60, %v651_v25  ;;  %v3445_v28 = vld [vmem:[#allocation21_spill] sm:$0xff]  ;;  %v3446_v50 = vld [vmem:[#allocation26_spill] sm:$0xff] }
 0x214   :  { %v631_v29 = vand.u32 2147483647, %v629_v7  ;;  %v418_v32 = vadd.f32 %v416_v38, %v2745_v39  ;;  %v542_v62 = vand.u32 2147483647, %v540_v2  ;;  %v580_v16 = vand.u32 2147483647, %v578_v54 }
 0x215   :  { %v650_v13 = vsub.f32 %v3444_v42, %v2764_v6  ;;  %v563_v57 = vadd.f32 %v561_v63, %v491_v43  ;;  %v685_v21 = vand.u32 2147483647, %v683_v34  ;;  %v488_v49 = vand.u32 2147483647, %v486_v0  ;;  %v2814_v63 = vld [vmem:[%s3317_s2] sm:$0xff] }
 0x216   :  { %v551_v22 = vpop.permute.xlu1 %550  ;;  %v633_v24 = vadd.f32 %v631_v29, %v615_v10  ;;  %v526_v52 = vadd.f32 %v524_v31, %v508_v53  ;;  %v420_v39 = vadd.f32 %v418_v32, %v2740_v48  ;;  %v684_v5 = vsub.f32 %v3446_v50, %v682_v58  ;;  %3447 = vst [vmem:[#allocation9_spill] sm:$0xff] %v2814_v63 }
 0x217   :  { %v558_v4 = vsub.f32 %v551_v22, %v556_v12  ;;  %v701_v22 = vsub.f32 %v3445_v28, %v700_v19  ;;  %v472_v12 = vadd.f32 %v470_v46, %v454_v36  ;;  %v687_v56 = vadd.f32 %v685_v21, %v669_v11  ;;  %v794_v21 = vld [vmem:[%s3320_s5 + $0x10] sm:$0xff] }
 0x218   :  { %v544_v35 = vadd.f32 %v542_v62, %v526_v52  ;;  %v635_v9 = vadd.f32 %v633_v24, %v563_v57  ;;  %v686_v47 = vand.u32 2147483647, %v684_v5  ;;  %v3449_v29 = vmov 0.0   ;;  %v792_v57 = vld [vmem:[%s3320_s5] sm:$0xff]  ;;  %v793_v24 = vld [vmem:[%s3320_s5 + $0x8] sm:$0xff] }
 0x219   :  { %v560_v23 = vand.u32 2147483647, %v558_v4  ;;  %v703_v25 = vand.u32 2147483647, %v701_v22  ;;  %v490_v60 = vadd.f32 %v488_v49, %v472_v12  ;;  %v798_v28 = vpack.c.bf16 %v793_v24, %v792_v57  ;;  %v795_v22 = vld [vmem:[%s3320_s5 + $0x18] sm:$0xff]  ;;  %v3451_v52 = vld [vmem:[#allocation6_spill] sm:$0xff] }
 0x21a   :  { %v799_v12 = vpack.c.bf16 %v795_v22, %v794_v21  ;;  %v3470_v57 = vmov 14   ;;  %v3471_v24 = vmov 7   ;;  %v3472_v21 = vmov 15  }
 0x21b   :  { %v605_v59 = vpop.permute.xlu1 %604  ;;  %v562_v0 = vadd.f32 %v560_v23, %v544_v35  ;;  %v705_v7 = vadd.f32 %v703_v25, %v687_v56  ;;  %v492_v53 = vadd.f32 %v490_v60, %v420_v39  ;;  %2028 = vmatpush3.bf16.msra.mxu0 %v798_v28  ;;  %v3473_v28 = vmov 21  }
 0x21c   :  { %v612_v61 = vsub.f32 %v605_v59, %v2760_v30  ;;  %v596_v30 = vand.u32 2147483647, %v594_v20  ;;  %v652_v59 = vand.u32 2147483647, %v650_v13  ;;  %v3450_v13 = vmov 0   ;;  %2029 = vmatprep.subr.bf16.mxu0 %v3449_v29 }
 0x21d   :  { %v707_v48 = vadd.f32 %v705_v7, %v635_v9  ;;  %v564_v10 = vadd.f32 %v562_v0, %v492_v53  ;;  %v1988_v53 = vld [vmem:[%s3321_s6] ss:$0 sm:$0xff]  ;;  %v3474_v22 = vmov 13  }
 0x21e   :  { %v598_v6 = vadd.f32 %v596_v30, %v580_v16 }
 0x21f   :  { %v709_v15 = vmax.f32 %v707_v48, 0.001  ;;  %2030 = vmatpush3.bf16.msra.mxu0 %v799_v12  ;;  %v3475_v12 = vmov 24  }
 0x220   :  { %v659_v1 = vpop.permute.xlu1 %658  ;;  %2041 = vmatprep.subr.bf16.mxu0 %v3449_v29 }
 0x221   :  { %v666_v33 = vsub.f32 %v659_v1, %v2768_v51  ;;  %v614_v51 = vand.u32 2147483647, %v612_v61  ;;  %2225 = vrcp.f32 %v709_v15  ;;  %v3458_v15 = vmov 4  }
 0x223   :  { %v668_v55 = vand.u32 2147483647, %v666_v33  ;;  %v616_v46 = vadd.f32 %v614_v51, %v598_v6 }
 0x225   :  { %v623_v27 = vpop.permute.xlu1 %622  ;;  %v670_v37 = vadd.f32 %v668_v55, %v652_v59 }
 0x226   :  { %v630_v38 = vsub.f32 %v623_v27, %v628_v14  ;;  %v3452_v27 = vld [vmem:[#allocation7_spill] sm:$0xff] }
 0x227   :  { %v688_v26 = vadd.f32 %v686_v47, %v670_v37 }
 0x228   :  { %v632_v36 = vand.u32 2147483647, %v630_v38 }
 0x22a   :  { %v695_v2 = vpop.permute.xlu1 %694  ;;  %v634_v54 = vadd.f32 %v632_v36, %v616_v46 }
 0x22b   :  { %v702_v43 = vsub.f32 %v695_v2, %v700_v19  ;;  %v2226_v4 = vpop.eup %2225  ;;  %v2819_v19 = vld [vmem:[%s3317_s2 + $0x8] sm:$0xff] }
 0x22c   :  { %v636_v34 = vadd.f32 %v634_v54, %v564_v10  ;;  %3448 = vst [vmem:[#allocation10_spill] sm:$0xff] %v2819_v19  ;;  %v713_v61 = vmul.f32 %v2226_v4, %v2814_v63  ;;  %v3461_v4 = vmov 22  }
 0x22d   :  { %v704_v14 = vand.u32 2147483647, %v702_v43 }
 0x22f   :  { %v706_v31 = vadd.f32 %v704_v14, %v688_v26  ;;  %v3455_v14 = vmov 11  }
 0x231   :  { %v708_v58 = vadd.f32 %v706_v31, %v636_v34  ;;  %v3456_v34 = vmov 1   ;;  %v3457_v31 = vmov 17  }
 0x233   :  { %v710_v20 = vmax.f32 %v708_v58, 0.001  ;;  %v3459_v58 = vmov 20  }
 0x235   :  { %2227 = vrcp.f32 %v710_v20  ;;  %v3460_v20 = vmov 5  }
 0x23f   :  { %v2228_v1 = vpop.eup %2227 }
 0x240   :  { %v714_v33 = vmul.f32 %v2228_v1, %v2819_v19  ;;  %v3462_v1 = vmov 2  }
 0x242   :  { %v715_v11 = vpack.c.bf16 %v714_v33, %v713_v61  ;;  %v3463_v61 = vmov 23   ;;  %v3464_v33 = vmov 6  }
 0x244   :  { %2024 = vmatmul.mubr.msk.bf16.vlgmr.msra.gmra.mrb[0].mxu1 %vm717_vm3, %v715_v11  ;;  %v3465_v11 = vmov 29  }
 0x245   :  { %2037 = vmatprep.mubr.msk.bf16.mxu1 %vm2276_vm1, %v3449_v29 }
 0x317   :  { %v755_v32 = vpop.f32.mrb[0].mxu1 }
 0x318   :  { %764 = vperm.xlu1 %2152, %v755_v32   ;;  %v2025_v62 = vpop.f32.mrb[1].mxu1 }
 0x319   :  { %v758_v16 = vpop.f32.mrb[2].mxu1  ;;  %v3467_v62 = vmov 9  }
 0x31a   :  { %v2026_v42 = vpop.f32.mrb[3].mxu1 }
 0x31b   :  { %v3469_v42 = vmov 3  }
 0x31c   :  { %769 = vperm.xlu1 %2152, %v758_v16  }
 0x320   :  { %2153 = vset.pattern.permute.xlu1 %v3450_v13 }
 0x397   :  { %v765_v49 = vpop.permute.xlu1 %764 }
 0x398   :  { %v772_v30 = vmul.f32 %v765_v49, %v3451_v52  ;;  %v3476_v49 = vmov 26  }
 0x39a   :  { %v774_v23 = vsub.f32 %v772_v30, %v755_v32  ;;  %v3466_v32 = vmov 8   ;;  %v3478_v30 = vmov 27  }
 0x39b   :  { %v770_v51 = vpop.permute.xlu1 %769 }
 0x39c   :  { %v776_v55 = vmul.f32 0.311, %v774_v23  ;;  %v773_v56 = vmul.f32 %v770_v51, %v3452_v27  ;;  %v3479_v23 = vmov 31   ;;  %v3480_v51 = vmov 18  }
 0x39e   :  { %v778_v39 = vsub.f32 %v3451_v52, %v776_v55  ;;  %v775_v35 = vsub.f32 %v773_v56, %v758_v16  ;;  %v3468_v16 = vmov 12   ;;  %v3477_v52 = vmov 16  }
 0x39f   :  { %v3481_v55 = vmov 32   ;;  %v3483_v56 = vmov 25  }
 0x3a0   :  { %v782_v59 = vmin.f32 %v778_v39, 0.0  ;;  %v777_v38 = vmul.f32 0.311, %v775_v35  ;;  %vm780_vm4 = vcmp.gt.f32.partialorder %v778_v39, 0.0  ;;  %v3485_v35 = vmov 30  }
 0x3a2   :  { %v784_v6 = vmul.f32 1.442695, %v782_v59  ;;  %v779_v9 = vsub.f32 %v3452_v27, %v777_v38  ;;  %v3482_v27 = vmov 19  }
 0x3a4   :  { %2229 = vpow2.f32 %v784_v6  ;;  %v783_v50 = vmin.f32 %v779_v9, 0.0  ;;  %vm781_vm5 = vcmp.gt.f32.partialorder %v779_v9, 0.0 }
 0x3a6   :  { %v786_v5 = vmul.f32 1.442695, %v783_v50 }
 0x3a8   :  { %2231 = vpow2.f32 %v786_v5 }
 0x3ae   :  { %v2230_v25 = vpop.eup %2229 }
 0x3af   :  { %v1986_v60 = vadd.f32 -1.0, %v2230_v25 }
 0x3b1   :  { %v790_v46 = vsel %vm780_vm4, %v778_v39, %v1986_v60  ;;  %v3484_v39 = vmov 28  }
 0x3b2   :  { %v2232_v36 = vpop.eup %2231 }
 0x3b3   :  { %v1987_v0 = vadd.f32 -1.0, %v2232_v36  ;;  %v3486_v36 = vmov 10  }
 0x3b5   :  { %v791_v37 = vsel %vm781_vm5, %v779_v9, %v1987_v0 }
 0x3b6   :  { %v797_v7 = vpack.c.bf16 %v791_v37, %v790_v46 }
 0x3b8   :  { %2032 = vmatmul.mubr.msk.bf16.vlgmr.msra.gmra.mrb[4].mxu0 %vm806_vm6, %v797_v7 }
 0x3b9   :  { %2045 = vmatprep.mubr.msk.bf16.mxu0 %vm2276_vm1, %v3449_v29 }
 0x48b   :  { %v844_v2 = vpop.f32.mrb[4].mxu0 }
 0x48c   :  { %v2851_v54 = vadd.f32 %v1988_v53, %v844_v2  ;;  %v2033_v47 = vpop.f32.mrb[5].mxu0 }
 0x48d   :  { %v847_v43 = vpop.f32.mrb[6].mxu0 }
 0x48e   :  { %3453 = vst [vmem:[#allocation8_spill] sm:$0xff] %v2851_v54  ;;  %v2853_v48 = vadd.f32 %v1988_v53, %v847_v43  ;;  %1062 = vperm.xlu0 %2163, %v2851_v54   ;;  %885 = vperm.xlu1 %2153, %v2851_v54   ;;  %v2034_v10 = vpop.f32.mrb[7].mxu0 }
 0x490   :  { %3454 = vst [vmem:[#allocation11_spill] sm:$0xff] %v2853_v48  ;;  %v1466_v26 = vpack.c.bf16 %v2853_v48, %v2851_v54 }
 0x492   :  { %2166 = vset.pattern.permute.xlu0 %v3455_v14  ;;  %2154 = vset.pattern.permute.xlu1 %v3456_v34 }
 0x493   :  { %2036 = vmatpush3.bf16.msra.mxu1 %v1466_v26  ;;  %1080 = vperm.xlu0 %2166, %v2851_v54  }
 0x494   :  { %902 = vperm.xlu1 %2154, %v2851_v54  }
 0x497   :  { %2169 = vset.pattern.permute.xlu0 %v3457_v31 }
 0x498   :  { %2155 = vset.pattern.permute.xlu1 %v3458_v15  ;;  %1188 = vperm.xlu0 %2169, %v2851_v54  }
 0x499   :  { %956 = vperm.xlu1 %2155, %v2851_v54  }
 0x49c   :  { %2172 = vset.pattern.permute.xlu0 %v3459_v58 }
 0x49d   :  { %2156 = vset.pattern.permute.xlu1 %v3460_v20  ;;  %1244 = vperm.xlu0 %2172, %v2851_v54  }
 0x49e   :  { %972 = vperm.xlu1 %2156, %v2851_v54  }
 0x4a1   :  { %2175 = vset.pattern.permute.xlu0 %v3461_v4 }
 0x4a2   :  { %2157 = vset.pattern.permute.xlu1 %v3462_v1  ;;  %1278 = vperm.xlu0 %2175, %v2851_v54  }
 0x4a3   :  { %920 = vperm.xlu1 %2157, %v2851_v54  }
 0x4a6   :  { %2178 = vset.pattern.permute.xlu0 %v3463_v61 }
 0x4a7   :  { %2158 = vset.pattern.permute.xlu1 %v3464_v33  ;;  %1296 = vperm.xlu0 %2178, %v2851_v54  }
 0x4a8   :  { %990 = vperm.xlu1 %2158, %v2851_v54  }
 0x4ab   :  { %2181 = vset.pattern.permute.xlu0 %v3465_v11 }
 0x4ac   :  { %2159 = vset.pattern.permute.xlu1 %v3466_v32  ;;  %1404 = vperm.xlu0 %2181, %v2851_v54  }
 0x4ad   :  { %1028 = vperm.xlu1 %2159, %v2851_v54  }
 0x4b0   :  { %2187 = vset.pattern.permute.xlu0 %v3460_v20 }
 0x4b1   :  { %2160 = vset.pattern.permute.xlu1 %v3467_v62  ;;  %976 = vperm.xlu0 %2187, %v2853_v48  }
 0x4b2   :  { %1044 = vperm.xlu1 %2160, %v2851_v54  }
 0x4b5   :  { %2195 = vset.pattern.permute.xlu0 %v3468_v16 }
 0x4b6   :  { %2161 = vset.pattern.permute.xlu1 %v3469_v42  ;;  %1104 = vperm.xlu0 %2195, %v2853_v48  }
 0x4b7   :  { %938 = vperm.xlu1 %2161, %v2851_v54  }
 0x4ba   :  { %2198 = vset.pattern.permute.xlu0 %v3470_v57 }
 0x4bb   :  { %2162 = vset.pattern.permute.xlu1 %v3471_v24  ;;  %1138 = vperm.xlu0 %2198, %v2853_v48  }
 0x4bc   :  { %1008 = vperm.xlu1 %2162, %v2851_v54  }
 0x4bf   :  { %2201 = vset.pattern.permute.xlu0 %v3472_v21 }
 0x4c0   :  { %2164 = vset.pattern.permute.xlu1 %v3468_v16  ;;  %1156 = vperm.xlu0 %2201, %v2853_v48  }
 0x4c1   :  { %1100 = vperm.xlu1 %2164, %v2851_v54  }
 0x4c4   :  { %2204 = vset.pattern.permute.xlu0 %v3473_v28 }
 0x4c5   :  { %2165 = vset.pattern.permute.xlu1 %v3474_v22  ;;  %1264 = vperm.xlu0 %2204, %v2853_v48  }
 0x4c6   :  { %1116 = vperm.xlu1 %2165, %v2851_v54  }
 0x4c9   :  { %2207 = vset.pattern.permute.xlu0 %v3475_v12 }
 0x4ca   :  { %2167 = vset.pattern.permute.xlu1 %v3470_v57  ;;  %1320 = vperm.xlu0 %2207, %v2853_v48  }
 0x4cb   :  { %1134 = vperm.xlu1 %2167, %v2851_v54  }
 0x4ce   :  { %2210 = vset.pattern.permute.xlu0 %v3476_v49 }
 0x4cf   :  { %2168 = vset.pattern.permute.xlu1 %v3477_v52  ;;  %1354 = vperm.xlu0 %2210, %v2853_v48  }
 0x4d0   :  { %1172 = vperm.xlu1 %2168, %v2851_v54  }
 0x4d3   :  { %2213 = vset.pattern.permute.xlu0 %v3478_v30 }
 0x4d4   :  { %2170 = vset.pattern.permute.xlu1 %v3472_v21  ;;  %1372 = vperm.xlu0 %2213, %v2853_v48  }
 0x4d5   :  { %1152 = vperm.xlu1 %2170, %v2851_v54  }
 0x4d8   :  { %2214 = vset.pattern.permute.xlu0 %v3479_v23 }
 0x4d9   :  { %2171 = vset.pattern.permute.xlu1 %v3480_v51  ;;  %1440 = vperm.xlu0 %2214, %v2851_v54  }
 0x4da   :  { %1206 = vperm.xlu1 %2171, %v2851_v54  }
 0x4dd   :  { %2217 = vset.pattern.permute.xlu0 %v3481_v55 }
 0x4de   :  { %2173 = vset.pattern.permute.xlu1 %v3473_v28 }
 0x4df   :  { %1260 = vperm.xlu1 %2173, %v2851_v54  }
 0x4e3   :  { %2174 = vset.pattern.permute.xlu1 %v3482_v27 }
 0x4e4   :  { %1224 = vperm.xlu1 %2174, %v2851_v54  }
 0x4e8   :  { %2176 = vset.pattern.permute.xlu1 %v3475_v12 }
 0x4e9   :  { %1316 = vperm.xlu1 %2176, %v2851_v54  }
 0x4ed   :  { %2177 = vset.pattern.permute.xlu1 %v3483_v56 }
 0x4ee   :  { %1332 = vperm.xlu1 %2177, %v2851_v54  }
 0x4f2   :  { %2179 = vset.pattern.permute.xlu1 %v3476_v49 }
 0x4f3   :  { %1350 = vperm.xlu1 %2179, %v2851_v54  }
 0x4f7   :  { %2180 = vset.pattern.permute.xlu1 %v3484_v39 }
 0x4f8   :  { %1388 = vperm.xlu1 %2180, %v2851_v54  }
 0x4fc   :  { %2182 = vset.pattern.permute.xlu1 %v3478_v30 }
 0x4fd   :  { %1368 = vperm.xlu1 %2182, %v2851_v54  }
 0x501   :  { %2183 = vset.pattern.permute.xlu1 %v3485_v35 }
 0x502   :  { %1422 = vperm.xlu1 %2183, %v2851_v54  }
 0x506   :  { %2184 = vset.pattern.permute.xlu1 %v3450_v13 }
 0x507   :  { %890 = vperm.xlu1 %2184, %v2853_v48  }
 0x50b   :  { %2185 = vset.pattern.permute.xlu1 %v3456_v34 }
 0x50c   :  { %906 = vperm.xlu1 %2185, %v2853_v48  }
 0x50d   :  { %v2940_v59 = vpop.permute.xlu1 %885 }
 0x510   :  { %2186 = vset.pattern.permute.xlu1 %v3458_v15 }
 0x511   :  { %960 = vperm.xlu1 %2186, %v2853_v48  }
 0x513   :  { %v2944_v38 = vpop.permute.xlu1 %902 }
 0x515   :  { %2188 = vset.pattern.permute.xlu1 %v3462_v1 }
 0x516   :  { %924 = vperm.xlu1 %2188, %v2853_v48  }
 0x518   :  { %v2948_v6 = vpop.permute.xlu1 %956 }
 0x51a   :  { %2189 = vset.pattern.permute.xlu1 %v3464_v33 }
 0x51b   :  { %994 = vperm.xlu1 %2189, %v2853_v48  }
 0x51d   :  { %v2952_v9 = vpop.permute.xlu1 %972 }
 0x51f   :  { %2190 = vset.pattern.permute.xlu1 %v3466_v32 }
 0x520   :  { %1032 = vperm.xlu1 %2190, %v2853_v48  }
 0x522   :  { %v2956_v50 = vpop.permute.xlu1 %920 }
 0x524   :  { %2191 = vset.pattern.permute.xlu1 %v3467_v62 }
 0x525   :  { %1048 = vperm.xlu1 %2191, %v2853_v48  }
 0x527   :  { %v2960_v5 = vpop.permute.xlu1 %990 }
 0x529   :  { %2192 = vset.pattern.permute.xlu1 %v3469_v42 }
 0x52a   :  { %942 = vperm.xlu1 %2192, %v2853_v48  }
 0x52c   :  { %v2964_v25 = vpop.permute.xlu1 %1028 }
 0x52e   :  { %2193 = vset.pattern.permute.xlu1 %v3471_v24 }
 0x52f   :  { %1012 = vperm.xlu1 %2193, %v2853_v48  }
 0x531   :  { %v2968_v60 = vpop.permute.xlu1 %1044 }
 0x533   :  { %2194 = vset.pattern.permute.xlu1 %v3486_v36 }
 0x534   :  { %1066 = vperm.xlu1 %2194, %v2853_v48  }
 0x536   :  { %v2972_v0 = vpop.permute.xlu1 %938 }
 0x538   :  { %2196 = vset.pattern.permute.xlu1 %v3474_v22 }
 0x539   :  { %1120 = vperm.xlu1 %2196, %v2853_v48  }
 0x53b   :  { %v2976_v46 = vpop.permute.xlu1 %1008 }
 0x53d   :  { %2197 = vset.pattern.permute.xlu1 %v3455_v14 }
 0x53e   :  { %1084 = vperm.xlu1 %2197, %v2853_v48  }
 0x540   :  { %v2980_v37 = vpop.permute.xlu1 %1100 }
 0x542   :  { %2199 = vset.pattern.permute.xlu1 %v3477_v52 }
 0x543   :  { %1176 = vperm.xlu1 %2199, %v2853_v48  }
 0x545   :  { %v2984_v7 = vpop.permute.xlu1 %1116 }
 0x547   :  { %2200 = vset.pattern.permute.xlu1 %v3457_v31 }
 0x548   :  { %1192 = vperm.xlu1 %2200, %v2853_v48  }
 0x54a   :  { %v2989_v53 = vpop.permute.xlu1 %1134 }
 0x54c   :  { %2202 = vset.pattern.permute.xlu1 %v3480_v51 }
 0x54d   :  { %1210 = vperm.xlu1 %2202, %v2853_v48  }
 0x54f   :  { %v2994_v2 = vpop.permute.xlu1 %1172 }
 0x551   :  { %2203 = vset.pattern.permute.xlu1 %v3459_v58 }
 0x552   :  { %1248 = vperm.xlu1 %2203, %v2853_v48  }
 0x554   :  { %v2998_v47 = vpop.permute.xlu1 %1152 }
 0x556   :  { %2205 = vset.pattern.permute.xlu1 %v3482_v27  ;;  %v3063_v27 = vpop.permute.xlu0 %1062 }
 0x557   :  { %1228 = vperm.xlu1 %2205, %v2853_v48  }
 0x559   :  { %v3002_v43 = vpop.permute.xlu1 %1206 }
 0x55a   :  { %3487 = vst [vmem:[#allocation16_spill] sm:$0xff] %v3002_v43 }
 0x55b   :  { %2206 = vset.pattern.permute.xlu1 %v3461_v4 }
 0x55c   :  { %1282 = vperm.xlu1 %2206, %v2853_v48  }
 0x55e   :  { %v3006_v10 = vpop.permute.xlu1 %1260 }
 0x55f   :  { %3488 = vst [vmem:[#allocation12_spill] sm:$0xff] %v3006_v10 }
 0x560   :  { %2208 = vset.pattern.permute.xlu1 %v3483_v56 }
 0x561   :  { %1336 = vperm.xlu1 %2208, %v2853_v48  }
 0x563   :  { %v3011_v26 = vpop.permute.xlu1 %1224 }
 0x564   :  { %3489 = vst [vmem:[#allocation22_spill] sm:$0xff] %v3011_v26 }
 0x565   :  { %2209 = vset.pattern.permute.xlu1 %v3463_v61 }
 0x566   :  { %1300 = vperm.xlu1 %2209, %v2853_v48  }
 0x568   :  { %v3016_v14 = vpop.permute.xlu1 %1316 }
 0x569   :  { %3490 = vst [vmem:[#allocation14_spill] sm:$0xff] %v3016_v14 }
 0x56a   :  { %2211 = vset.pattern.permute.xlu1 %v3484_v39  ;;  %v3067_v39 = vpop.permute.xlu0 %1080 }
 0x56b   :  { %1392 = vperm.xlu1 %2211, %v2853_v48  }
 0x56d   :  { %v3020_v31 = vpop.permute.xlu1 %1332 }
 0x56e   :  { %3491 = vst [vmem:[#allocation23_spill] sm:$0xff] %v3020_v31  ;;  %v3071_v36 = vpop.permute.xlu0 %1188 }
 0x56f   :  { %2212 = vset.pattern.permute.xlu1 %v3465_v11 }
 0x570   :  { %1408 = vperm.xlu1 %2212, %v2853_v48  }
 0x572   :  { %v3024_v15 = vpop.permute.xlu1 %1350 }
 0x573   :  { %3492 = vst [vmem:[#allocation13_spill] sm:$0xff] %v3024_v15 }
 0x574   :  { %2215 = vset.pattern.permute.xlu1 %v3485_v35 }
 0x575   :  { %1426 = vperm.xlu1 %2215, %v2853_v48  }
 0x577   :  { %v3026_v58 = vpop.permute.xlu1 %1388 }
 0x578   :  { %3493 = vst [vmem:[#allocation18_spill] sm:$0xff] %v3026_v58 }
 0x579   :  { %2216 = vset.pattern.permute.xlu1 %v3479_v23 }
 0x57a   :  { %1444 = vperm.xlu1 %2216, %v2853_v48  }
 0x57c   :  { %v3028_v20 = vpop.permute.xlu1 %1368 }
 0x57d   :  { %3494 = vst [vmem:[#allocation19_spill] sm:$0xff] %v3028_v20 }
 0x581   :  { %v3030_v4 = vpop.permute.xlu1 %1422 }
 0x582   :  { %3495 = vst [vmem:[#allocation17_spill] sm:$0xff] %v3030_v4 }
 0x586   :  { %v891_v61 = vpop.permute.xlu1 %890 }
 0x58b   :  { %v907_v33 = vpop.permute.xlu1 %906 }
 0x590   :  { %v3032_v11 = vpop.permute.xlu1 %960 }
 0x595   :  { %v925_v32 = vpop.permute.xlu1 %924 }
 0x59a   :  { %v3036_v62 = vpop.permute.xlu1 %994 }
 0x59f   :  { %v3038_v16 = vpop.permute.xlu1 %1032 }
 0x5a3   :  { %851 = vxpose.xlu1.b32.start [1/2] (short) (narrow) %v2851_v54, 32 }
 0x5a4   :  { %v3040_v57 = vpop.permute.xlu1 %1048 }
 0x5a7   :  { %852 = vxpose.xlu1.b32.end [2/2] (short) (narrow) %v2853_v48, 32 }
 0x5a9   :  { %v943_v24 = vpop.permute.xlu1 %942 }
 0x5ae   :  { %v3042_v21 = vpop.permute.xlu1 %1012 }
 0x5b3   :  { %v3045_v28 = vpop.permute.xlu1 %1066 }
 0x5b8   :  { %v3047_v22 = vpop.permute.xlu1 %1120 }
 0x5bd   :  { %v3049_v12 = vpop.permute.xlu1 %1084 }
 0x5c2   :  { %v3051_v49 = vpop.permute.xlu1 %1176 }
 0x5c5   :  { %2220 = vset.pattern.permute.xlu1 %v3469_v42  ;;  %v3075_v42 = vpop.permute.xlu0 %1244 }
 0x5c6   :  { %3503 = vst [vmem:[#allocation7_spill] sm:$0xff] %v3075_v42 }
 0x5c7   :  { %v3053_v52 = vpop.permute.xlu1 %1192 }
 0x5c9   :  { %v3079_v48 = vpop.permute.xlu0 %1278 }
 0x5ca   :  { %3505 = vst [vmem:[#allocation28_spill] sm:$0xff] %v3079_v48 }
 0x5cc   :  { %v3055_v30 = vpop.permute.xlu1 %1210 }
 0x5cd   :  { %3496 = vst [vmem:[#allocation15_spill] sm:$0xff] %v3055_v30  ;;  %v3083_v29 = vpop.permute.xlu0 %1296 }
 0x5ce   :  { %3507 = vst [vmem:[#allocation30_spill] sm:$0xff] %v3083_v29 }
 0x5d1   :  { %v3057_v23 = vpop.permute.xlu1 %1248  ;;  %v3087_v19 = vpop.permute.xlu0 %1404 }
 0x5d2   :  { %3497 = vst [vmem:[#allocation20_spill] sm:$0xff] %v3057_v23  ;;  %3509 = vst [vmem:[#allocation32_spill] sm:$0xff] %v3087_v19 }
 0x5d6   :  { %v3059_v51 = vpop.permute.xlu1 %1228 }
 0x5d7   :  { %3498 = vst [vmem:[#allocation24_spill] sm:$0xff] %v3059_v51 }
 0x5db   :  { %v3061_v55 = vpop.permute.xlu1 %1282 }
 0x5dc   :  { %3499 = vst [vmem:[#allocation25_spill] sm:$0xff] %v3061_v55 }
 0x5e0   :  { %v3065_v56 = vpop.permute.xlu1 %1336 }
 0x5e1   :  { %3500 = vst [vmem:[#allocation21_spill] sm:$0xff] %v3065_v56 }
 0x5e5   :  { %v3069_v35 = vpop.permute.xlu1 %1300 }
 0x5e6   :  { %3501 = vst [vmem:[#allocation26_spill] sm:$0xff] %v3069_v35 }
 0x5ea   :  { %v3073_v13 = vpop.permute.xlu1 %1392 }
 0x5eb   :  { %3502 = vst [vmem:[#allocation6_spill] sm:$0xff] %v3073_v13 }
 0x5ef   :  { %v3077_v1 = vpop.permute.xlu1 %1408 }
 0x5f0   :  { %3504 = vst [vmem:[#allocation27_spill] sm:$0xff] %v3077_v1 }
 0x5f4   :  { %v3081_v54 = vpop.permute.xlu1 %1426 }
 0x5f5   :  { %3506 = vst [vmem:[#allocation29_spill] sm:$0xff] %v3081_v54 }
 0x5f9   :  { %v3085_v34 = vpop.permute.xlu1 %1444 }
 0x5fa   :  { %3508 = vst [vmem:[#allocation31_spill] sm:$0xff] %v3085_v34  ;;  %v977_v34 = vpop.permute.xlu0 %976 }
 0x623   :  { %v867_v63 = vpop.trf.xlu1 }
 0x624   :  { %v896_v4 = vrot.slane %v867_v63, %v2621_v40  ;;  %v912_v58 = vrot.slane %v867_v63, %v2623_v17  ;;  %v930_v13 = vrot.slane %v867_v63, %v2625_v18  ;;  %v948_v20 = vrot.slane %v867_v63, %v2635_v3 }
 0x625   :  { %v966_v1 = vrot.slane %v867_v63, %v2631_v8  ;;  %v982_v15 = vrot.slane %v867_v63, %v2633_v44  ;;  %v1000_v54 = vrot.slane %v867_v63, %v2646_v41  ;;  %v1018_v56 = vrot.slane %v867_v63, %v2648_v45 }
 0x626   :  { %v897_v19 = vsub.f32 %v2940_v59, %v896_v4  ;;  %v898_v31 = vsub.f32 %v891_v61, %v896_v4  ;;  %v913_v14 = vsub.f32 %v2944_v38, %v912_v58  ;;  %v914_v35 = vsub.f32 %v907_v33, %v912_v58 }
 0x627   :  { %v931_v29 = vsub.f32 %v2956_v50, %v930_v13  ;;  %v932_v55 = vsub.f32 %v925_v32, %v930_v13  ;;  %v949_v48 = vsub.f32 %v2972_v0, %v948_v20  ;;  %v950_v10 = vsub.f32 %v943_v24, %v948_v20  ;;  %v1105_v20 = vpop.permute.xlu0 %1104 }
 0x628   :  { %v899_v23 = vand.u32 2147483647, %v897_v19  ;;  %v900_v42 = vand.u32 2147483647, %v898_v31  ;;  %v915_v51 = vand.u32 2147483647, %v913_v14  ;;  %v967_v26 = vsub.f32 %v2948_v6, %v966_v1 }
 0x629   :  { %v916_v30 = vand.u32 2147483647, %v914_v35  ;;  %v933_v63 = vand.u32 2147483647, %v931_v29  ;;  %v934_v43 = vand.u32 2147483647, %v932_v55  ;;  %v968_v59 = vsub.f32 %v3032_v11, %v966_v1 }
 0x62a   :  { %v917_v4 = vadd.f32 %v915_v51, %v899_v23  ;;  %v951_v61 = vand.u32 2147483647, %v949_v48  ;;  %v952_v38 = vand.u32 2147483647, %v950_v10  ;;  %v969_v58 = vand.u32 2147483647, %v967_v26  ;;  %v868_v10 = vpop.trf.xlu1 }
 0x62b   :  { %v918_v33 = vadd.f32 %v916_v30, %v900_v42  ;;  %v970_v50 = vand.u32 2147483647, %v968_v59  ;;  %v983_v13 = vsub.f32 %v2952_v9, %v982_v15  ;;  %v984_v0 = vsub.f32 %v977_v34, %v982_v15  ;;  %v1139_v55 = vpop.permute.xlu0 %1138 }
 0x62c   :  { %v935_v19 = vadd.f32 %v933_v63, %v917_v4  ;;  %v1001_v14 = vsub.f32 %v2960_v5, %v1000_v54  ;;  %v1002_v6 = vsub.f32 %v3036_v62, %v1000_v54  ;;  %v1019_v29 = vsub.f32 %v2976_v46, %v1018_v56 }
 0x62d   :  { %v936_v31 = vadd.f32 %v934_v43, %v918_v33  ;;  %v985_v32 = vand.u32 2147483647, %v983_v13  ;;  %v986_v1 = vand.u32 2147483647, %v984_v0  ;;  %v1020_v48 = vsub.f32 %v3042_v21, %v1018_v56 }
 0x62e   :  { %v953_v26 = vadd.f32 %v951_v61, %v935_v19  ;;  %v1003_v42 = vand.u32 2147483647, %v1001_v14  ;;  %v1004_v11 = vand.u32 2147483647, %v1002_v6  ;;  %v1021_v24 = vand.u32 2147483647, %v1019_v29 }
 0x62f   :  { %v954_v9 = vadd.f32 %v952_v38, %v936_v31  ;;  %v987_v34 = vadd.f32 %v985_v32, %v969_v58  ;;  %v988_v15 = vadd.f32 %v986_v1, %v970_v50  ;;  %v1022_v30 = vand.u32 2147483647, %v1020_v48  ;;  %v1157_v1 = vpop.permute.xlu0 %1156 }
 0x630   :  { %v1038_v5 = vrot.slane %v868_v10, %v2621_v40  ;;  %v1054_v54 = vrot.slane %v868_v10, %v2623_v17  ;;  %v1072_v46 = vrot.slane %v868_v10, %v2625_v18  ;;  %v1090_v43 = vrot.slane %v868_v10, %v2635_v3 }
 0x631   :  { %v1005_v62 = vadd.f32 %v1003_v42, %v987_v34  ;;  %v1006_v23 = vadd.f32 %v1004_v11, %v988_v15  ;;  %v1110_v21 = vrot.slane %v868_v10, %v2631_v8  ;;  %v1126_v51 = vrot.slane %v868_v10, %v2633_v44  ;;  %v869_v11 = vpop.trf.xlu1 }
 0x632   :  { %v1039_v56 = vsub.f32 %v2964_v25, %v1038_v5  ;;  %v1040_v35 = vsub.f32 %v3038_v16, %v1038_v5  ;;  %v1055_v63 = vsub.f32 %v2968_v60, %v1054_v54  ;;  %v1056_v59 = vsub.f32 %v3040_v57, %v1054_v54 }
 0x633   :  { %v1023_v4 = vadd.f32 %v1021_v24, %v1005_v62  ;;  %v1024_v61 = vadd.f32 %v1022_v30, %v1006_v23  ;;  %v1073_v38 = vsub.f32 %v3063_v27, %v1072_v46  ;;  %v1074_v58 = vsub.f32 %v3045_v28, %v1072_v46 }
 0x634   :  { %v1041_v33 = vand.u32 2147483647, %v1039_v56  ;;  %v1042_v50 = vand.u32 2147483647, %v1040_v35  ;;  %v1057_v13 = vand.u32 2147483647, %v1055_v63  ;;  %v1091_v0 = vsub.f32 %v3067_v39, %v1090_v43  ;;  %v1265_v63 = vpop.permute.xlu0 %1264 }
 0x635   :  { %v1025_v19 = vadd.f32 %v1023_v4, %v953_v26  ;;  %v1026_v14 = vadd.f32 %v1024_v61, %v954_v9  ;;  %v1058_v25 = vand.u32 2147483647, %v1056_v59  ;;  %v1075_v6 = vand.u32 2147483647, %v1073_v38 }
 0x636   :  { %v1059_v16 = vadd.f32 %v1057_v13, %v1041_v33  ;;  %v1076_v29 = vand.u32 2147483647, %v1074_v58  ;;  %v1092_v60 = vsub.f32 %v3049_v12, %v1090_v43  ;;  %v1093_v57 = vand.u32 2147483647, %v1091_v0 }
 0x637   :  { %v1060_v31 = vadd.f32 %v1058_v25, %v1042_v50  ;;  %v1111_v32 = vsub.f32 %v2980_v37, %v1110_v21  ;;  %v1112_v27 = vsub.f32 %v1105_v20, %v1110_v21  ;;  %v1127_v28 = vsub.f32 %v2984_v7, %v1126_v51  ;;  %v3511_v25 = vld [vmem:[#allocation15_spill] sm:$0xff] }
 0x638   :  { %v1077_v48 = vadd.f32 %v1075_v6, %v1059_v16  ;;  %v1094_v42 = vand.u32 2147483647, %v1092_v60  ;;  %v1128_v39 = vsub.f32 %v3047_v22, %v1126_v51  ;;  %v1144_v26 = vrot.slane %v868_v10, %v2646_v41 }
 0x639   :  { %v1078_v24 = vadd.f32 %v1076_v29, %v1060_v31  ;;  %v1113_v9 = vand.u32 2147483647, %v1111_v32  ;;  %v1114_v34 = vand.u32 2147483647, %v1112_v27  ;;  %v1129_v15 = vand.u32 2147483647, %v1127_v28 }
 0x63a   :  { %v1095_v12 = vadd.f32 %v1093_v57, %v1077_v48  ;;  %v1130_v30 = vand.u32 2147483647, %v1128_v39  ;;  %v1145_v5 = vsub.f32 %v2989_v53, %v1144_v26  ;;  %v1146_v37 = vsub.f32 %v1139_v55, %v1144_v26  ;;  %v3512_v29 = vld [vmem:[#allocation22_spill] sm:$0xff]  ;;  %v3513_v57 = vld [vmem:[#allocation24_spill] sm:$0xff] }
 0x63b   :  { %v1096_v20 = vadd.f32 %v1094_v42, %v1078_v24  ;;  %v1131_v54 = vadd.f32 %v1129_v15, %v1113_v9  ;;  %v1162_v7 = vrot.slane %v868_v10, %v2648_v45  ;;  %v1182_v46 = vrot.slane %v869_v11, %v2621_v40 }
 0x63c   :  { %v1097_v43 = vadd.f32 %v1095_v12, %v1025_v19  ;;  %v1132_v22 = vadd.f32 %v1130_v30, %v1114_v34  ;;  %v1147_v62 = vand.u32 2147483647, %v1145_v5  ;;  %v1148_v23 = vand.u32 2147483647, %v1146_v37  ;;  %v3510_v19 = vld [vmem:[#allocation16_spill] sm:$0xff] }
 0x63d   :  { %v1098_v21 = vadd.f32 %v1096_v20, %v1026_v14  ;;  %v1163_v51 = vsub.f32 %v2998_v47, %v1162_v7  ;;  %v1164_v56 = vsub.f32 %v1157_v1, %v1162_v7  ;;  %v1183_v35 = vsub.f32 %v2994_v2, %v1182_v46  ;;  %v3141_v1 = vpop.trf.xlu1  ;;  %v3514_v20 = vld [vmem:[#allocation7_spill] sm:$0xff]  ;;  %v3515_v7 = vld [vmem:[#allocation20_spill] sm:$0xff] }
 0x63e   :  { %v1149_v59 = vadd.f32 %v1147_v62, %v1131_v54  ;;  %v1150_v53 = vadd.f32 %v1148_v23, %v1132_v22  ;;  %v1184_v55 = vsub.f32 %v3051_v49, %v1182_v46  ;;  %v1198_v4 = vrot.slane %v869_v11, %v2623_v17 }
 0x63f   :  { %v1165_v10 = vand.u32 2147483647, %v1163_v51  ;;  %v1166_v61 = vand.u32 2147483647, %v1164_v56  ;;  %v1185_v38 = vand.u32 2147483647, %v1183_v35  ;;  %v1216_v58 = vrot.slane %v869_v11, %v2625_v18 }
 0x640   :  { %v1186_v33 = vand.u32 2147483647, %v1184_v55  ;;  %v1199_v50 = vsub.f32 %v3071_v36, %v1198_v4  ;;  %v1200_v47 = vsub.f32 %v3053_v52, %v1198_v4  ;;  %v1234_v13 = vrot.slane %v869_v11, %v2635_v3  ;;  %v1321_v52 = vpop.permute.xlu0 %1320  ;;  %v3517_v51 = vld [vmem:[#allocation28_spill] sm:$0xff]  ;;  %v3519_v4 = vld [vmem:[#allocation30_spill] sm:$0xff] }
 0x641   :  { %v1167_v2 = vadd.f32 %v1165_v10, %v1149_v59  ;;  %v1168_v0 = vadd.f32 %v1166_v61, %v1150_v53  ;;  %v1217_v14 = vsub.f32 %v3510_v19, %v1216_v58  ;;  %v1218_v49 = vsub.f32 %v3511_v25, %v1216_v58 }
 0x642   :  { %v1201_v6 = vand.u32 2147483647, %v1199_v50  ;;  %v1202_v16 = vand.u32 2147483647, %v1200_v47  ;;  %v1235_v60 = vsub.f32 %v3512_v29, %v1234_v13  ;;  %v1236_v31 = vsub.f32 %v3513_v57, %v1234_v13  ;;  %v3523_v57 = vld [vmem:[#allocation21_spill] sm:$0xff] }
 0x643   :  { %v1169_v32 = vadd.f32 %v1167_v2, %v1097_v43  ;;  %v1170_v27 = vadd.f32 %v1168_v0, %v1098_v21  ;;  %v1219_v28 = vand.u32 2147483647, %v1217_v14  ;;  %v1220_v36 = vand.u32 2147483647, %v1218_v49  ;;  %v3516_v43 = vld [vmem:[#allocation12_spill] sm:$0xff]  ;;  %v3520_v2 = vld [vmem:[#allocation26_spill] sm:$0xff] }
 0x644   :  { %v1203_v48 = vadd.f32 %v1201_v6, %v1185_v38  ;;  %v1204_v42 = vadd.f32 %v1202_v16, %v1186_v33  ;;  %v1237_v39 = vand.u32 2147483647, %v1235_v60  ;;  %v1238_v26 = vand.u32 2147483647, %v1236_v31  ;;  %v1355_v61 = vpop.permute.xlu0 %1354  ;;  %v3521_v14 = vld [vmem:[#allocation14_spill] sm:$0xff]  ;;  %v3522_v6 = vld [vmem:[#allocation23_spill] sm:$0xff] }
 0x645   :  { %v1254_v24 = vrot.slane %v869_v11, %v2631_v8  ;;  %v1270_v9 = vrot.slane %v869_v11, %v2633_v44  ;;  %v1288_v34 = vrot.slane %v869_v11, %v2646_v41  ;;  %v1306_v15 = vrot.slane %v869_v11, %v2648_v45  ;;  %v3518_v11 = vld [vmem:[#allocation25_spill] sm:$0xff] }
 0x646   :  { %v1221_v12 = vadd.f32 %v1219_v28, %v1203_v48  ;;  %v1222_v30 = vadd.f32 %v1220_v36, %v1204_v42  ;;  %v1326_v5 = vrot.slane %v3141_v1, %v2621_v40  ;;  %v1342_v37 = vrot.slane %v3141_v1, %v2623_v17 }
 0x647   :  { %v1255_v54 = vsub.f32 %v3514_v20, %v1254_v24  ;;  %v1256_v46 = vsub.f32 %v3515_v7, %v1254_v24  ;;  %v1271_v22 = vsub.f32 %v3516_v43, %v1270_v9  ;;  %v1272_v62 = vsub.f32 %v1265_v63, %v1270_v9 }
 0x648   :  { %v1239_v23 = vadd.f32 %v1237_v39, %v1221_v12  ;;  %v1240_v21 = vadd.f32 %v1238_v26, %v1222_v30  ;;  %v1289_v56 = vsub.f32 %v3517_v51, %v1288_v34  ;;  %v1290_v35 = vsub.f32 %v3518_v11, %v1288_v34  ;;  %v3524_v26 = vld [vmem:[#allocation13_spill] sm:$0xff]  ;;  %v1373_v34 = vpop.permute.xlu0 %1372 }
 0x649   :  { %v1257_v59 = vand.u32 2147483647, %v1255_v54  ;;  %v1258_v53 = vand.u32 2147483647, %v1256_v46  ;;  %v1273_v55 = vand.u32 2147483647, %v1271_v22  ;;  %v1307_v10 = vsub.f32 %v3519_v4, %v1306_v15 }
 0x64a   :  { %v1241_v38 = vadd.f32 %v1239_v23, %v1169_v32  ;;  %v1242_v58 = vadd.f32 %v1240_v21, %v1170_v27  ;;  %v1274_v33 = vand.u32 2147483647, %v1272_v62  ;;  %v1291_v50 = vand.u32 2147483647, %v1289_v56  ;;  %v3525_v46 = vld [vmem:[#allocation19_spill] sm:$0xff]  ;;  %v3526_v62 = vld [vmem:[#allocation18_spill] sm:$0xff] }
 0x64b   :  { %v1275_v47 = vadd.f32 %v1273_v55, %v1257_v59  ;;  %v1292_v13 = vand.u32 2147483647, %v1290_v35  ;;  %v1308_v63 = vsub.f32 %v3520_v2, %v1306_v15  ;;  %v1309_v0 = vand.u32 2147483647, %v1307_v10  ;;  %v3527_v56 = vld [vmem:[#allocation6_spill] sm:$0xff]  ;;  %v3528_v10 = vld [vmem:[#allocation32_spill] sm:$0xff] }
 0x64c   :  { %v1276_v19 = vadd.f32 %v1274_v33, %v1258_v53  ;;  %v1327_v25 = vsub.f32 %v3521_v14, %v1326_v5  ;;  %v1328_v49 = vsub.f32 %v1321_v52, %v1326_v5  ;;  %v1343_v16 = vsub.f32 %v3522_v6, %v1342_v37  ;;  %v3530_v2 = vld [vmem:[#allocation17_spill] sm:$0xff] }
 0x64d   :  { %v1293_v29 = vadd.f32 %v1291_v50, %v1275_v47  ;;  %v1310_v60 = vand.u32 2147483647, %v1308_v63  ;;  %v1344_v31 = vsub.f32 %v3523_v57, %v1342_v37  ;;  %v1360_v32 = vrot.slane %v3141_v1, %v2625_v18  ;;  %v1441_v50 = vpop.permute.xlu0 %1440 }
 0x64e   :  { %v1294_v27 = vadd.f32 %v1292_v13, %v1276_v19  ;;  %v1329_v28 = vand.u32 2147483647, %v1327_v25  ;;  %v1330_v36 = vand.u32 2147483647, %v1328_v49  ;;  %v1345_v48 = vand.u32 2147483647, %v1343_v16 }
 0x64f   :  { %v1311_v42 = vadd.f32 %v1309_v0, %v1293_v29  ;;  %v1346_v39 = vand.u32 2147483647, %v1344_v31  ;;  %v1361_v24 = vsub.f32 %v3524_v26, %v1360_v32  ;;  %v1362_v9 = vsub.f32 %v1355_v61, %v1360_v32  ;;  %v3532_v49 = vld [vmem:[#allocation31_spill] sm:$0xff] }
 0x650   :  { %v1312_v52 = vadd.f32 %v1310_v60, %v1294_v27  ;;  %v1347_v15 = vadd.f32 %v1345_v48, %v1329_v28  ;;  %v1378_v12 = vrot.slane %v3141_v1, %v2635_v3  ;;  %v1398_v30 = vrot.slane %v3141_v1, %v2631_v8 }
 0x651   :  { %v1313_v5 = vadd.f32 %v1311_v42, %v1241_v38  ;;  %v1348_v37 = vadd.f32 %v1346_v39, %v1330_v36  ;;  %v1363_v20 = vand.u32 2147483647, %v1361_v24  ;;  %v1364_v54 = vand.u32 2147483647, %v1362_v9  ;;  %v3529_v38 = vld [vmem:[#allocation27_spill] sm:$0xff] }
 0x652   :  { %v1314_v7 = vadd.f32 %v1312_v52, %v1242_v58  ;;  %v1379_v43 = vsub.f32 %v3525_v46, %v1378_v12  ;;  %v1380_v22 = vsub.f32 %v1373_v34, %v1378_v12  ;;  %v1399_v23 = vsub.f32 %v3526_v62, %v1398_v30  ;;  %v3533_v34 = vld [vmem:[#allocation9_spill] sm:$0xff] }
 0x653   :  { %v1365_v21 = vadd.f32 %v1363_v20, %v1347_v15  ;;  %v1366_v51 = vadd.f32 %v1364_v54, %v1348_v37  ;;  %v1400_v11 = vsub.f32 %v3527_v56, %v1398_v30  ;;  %v1414_v35 = vrot.slane %v3141_v1, %v2633_v44  ;;  %v3531_v44 = vld [vmem:[#allocation29_spill] sm:$0xff]  ;;  %v3534_v15 = vld [vmem:[#allocation10_spill] sm:$0xff] }
 0x654   :  { %v1381_v59 = vand.u32 2147483647, %v1379_v43  ;;  %v1382_v53 = vand.u32 2147483647, %v1380_v22  ;;  %v1401_v8 = vand.u32 2147483647, %v1399_v23  ;;  %v1432_v55 = vrot.slane %v3141_v1, %v2646_v41 }
 0x655   :  { %v1402_v4 = vand.u32 2147483647, %v1400_v11  ;;  %v1415_v61 = vsub.f32 %v3528_v10, %v1414_v35  ;;  %v1416_v58 = vsub.f32 %v3529_v38, %v1414_v35  ;;  %v1450_v33 = vrot.slane %v3141_v1, %v2648_v45  ;;  %v1541_v46 = vld [vmem:[%s3322_s7] sm:$0xff]  ;;  %v1542_v43 = vld [vmem:[%s3322_s7 + $0x8] sm:$0xff]  ;;  %v1543_v23 = vld [vmem:[%s3322_s7 + $0x10] sm:$0xff] }
 0x656   :  { %v1383_v47 = vadd.f32 %v1381_v59, %v1365_v21  ;;  %v1384_v13 = vadd.f32 %v1382_v53, %v1366_v51  ;;  %v1433_v63 = vsub.f32 %v3530_v2, %v1432_v55  ;;  %v1434_v0 = vsub.f32 %v3531_v44, %v1432_v55  ;;  %v1544_v21 = vld [vmem:[%s3322_s7 + $0x18] sm:$0xff]  ;;  %v3538_v55 = vld [vmem:[#allocation11_spill] sm:$0xff] }
 0x657   :  { %v1417_v19 = vand.u32 2147483647, %v1415_v61  ;;  %v1418_v14 = vand.u32 2147483647, %v1416_v58  ;;  %v1451_v25 = vsub.f32 %v1441_v50, %v1450_v33  ;;  %v1452_v41 = vsub.f32 %v3532_v49, %v1450_v33  ;;  %v3537_v11 = vld [vmem:[#allocation8_spill] sm:$0xff] }
 0x658   :  { %v1435_v29 = vand.u32 2147483647, %v1433_v63  ;;  %v1436_v60 = vand.u32 2147483647, %v1434_v0  ;;  %v1385_v57 = vadd.f32 %v1383_v47, %v1313_v5  ;;  %v1386_v31 = vadd.f32 %v1384_v13, %v1314_v7  ;;  %v1993_v49 = vld [vmem:[%s3323_s8] ss:$0 sm:$0xff] }
 0x659   :  { %v1419_v6 = vadd.f32 %v1417_v19, %v1401_v8  ;;  %v1420_v16 = vadd.f32 %v1418_v14, %v1402_v4  ;;  %v1453_v1 = vand.u32 2147483647, %v1451_v25  ;;  %v1454_v27 = vand.u32 2147483647, %v1452_v41 }
 0x65a   :  { %v3535_v7 = vmov 1   ;;  %v1547_v22 = vpack.c.bf16 %v1542_v43, %v1541_v46  ;;  %v3536_v62 = vmov 0.0   ;;  %v1548_v51 = vpack.c.bf16 %v1544_v21, %v1543_v23 }
 0x65b   :  { %v1437_v32 = vadd.f32 %v1435_v29, %v1419_v6  ;;  %v1438_v45 = vadd.f32 %v1436_v60, %v1420_v16  ;;  %v3540_v23 = vmov 3   ;;  %v3541_v21 = vmov 0  }
 0x65c   :  { %2042 = vmatpush3.bf16.msra.mxu0 %v1547_v22  ;;  %v3539_v22 = vmov 2  }
 0x65d   :  { %v1455_v28 = vadd.f32 %v1453_v1, %v1437_v32  ;;  %v1456_v36 = vadd.f32 %v1454_v27, %v1438_v45  ;;  %2043 = vmatprep.subr.bf16.mxu0 %v3536_v62 }
 0x65f   :  { %v1457_v48 = vadd.f32 %v1455_v28, %v1385_v57  ;;  %v1458_v42 = vadd.f32 %v1456_v36, %v1386_v31 }
 0x660   :  { %2044 = vmatpush3.bf16.msra.mxu0 %v1548_v51 }
 0x661   :  { %v1459_v39 = vmax.f32 %v1457_v48, 0.001  ;;  %v1460_v26 = vmax.f32 %v1458_v42, 0.001 }
 0x663   :  { %2233 = vrcp.f32 %v1459_v39 }
 0x664   :  { %2235 = vrcp.f32 %v1460_v26 }
 0x66d   :  { %v2234_v24 = vpop.eup %2233 }
 0x66e   :  { %v2236_v9 = vpop.eup %2235  ;;  %v1463_v52 = vmul.f32 %v2234_v24, %v3533_v34 }
 0x66f   :  { %v1464_v12 = vmul.f32 %v2236_v9, %v3534_v15 }
 0x671   :  { %v1465_v30 = vpack.c.bf16 %v1464_v12, %v1463_v52 }
 0x673   :  { %2038 = vmatmul.mubr.msk.bf16.vlgmr.msra.gmra.mrb[4].mxu1 %vm717_vm3, %v1465_v30 }
 0x746   :  { %v1504_v5 = vpop.f32.mrb[4].mxu1 }
 0x747   :  { %1513 = vperm.xlu0 %2217, %v1504_v5   ;;  %v2039_v37 = vpop.f32.mrb[5].mxu1 }
 0x748   :  { %v1507_v20 = vpop.f32.mrb[6].mxu1 }
 0x749   :  { %v2040_v54 = vpop.f32.mrb[7].mxu1 }
 0x74b   :  { %1518 = vperm.xlu0 %2217, %v1507_v20  }
 0x74f   :  { %2218 = vset.pattern.permute.xlu0 %v3535_v7 }
 0x7c6   :  { %v1514_v56 = vpop.permute.xlu0 %1513 }
 0x7c7   :  { %v1521_v35 = vmul.f32 %v1514_v56, %v3537_v11 }
 0x7c9   :  { %v1523_v59 = vsub.f32 %v1521_v35, %v1504_v5 }
 0x7ca   :  { %v1519_v53 = vpop.permute.xlu0 %1518 }
 0x7cb   :  { %v1525_v8 = vmul.f32 0.311, %v1523_v59  ;;  %v1522_v4 = vmul.f32 %v1519_v53, %v3538_v55 }
 0x7cd   :  { %v1527_v10 = vsub.f32 %v3537_v11, %v1525_v8  ;;  %v1524_v61 = vsub.f32 %v1522_v4, %v1507_v20 }
 0x7cf   :  { %v1531_v38 = vmin.f32 %v1527_v10, 0.0  ;;  %v1526_v58 = vmul.f32 0.311, %v1524_v61  ;;  %vm1529_vm7 = vcmp.gt.f32.partialorder %v1527_v10, 0.0 }
 0x7d1   :  { %v1533_v33 = vmul.f32 1.442695, %v1531_v38  ;;  %v1528_v50 = vsub.f32 %v3538_v55, %v1526_v58 }
 0x7d3   :  { %2237 = vpow2.f32 %v1533_v33  ;;  %v1532_v47 = vmin.f32 %v1528_v50, 0.0  ;;  %vm1530_vm8 = vcmp.gt.f32.partialorder %v1528_v50, 0.0 }
 0x7d5   :  { %v1535_v13 = vmul.f32 1.442695, %v1532_v47 }
 0x7d7   :  { %2239 = vpow2.f32 %v1535_v13 }
 0x7dd   :  { %v2238_v2 = vpop.eup %2237 }
 0x7de   :  { %v1991_v63 = vadd.f32 -1.0, %v2238_v2 }
 0x7e0   :  { %v1539_v19 = vsel %vm1529_vm7, %v1527_v10, %v1991_v63 }
 0x7e1   :  { %v2240_v44 = vpop.eup %2239 }
 0x7e2   :  { %v1992_v0 = vadd.f32 -1.0, %v2240_v44 }
 0x7e4   :  { %v1540_v14 = vsel %vm1530_vm8, %v1528_v50, %v1992_v0 }
 0x7e5   :  { %v1546_v25 = vpack.c.bf16 %v1540_v14, %v1539_v19 }
 0x7e7   :  { %2046 = vmatmul.mubr.msk.bf16.vlgmr.msra.gmra.mrb[8].mxu0 %vm806_vm6, %v1546_v25  ;;  %vm1832_vm6 = vcmask 23568  }
 0x8ba   :  { %v1592_v41 = vpop.f32.mrb[8].mxu0 }
 0x8bb   :  { %v1593_v6 = vadd.f32 %v1993_v49, %v1592_v41  ;;  %v2047_v16 = vpop.f32.mrb[9].mxu0 }
 0x8bc   :  { %v1595_v29 = vpop.f32.mrb[10].mxu0 }
 0x8bd   :  { %v1596_v60 = vadd.f32 %v1993_v49, %v1595_v29  ;;  %v2048_v57 = vpop.f32.mrb[11].mxu0  ;;  %v1600_v31 = vsel %vm1599_vm9, %v1593_v6, -inf }
 0x8be   :  { %1601 = vmax.xlane.f32.xlu0 %v1600_v31 }
 0x8bf   :  { %v1603_v32 = vsel %vm1599_vm9, %v1596_v60, -inf }
 0x8c0   :  { %1604 = vmax.xlane.f32.xlu1 %v1603_v32 }
 0x94b   :  { %v1602_v45 = vpop.xlane.xlu0 %1601 }
 0x94c   :  { %v1606_v1 = vsub.f32 %v1593_v6, %v1602_v45 }
 0x94d   :  { %v1605_v27 = vpop.xlane.xlu1 %1604 }
 0x94e   :  { %v1608_v28 = vmul.f32 1.442695, %v1606_v1  ;;  %v1607_v36 = vsub.f32 %v1596_v60, %v1605_v27 }
 0x950   :  { %2241 = vpow2.f32 %v1608_v28  ;;  %v1610_v48 = vmul.f32 1.442695, %v1607_v36 }
 0x952   :  { %2243 = vpow2.f32 %v1610_v48 }
 0x95a   :  { %v2242_v42 = vpop.eup %2241 }
 0x95b   :  { %v1612_v39 = vsel %vm1599_vm9, %v2242_v42, 0.0 }
 0x95c   :  { %v2244_v26 = vpop.eup %2243  ;;  %1613 = vadd.xlane.f32.xlu0 %v1612_v39 }
 0x95d   :  { %v1615_v24 = vsel %vm1599_vm9, %v2244_v26, 0.0 }
 0x960   :  { %1616 = vadd.xlane.f32.xlu0 %v1615_v24 }
 0x9e9   :  { %v1614_v9 = vpop.xlane.xlu0 %1613 }
 0x9ea   :  { %2245 = vrcp.f32 %v1614_v9 }
 0x9ed   :  { %v1617_v34 = vpop.xlane.xlu0 %1616 }
 0x9ee   :  { %2247 = vrcp.f32 %v1617_v34 }
 0x9f4   :  { %v2246_v52 = vpop.eup %2245 }
 0x9f5   :  { %v1620_v15 = vmul.f32 %v2246_v52, %v1614_v9 }
 0x9f7   :  { %v1622_v12 = vsub.f32 2.0, %v1620_v15 }
 0x9f8   :  { %v2248_v30 = vpop.eup %2247 }
 0x9f9   :  { %v1624_v5 = vmul.f32 %v2246_v52, %v1622_v12  ;;  %v1621_v37 = vmul.f32 %v2248_v30, %v1617_v34  ;;  %v2249_v52 = vld [vmem:[%s3317_s2] sm:$0xff] }
 0x9fb   :  { %v3211_v20 = vmul.f32 %v2242_v42, %v1624_v5  ;;  %v1623_v54 = vsub.f32 2.0, %v1621_v37  ;;  %v2250_v5 = vld [vmem:[%s3317_s2 + $0x8] sm:$0xff]  ;;  %s2310_s2 = smov 127  }
 0x9fd   :  { %1961 = vst.msk [vmem:[%s3324_s9] sm:$0xff] %vm1599_vm9, %v3211_v20  ;;  %v1625_v46 = vmul.f32 %v2248_v30, %v1623_v54  ;;  %1869 = vperm.xlu1 %2220, %v3211_v20   ;;  %1729 = vperm.xlu0 %2218, %v3211_v20  }
 0x9ff   :  { %v3220_v43 = vmul.f32 %v2244_v26, %v1625_v46 }
 0xa01   :  { %1962 = vst.msk [vmem:[%s3324_s9 + $0x8] sm:$0xff] %vm1599_vm9, %v3220_v43  ;;  %2221 = vset.pattern.permute.xlu1 %v3535_v7  ;;  %2219 = vset.pattern.permute.xlu0 %v3539_v22  ;;  %vm1902_vm9 = vcmask 31768  }
 0xa02   :  { %1799 = vperm.xlu0 %2219, %v3211_v20   ;;  %1733 = vperm.xlu1 %2221, %v3220_v43  }
 0xa06   :  { %1803 = vperm.xlu0 %2219, %v3220_v43  }
 0xa0a   :  { %2222 = vset.pattern.permute.xlu0 %v3540_v23 }
 0xa0b   :  { %1873 = vperm.xlu0 %2222, %v3220_v43  }
 0xa0f   :  { %2223 = vset.pattern.permute.xlu0 %v3541_v21 }
 0xa10   :  { %1662 = vperm.xlu0 %2223, %v3211_v20  }
 0xa14   :  { %1667 = vperm.xlu0 %2223, %v3220_v43  }
 0xa18   :  { %2224 = vset.pattern.permute.xlu0 %v3540_v23 }
 0xa2b   :  { %1628 = vxpose.xlu1.b32.start [1/2] (short) (narrow) %v3211_v20, 8 }
 0xa2f   :  { %1629 = vxpose.xlu1.b32.end [2/2] (short) (narrow) %v3220_v43, 8 }
 0xa7c   :  { %v1730_v7 = vpop.permute.xlu0 %1729  ;;  %v1870_v56 = vpop.permute.xlu1 %1869 }
 0xa81   :  { %v1800_v51 = vpop.permute.xlu0 %1799  ;;  %v1734_v35 = vpop.permute.xlu1 %1733 }
 0xa85   :  { %v1804_v11 = vpop.permute.xlu0 %1803 }
 0xa8a   :  { %v1874_v59 = vpop.permute.xlu0 %1873 }
 0xa8f   :  { %v1663_v50 = vpop.permute.xlu0 %1662 }
 0xa93   :  { %v1668_v2 = vpop.permute.xlu0 %1667 }
 0xaab   :  { %v1644_v53 = vpop.trf.xlu1 }
 0xaac   :  { %v1739_v8 = vrot.slane %v1644_v53, %v2623_v17  ;;  %v1809_v55 = vrot.slane %v1644_v53, %v2625_v18  ;;  %v1879_v4 = vrot.slane %v1644_v53, %v2635_v3  ;;  %v1673_v38 = vrot.slane %v1644_v53, %v2621_v40 }
 0xaae   :  { %vm1747_vm10 = vcmp.gt.f32.partialorder %v1739_v8, %v1734_v35  ;;  %vm1746_vm11 = vcmp.gt.f32.partialorder %v1739_v8, %v1730_v7  ;;  %vm1816_vm12 = vcmp.gt.f32.partialorder %v1809_v55, %v1800_v51  ;;  %vm1886_vm13 = vcmp.gt.f32.partialorder %v1879_v4, %v1870_v56 }
 0xaaf   :  { %v1998_v10 = vsel %vm1747_vm10, 1.0, %v3536_v62  ;;  %v1997_v61 = vsel %vm1746_vm11, 1.0, %v3536_v62  ;;  %v1999_v17 = vsel %vm1816_vm12, 1.0, %v3536_v62  ;;  %v2001_v18 = vsel %vm1886_vm13, 1.0, %v3536_v62 }
 0xab0   :  { %v1755_v58 = vsel %vm717_vm3, %v1998_v10, 0.0  ;;  %v1752_v33 = vsel %vm717_vm3, %v1997_v61, 0.0  ;;  %v1822_v3 = vsel %vm717_vm3, %v1999_v17, 0.0  ;;  %v1674_v47 = vsub.f32 %v1663_v50, %v1673_v38 }
 0xab1   :  { %1756 = vadd.xlane.f32.xlu1 %v1755_v58  ;;  %1753 = vadd.xlane.f32.xlu0 %v1752_v33  ;;  %v1740_v13 = vsub.f32 %v1730_v7, %v1739_v8  ;;  %vm1817_vm14 = vcmp.gt.f32.partialorder %v1809_v55, %v1804_v11  ;;  %v1892_v40 = vsel %vm717_vm3, %v2001_v18, 0.0  ;;  %v1675_v0 = vsub.f32 %v1668_v2, %v1673_v38 }
 0xab2   :  { %v1676_v63 = vand.u32 2147483647, %v1674_v47  ;;  %v1741_v19 = vsub.f32 %v1734_v35, %v1739_v8  ;;  %v2000_v14 = vsel %vm1817_vm14, 1.0, %v3536_v62  ;;  %vm1887_vm15 = vcmp.gt.f32.partialorder %v1879_v4, %v1874_v59 }
 0xab3   :  { %v1742_v44 = vand.u32 2147483647, %v1740_v13  ;;  %v1810_v25 = vsub.f32 %v1800_v51, %v1809_v55  ;;  %v1825_v49 = vsel %vm717_vm3, %v2000_v14, 0.0  ;;  %v1677_v6 = vand.u32 2147483647, %v1675_v0 }
 0xab4   :  { %v1743_v16 = vand.u32 2147483647, %v1741_v19  ;;  %v2002_v29 = vsel %vm1887_vm15, 1.0, %v3536_v62  ;;  %vm1680_vm0 = vcmp.gt.f32.partialorder %v1673_v38, %v1663_v50  ;;  %v1880_v57 = vsub.f32 %v1870_v56, %v1879_v4 }
 0xab5   :  { %1823 = vadd.xlane.f32.xlu0 %v1822_v3  ;;  %v1744_v41 = vadd.f32 %v1742_v44, %v1676_v63  ;;  %v1812_v60 = vand.u32 2147483647, %v1810_v25  ;;  %v1811_v31 = vsub.f32 %v1804_v11, %v1809_v55  ;;  %v1895_v32 = vsel %vm717_vm3, %v2002_v29, 0.0 }
 0xab6   :  { %v1745_v1 = vadd.f32 %v1743_v16, %v1677_v6  ;;  %v1995_v27 = vsel %vm1680_vm0, 1.0, %v3536_v62  ;;  %vm1681_vm1 = vcmp.gt.f32.partialorder %v1673_v38, %v1668_v2  ;;  %v1882_v28 = vand.u32 2147483647, %v1880_v57 }
 0xab7   :  { %v1814_v45 = vadd.f32 %v1812_v60, %v1744_v41  ;;  %v1813_v36 = vand.u32 2147483647, %v1811_v31  ;;  %v1881_v48 = vsub.f32 %v1874_v59, %v1879_v4  ;;  %v1686_v42 = vsel %vm717_vm3, %v1995_v27, 0.0 }
 0xab8   :  { %v1996_v24 = vsel %vm1681_vm1, 1.0, %v3536_v62 }
 0xab9   :  { %1893 = vadd.xlane.f32.xlu0 %v1892_v40  ;;  %v1884_v39 = vadd.f32 %v1882_v28, %v1814_v45  ;;  %v1815_v26 = vadd.f32 %v1813_v36, %v1745_v1  ;;  %v1883_v9 = vand.u32 2147483647, %v1881_v48  ;;  %v1689_v34 = vsel %vm717_vm3, %v1996_v24, 0.0 }
 0xabb   :  { %v1938_v15 = vmul.f32 %v2249_v52, %v1884_v39  ;;  %v1885_v12 = vadd.f32 %v1883_v9, %v1815_v26 }
 0xabd   :  { %1826 = vadd.xlane.f32.xlu0 %v1825_v49  ;;  %v1940_v30 = vsel %vm717_vm3, %v1938_v15, 0.0  ;;  %v1939_v37 = vmul.f32 %v2250_v5, %v1885_v12 }
 0xabf   :  { %v1943_v62 = vsel %vm717_vm3, %v1939_v37, 0.0 }
 0xac1   :  { %1896 = vadd.xlane.f32.xlu0 %v1895_v32 }
 0xac5   :  { %1687 = vadd.xlane.f32.xlu0 %v1686_v42 }
 0xac9   :  { %1690 = vadd.xlane.f32.xlu0 %v1689_v34 }
 0xacd   :  { %1941 = vadd.xlane.f32.xlu0 %v1940_v30 }
 0xad1   :  { %1944 = vadd.xlane.f32.xlu0 %v1943_v62 }
 0xb3e   :  { %v1757_v54 = vpop.xlane.xlu1 %1756  ;;  %v1754_v46 = vpop.xlane.xlu0 %1753 }
 0xb3f   :  { %vm1759_vm4 = vcmp.le.f32.partialorder %v1757_v54, 4.0  ;;  %vm1758_vm5 = vcmp.le.f32.partialorder %v1754_v46, 4.0 }
 0xb40   :  { %v1761_v22 = vsel %vm1759_vm4, %v3220_v43, 2.0  ;;  %v1760_v23 = vsel %vm1758_vm5, %v3211_v20, 2.0  ;;  %vm1696_vm4 = vcmask 7168  }
 0xb41   :  { %v1764_v21 = vsel %vm1762_vm2, %v1761_v22, inf  ;;  %v1763_v7 = vsel %vm1762_vm2, %v1760_v23, inf }
 0xb42   :  { %v1765_v51 = vmin.f32 %v1763_v7, %v1764_v21  ;;  %v1824_v56 = vpop.xlane.xlu0 %1823 }
 0xb43   :  { %vm1828_vm3 = vcmp.le.f32.partialorder %v1824_v56, 4.0 }
 0xb44   :  { %v1766_v11 = vrot.slane %v1765_v51, 4  ;;  %v1830_v55 = vsel %vm1828_vm3, %v3211_v20, 2.0 }
 0xb45   :  { %v1833_v38 = vsel %vm1832_vm6, %v1830_v55, inf }
 0xb46   :  { %v1767_v35 = vmin.f32 %v1765_v51, %v1766_v11  ;;  %v1894_v59 = vpop.xlane.xlu0 %1893 }
 0xb47   :  { %vm1898_vm7 = vcmp.le.f32.partialorder %v1894_v59, 4.0 }
 0xb48   :  { %v1768_v53 = vrot.slane %v1767_v35, 2  ;;  %v1900_v50 = vsel %vm1898_vm7, %v3211_v20, 2.0 }
 0xb49   :  { %v1903_v40 = vsel %vm1902_vm9, %v1900_v50, inf }
 0xb4a   :  { %v1769_v8 = vmin.f32 %v1767_v35, %v1768_v53  ;;  %v1827_v4 = vpop.xlane.xlu0 %1826 }
 0xb4b   :  { %vm1829_vm8 = vcmp.le.f32.partialorder %v1827_v4, 4.0 }
 0xb4c   :  { %v1770_v10 = vrot.slane %v1769_v8, 1  ;;  %v1831_v61 = vsel %vm1829_vm8, %v3220_v43, 2.0 }
 0xb4d   :  { %v1834_v58 = vsel %vm1832_vm6, %v1831_v61, inf }
 0xb4e   :  { %v1771_v33 = vmin.f32 %v1769_v8, %v1770_v10  ;;  %v1835_v17 = vmin.f32 %v1833_v38, %v1834_v58  ;;  %v1897_v3 = vpop.xlane.xlu0 %1896 }
 0xb4f   :  { %vm1899_vm10 = vcmp.le.f32.partialorder %v1897_v3, 4.0 }
 0xb50   :  { %v1772_v18 = vsub.f32 %v3211_v20, %v1771_v33  ;;  %v1773_v47 = vsub.f32 %v3220_v43, %v1771_v33  ;;  %v1836_v13 = vrot.slane %v1835_v17, 4  ;;  %v1901_v2 = vsel %vm1899_vm10, %v3220_v43, 2.0 }
 0xb51   :  { %v1904_v63 = vsel %vm1902_vm9, %v1901_v2, inf }
 0xb52   :  { %vm1774_vm11 = vcmp.ge.f32.partialorder %v1772_v18, 0.0  ;;  %vm1775_vm12 = vcmp.ge.f32.partialorder %v1773_v47, 0.0  ;;  %v1776_v44 = vmul.f32 3.0, %v1772_v18  ;;  %v1777_v0 = vmul.f32 3.0, %v1773_v47 }
 0xb53   :  { %v1778_v19 = vsub.f32 0.0, %v1772_v18  ;;  %v1779_v14 = vsub.f32 0.0, %v1773_v47  ;;  %v1837_v25 = vmin.f32 %v1835_v17, %v1836_v13  ;;  %v1905_v49 = vmin.f32 %v1903_v40, %v1904_v63  ;;  %v1688_v63 = vpop.xlane.xlu0 %1687 }
 0xb55   :  { %v1838_v41 = vrot.slane %v1837_v25, 2  ;;  %v1906_v6 = vrot.slane %v1905_v49, 4  ;;  %v1780_v16 = vsel %vm1774_vm11, %v1776_v44, %v1778_v19  ;;  %v1781_v29 = vsel %vm1775_vm12, %v1777_v0, %v1779_v14 }
 0xb56   :  { %v1784_v60 = vsel %vm1762_vm2, %v1780_v16, 0.0  ;;  %v1785_v32 = vsel %vm1762_vm2, %v1781_v29, 0.0  ;;  %vm1692_vm2 = vcmp.le.f32.partialorder %v1688_v63, 4.0 }
 0xb57   :  { %v1839_v57 = vmin.f32 %v1837_v25, %v1838_v41  ;;  %v1907_v31 = vmin.f32 %v1905_v49, %v1906_v6  ;;  %v1786_v45 = vadd.f32 %v1785_v32, %v1784_v60  ;;  %v1691_v44 = vpop.xlane.xlu0 %1690  ;;  %v1694_v19 = vsel %vm1692_vm2, %v3211_v20, 2.0 }
 0xb58   :  { %vm1693_vm1 = vcmp.le.f32.partialorder %v1691_v44, 4.0  ;;  %v1697_v25 = vsel %vm1696_vm4, %v1694_v19, inf }
 0xb59   :  { %v1840_v1 = vrot.slane %v1839_v57, 1  ;;  %v1908_v27 = vrot.slane %v1907_v31, 2  ;;  %v1787_v28 = vrot.slane %v1786_v45, 4  ;;  %v1695_v0 = vsel %vm1693_vm1, %v3220_v43, 2.0 }
 0xb5a   :  { %v1698_v14 = vsel %vm1696_vm4, %v1695_v0, inf }
 0xb5b   :  { %v1841_v36 = vmin.f32 %v1839_v57, %v1840_v1  ;;  %v1909_v48 = vmin.f32 %v1907_v31, %v1908_v27  ;;  %v1788_v42 = vadd.f32 %v1787_v28, %v1786_v45  ;;  %v1699_v49 = vmin.f32 %v1697_v25, %v1698_v14 }
 0xb5d   :  { %v1842_v39 = vsub.f32 %v3211_v20, %v1841_v36  ;;  %v1843_v26 = vsub.f32 %v3220_v43, %v1841_v36  ;;  %v1910_v24 = vrot.slane %v1909_v48, 1  ;;  %v1789_v9 = vrot.slane %v1788_v42, 2 }
 0xb5e   :  { %v1700_v41 = vrot.slane %v1699_v49, 4 }
 0xb5f   :  { %vm1844_vm13 = vcmp.ge.f32.partialorder %v1842_v39, 0.0  ;;  %v1846_v34 = vmul.f32 3.0, %v1842_v39  ;;  %v1847_v52 = vmul.f32 3.0, %v1843_v26  ;;  %vm1845_vm14 = vcmp.ge.f32.partialorder %v1843_v26, 0.0 }
 0xb60   :  { %v1848_v15 = vsub.f32 0.0, %v1842_v39  ;;  %v1849_v12 = vsub.f32 0.0, %v1843_v26  ;;  %v1911_v30 = vmin.f32 %v1909_v48, %v1910_v24  ;;  %v1790_v5 = vadd.f32 %v1789_v9, %v1788_v42  ;;  %v1942_v42 = vpop.xlane.xlu0 %1941 }
 0xb61   :  { %v1701_v6 = vmin.f32 %v1699_v49, %v1700_v41 }
 0xb62   :  { %v1912_v37 = vsub.f32 %v3211_v20, %v1911_v30  ;;  %v1913_v62 = vsub.f32 %v3220_v43, %v1911_v30  ;;  %v1850_v54 = vsel %vm1844_vm13, %v1846_v34, %v1848_v15  ;;  %v1791_v46 = vrot.slane %v1790_v5, 1 }
 0xb63   :  { %v1851_v22 = vsel %vm1845_vm14, %v1847_v52, %v1849_v12  ;;  %v1854_v7 = vsel %vm1832_vm6, %v1850_v54, 0.0  ;;  %v1702_v16 = vrot.slane %v1701_v6, 2 }
 0xb64   :  { %vm1914_vm15 = vcmp.ge.f32.partialorder %v1912_v37, 0.0  ;;  %v1916_v23 = vmul.f32 3.0, %v1912_v37  ;;  %v1917_v21 = vmul.f32 3.0, %v1913_v62  ;;  %vm1915_vm0 = vcmp.ge.f32.partialorder %v1913_v62, 0.0  ;;  %v1945_v9 = vpop.xlane.xlu0 %1944 }
 0xb65   :  { %v1918_v51 = vsub.f32 0.0, %v1912_v37  ;;  %v1919_v56 = vsub.f32 0.0, %v1913_v62  ;;  %v1792_v11 = vadd.f32 %v1791_v46, %v1790_v5  ;;  %v1855_v35 = vsel %vm1832_vm6, %v1851_v22, 0.0 }
 0xb66   :  { %v1856_v59 = vadd.f32 %v1855_v35, %v1854_v7  ;;  %v1703_v29 = vmin.f32 %v1701_v6, %v1702_v16  ;;  %v1946_v34 = vadd.f32 %v1945_v9, %v1942_v42  ;;  %vm1963_vm6 = vcmask 0  }
 0xb67   :  { %v1920_v53 = vsel %vm1914_vm15, %v1916_v23, %v1918_v51  ;;  %1794 = vrot.lane.b32.xlu0 %v1792_v11, %s2310_s2  ;;  %v1921_v8 = vsel %vm1915_vm0, %v1917_v21, %v1919_v56  ;;  %v1953_v11 = vstv %s3315_s0 }
 0xb68   :  { %v1924_v55 = vsel %vm1902_vm9, %v1920_v53, 0.0  ;;  %v1857_v4 = vrot.slane %v1856_v59, 4  ;;  %v1925_v10 = vsel %vm1902_vm9, %v1921_v8, 0.0  ;;  %v1704_v60 = vrot.slane %v1703_v29, 1 }
 0xb69   :  { %v1926_v38 = vadd.f32 %v1925_v10, %v1924_v55 }
 0xb6a   :  { %v1858_v61 = vadd.f32 %v1857_v4, %v1856_v59  ;;  %v1705_v57 = vmin.f32 %v1703_v29, %v1704_v60 }
 0xb6b   :  { %v1927_v33 = vrot.slane %v1926_v38, 4 }
 0xb6c   :  { %v1859_v58 = vrot.slane %v1858_v61, 2  ;;  %v1706_v31 = vsub.f32 %v3211_v20, %v1705_v57  ;;  %v1707_v32 = vsub.f32 %v3220_v43, %v1705_v57  ;;  %v1947_v20 = vrot.slane %v1946_v34, 4 }
 0xb6d   :  { %v1928_v17 = vadd.f32 %v1927_v33, %v1926_v38 }
 0xb6e   :  { %v1860_v50 = vadd.f32 %v1859_v58, %v1858_v61  ;;  %v1710_v45 = vmul.f32 3.0, %v1706_v31  ;;  %v1711_v1 = vmul.f32 3.0, %v1707_v32  ;;  %v1712_v27 = vsub.f32 0.0, %v1706_v31 }
 0xb6f   :  { %v1929_v18 = vrot.slane %v1928_v17, 2  ;;  %v1713_v28 = vsub.f32 0.0, %v1707_v32  ;;  %vm1708_vm5 = vcmp.ge.f32.partialorder %v1706_v31, 0.0  ;;  %vm1709_vm3 = vcmp.ge.f32.partialorder %v1707_v32, 0.0 }
 0xb70   :  { %v1861_v3 = vrot.slane %v1860_v50, 1  ;;  %v1714_v36 = vsel %vm1708_vm5, %v1710_v45, %v1712_v27  ;;  %v1948_v43 = vadd.f32 %v1947_v20, %v1946_v34 }
 0xb71   :  { %v1930_v13 = vadd.f32 %v1929_v18, %v1928_v17  ;;  %v1715_v48 = vsel %vm1709_vm3, %v1711_v1, %v1713_v28  ;;  %v1718_v39 = vsel %vm1696_vm4, %v1714_v36, 0.0 }
 0xb72   :  { %v1862_v47 = vadd.f32 %v1861_v3, %v1860_v50  ;;  %v1719_v26 = vsel %vm1696_vm4, %v1715_v48, 0.0  ;;  %v1949_v30 = vrot.slane %v1948_v43, 2 }
 0xb73   :  { %v1931_v2 = vrot.slane %v1930_v13, 1  ;;  %v1720_v24 = vadd.f32 %v1719_v26, %v1718_v39 }
 0xb74   :  { %1864 = vrot.lane.b32.xlu1 %v1862_v47, %s2311_s22  ;;  %v1950_v37 = vadd.f32 %v1949_v30, %v1948_v43 }
 0xb75   :  { %v1932_v40 = vadd.f32 %v1931_v2, %v1930_v13  ;;  %v1721_v52 = vrot.slane %v1720_v24, 4 }
 0xb76   :  { %v1951_v46 = vrot.slane %v1950_v37, 1 }
 0xb77   :  { %v1722_v15 = vadd.f32 %v1721_v52, %v1720_v24 }
 0xb78   :  { %1934 = vrot.lane.b32.xlu1 %v1932_v40, %s2312_s23  ;;  %v1952_v7 = vadd.f32 %v1951_v46, %v1950_v37 }
 0xb79   :  { %v1723_v12 = vrot.slane %v1722_v15, 2 }
 0xb7a   :  { %v1954_v53 = vmul.f32 %v1953_v11, %v1952_v7 }
 0xb7b   :  { %v1724_v5 = vadd.f32 %v1723_v12, %v1722_v15 }
 0xb7c   :  { %v1958_v4 = vmul.f32 0.785, %v1954_v53 }
 0xb7d   :  { %v1725_v62 = vrot.slane %v1724_v5, 1 }
 0xb7f   :  { %v1726_v22 = vadd.f32 %v1725_v62, %v1724_v5 }
 0xbd9   :  { %v1795_v54 = vpop.permute.xlu0 %1794 }
 0xbda   :  { %v1797_v21 = vadd.f32 %v1795_v54, %v1726_v22 }
 0xbe6   :  { %v1865_v23 = vpop.permute.xlu1 %1864 }
 0xbe7   :  { %v1867_v51 = vadd.f32 %v1865_v23, %v1797_v21 }
 0xbea   :  { %v1935_v56 = vpop.permute.xlu1 %1934 }
 0xbeb   :  { %v1937_v35 = vadd.f32 %v1935_v56, %v1867_v51 }
 0xbed   :  { %v1955_v59 = vsub.f32 48.0, %v1937_v35 }
 0xbef   :  { %v1957_v8 = vmul.f32 0.020833334, %v1955_v59 }
 0xbf1   :  { %v1959_v55 = vmul.f32 0.514, %v1957_v8 }
 0xbf3   :  { %v1960_v10 = vadd.f32 %v1959_v55, %v1958_v4 }
 0xbf5   :  { %1964 = vst.msk [vmem:[#allocation3] sm:$0x1] %vm1963_vm6, %v1960_v10 }
 0xbf6   :  { %2262 = shalt.err (!%p2259_p4)
}
 0xbf7   :  { %s2263_s30 = scalar_lea.hbm %s3325_s10, 16 }
 0xbf8   :  { %p2264_p5 = scmp.ne.s32.totalorder %s3325_s10, %s2263_s30  ;;  %p2267_p6 = scmp.lt.u32.totalorder %s2263_s30, %s3325_s10 }
 0xbfa   :  { %p2269_p7 = pnand %p2267_p6, %p2264_p5 }
 0xbfc   :  { %2272 = shalt.err (!%p2269_p7)
}
 0xbfd   :  { %1976 = dma.vmem_to_hbm [thread:$0]  %s1974_s27, 16, %s3325_s10, [#allocation4]  }
 0xbfe   :  { %2273 = dma.done.wait [#allocation4], 16  }
 0xbff   :  { %2274 = vsyncadd [#allocation4], 4294967280 }
 0xc00   :  { %1982 = vsyncpa [#allocation4], 1 }

</bundles_post_ra>
